<compile_context>
chip_gen: v7x
topology: tpu7x:2x2x1
jax: 0.10.0
libtpu: 0.0.40
codegen_flags: <defaults>
</compile_context>

<pallas_src>
import functools
from math import sqrt

import jax
import jax.numpy as jnp
from jax.experimental import pallas as pl
from jax.experimental.pallas import tpu as pltpu


# ----------------------------------------------------------------------------
# Conv (KxK, stride 1, "same" for 3x3) + folded BatchNorm + SiLU, NHWC layout.
# Whole-array kernel (single invocation); conv done as KH*KW shifted matmuls.
# ----------------------------------------------------------------------------
def _conv_bn_silu_kernel(x_ref, w_ref, scale_ref, bias_ref, o_ref, *, KH, KW, H, W):
    B = o_ref.shape[0]
    Cout = o_ref.shape[3]
    Cin = x_ref.shape[3]

    x = x_ref[...].astype(jnp.float32)          # (B, H+KH-1, W+KW-1, Cin)
    w = w_ref[...].astype(jnp.float32)          # (KH, KW, Cin, Cout)

    acc = jnp.zeros((B * H * W, Cout), jnp.float32)
    for dy in range(KH):                        # static loops (KH*KW matmuls)
        for dx in range(KW):
            slab = x[:, dy:dy + H, dx:dx + W, :].reshape(B * H * W, Cin)
            acc = acc + jnp.dot(slab, w[dy, dx], preferred_element_type=jnp.float32)

    y = acc * scale_ref[...] + bias_ref[...]    # folded eval-mode BatchNorm
    y = y * jax.nn.sigmoid(y)                   # SiLU
    o_ref[...] = y.reshape(B, H, W, Cout).astype(o_ref.dtype)


def conv_bn_silu(x, conv_params):
    """x: (B, H, W, Cin) NHWC.  conv_params = (w[KH,KW,Cin,Cout], scale[1,Cout], bias[1,Cout])."""
    w, scale, bias = conv_params
    KH, KW, _, Cout = w.shape
    B, H, W, _ = x.shape
    if KH > 1 or KW > 1:                        # PyTorch padding=1 for the 3x3 convs
        x = jnp.pad(x, ((0, 0), (KH // 2, KH // 2), (KW // 2, KW // 2), (0, 0)))
    kernel = functools.partial(_conv_bn_silu_kernel, KH=KH, KW=KW, H=H, W=W)
    return pl.pallas_call(
        kernel,
        out_shape=jax.ShapeDtypeStruct((B, H, W, Cout), x.dtype),
    )(x, w, scale, bias)


# ----------------------------------------------------------------------------
# Fused depth-layer Transformer kernel.
#   grid = (batch_blocks, depth); the running activation lives in x_scr (VMEM)
#   across the depth axis; per-layer weights are selected by index_map.
# ----------------------------------------------------------------------------
def _transformer_kernel(x_ref,
                        g1_ref, b1_ref,            # LayerNorm 1
                        wq_ref, wk_ref, wv_ref,    # (1, heads, D, dh) each (scale folded in Wq)
                        wo_ref, bo_ref,            # (1, heads, dh, D), (1, 1, D)
                        g2_ref, b2_ref,            # LayerNorm 2
                        w1_ref, bb1_ref,           # (1, D, mlp), (1, 1, mlp)
                        w2_ref, bb2_ref,           # (1, mlp, D), (1, 1, D)
                        o_ref,
                        x_scr,                     # VMEM (Bb*N, D) f32 resident activation
                        *, heads, dim_head):
    l = pl.program_id(1)
    bb, ntok, d = x_ref.shape

    @pl.when(l == 0)
    def _():
        x_scr[...] = x_ref[...].reshape(x_scr.shape).astype(jnp.float32)

    x = x_scr[...]                                  # (M, D) f32, M = bb * ntok

    def layer_norm(z, g, b):
        mu = jnp.mean(z, axis=-1, keepdims=True)
        zc = z - mu
        var = jnp.mean(zc * zc, axis=-1, keepdims=True)
        return zc * jax.lax.rsqrt(var + 1e-5) * g + b

    # ---- pre-norm multi-head attention --------------------------------------
    xn = layer_norm(x, g1_ref[0], b1_ref[0])        # (M, D)
    wq = wq_ref[0]                                  # (heads, D, dh), scale pre-folded
    wk = wk_ref[0]
    wv = wv_ref[0]
    wo = wo_ref[0]                                  # (heads, dh, D)

    attn_acc = jnp.zeros_like(x)                    # (M, D) f32 accumulator
    for h in range(heads):                          # static head loop, no concat
        qh = jnp.dot(xn, wq[h], preferred_element_type=jnp.float32)   # (M, dh)
        kh = jnp.dot(xn, wk[h], preferred_element_type=jnp.float32)
        vh = jnp.dot(xn, wv[h], preferred_element_type=jnp.float32)
        qb = qh.reshape(bb, ntok, dim_head)
        kb = kh.reshape(bb, ntok, dim_head)
        vb = vh.reshape(bb, ntok, dim_head)
        dots = jnp.einsum('bnd,bmd->bnm', qb, kb,
                          preferred_element_type=jnp.float32)          # (bb, N, N)
        dots = dots - jnp.max(dots, axis=-1, keepdims=True)
        e = jnp.exp(dots)
        p = e * pl.reciprocal(jnp.sum(e, axis=-1, keepdims=True), approx=True)
        oh = jnp.einsum('bnm,bmd->bnd', p, vb,
                        preferred_element_type=jnp.float32)            # (bb, N, dh)
        attn_acc = attn_acc + jnp.dot(oh.reshape(bb * ntok, dim_head), wo[h],
                                      preferred_element_type=jnp.float32)
    x = x + attn_acc + bo_ref[0]                    # residual

    # ---- pre-norm feed-forward ----------------------------------------------
    xn2 = layer_norm(x, g2_ref[0], b2_ref[0])
    h1 = jnp.dot(xn2, w1_ref[0], preferred_element_type=jnp.float32) + bb1_ref[0]
    h1 = jax.nn.gelu(h1, approximate=False)          # exact erf GELU (matches nn.GELU())
    ff = jnp.dot(h1, w2_ref[0], preferred_element_type=jnp.float32) + bb2_ref[0]
    x = x + ff                                       # residual

    x_scr[...] = x                                   # stays resident for next layer

    @pl.when(l == pl.num_programs(1) - 1)
    def _():
        o_ref[...] = x.reshape(o_ref.shape).astype(o_ref.dtype)


def transformer_forward(tokens, tp, *, heads, dim_head):
    """tokens: (B_eff, N, D).  tp: dict of depth-stacked parameter arrays."""
    B_eff, N, D = tokens.shape
    depth = tp['wq'].shape[0]
    scale = dim_head ** (-0.5)
    wq_scaled = tp['wq'] * scale                     # fold attention scale into Wq (once)

    b_blocks = 2 if (B_eff % 2 == 0 and B_eff >= 2) else 1   # >=2 parallel blocks for v7x megacore
    Bb = B_eff // b_blocks

    def wspec(arr):
        n_rest = arr.ndim - 1
        return pl.BlockSpec((1,) + arr.shape[1:],
                            lambda b, l, _n=n_rest: (l,) + (0,) * _n)

    in_arrays = [tokens, tp['g1'], tp['b1'], wq_scaled, tp['wk'], tp['wv'],
                 tp['wo'], tp['bo'], tp['g2'], tp['b2'],
                 tp['w1'], tp['bb1'], tp['w2'], tp['bb2']]
    in_specs = [pl.BlockSpec((Bb, N, D), lambda b, l: (b, 0, 0))] + \
               [wspec(a) for a in in_arrays[1:]]

    kernel = functools.partial(_transformer_kernel, heads=heads, dim_head=dim_head)

    return pl.pallas_call(
        kernel,
        out_shape=jax.ShapeDtypeStruct((B_eff, N, D), tokens.dtype),
        grid_spec=pltpu.PrefetchScalarGridSpec(
            num_scalar_prefetch=0,
            grid=(b_blocks, depth),
            in_specs=in_specs,
            out_specs=pl.BlockSpec((Bb, N, D), lambda b, l: (b, 0, 0)),
            scratch_shapes=[pltpu.VMEM((Bb * N, D), jnp.float32)],
        ),
        compiler_params=pltpu.CompilerParams(
            dimension_semantics=("parallel", "arbitrary")),
    )(*in_arrays)


# ----------------------------------------------------------------------------
# Full MobileViTBlock forward (inference).  x: (B, C, H, W) NCHW like PyTorch.
# Rearranges / pad / channel-concat are wrapper-level layout plumbing.
# ----------------------------------------------------------------------------
def mobilevit_block_forward(x_nchw, params, *, patch_size, heads, dim_head):
    ph, pw = patch_size
    x = jnp.transpose(x_nchw, (0, 2, 3, 1))          # NHWC (channels on lane axis)
    y0 = x                                           # skip branch (torch: x.clone())

    x = conv_bn_silu(x, params['conv1'])             # 3x3 conv + BN + SiLU
    x = conv_bn_silu(x, params['conv2'])             # 1x1 conv + BN + SiLU -> dim

    B, H, W, D = x.shape
    h, w = H // ph, W // pw
    # 'b d (h ph) (w pw) -> b (ph pw) (h w) d', with (b, ph*pw) folded into the batch
    t = jnp.transpose(x.reshape(B, h, ph, w, pw, D), (0, 2, 4, 1, 3, 5))
    t = t.reshape(B * ph * pw, h * w, D)

    t = transformer_forward(t, params['transformer'], heads=heads, dim_head=dim_head)

    # inverse rearrange back to NHWC
    x = jnp.transpose(t.reshape(B, ph, pw, h, w, D), (0, 3, 1, 4, 2, 5)).reshape(B, H, W, D)

    x = conv_bn_silu(x, params['conv3'])             # 1x1 conv + BN + SiLU -> channel
    x = jnp.concatenate([x, y0], axis=-1)            # torch.cat((x, y), dim=1)
    x = conv_bn_silu(x, params['conv4'])             # 3x3 conv + BN + SiLU
    return jnp.transpose(x, (0, 3, 1, 2))            # back to NCHW


# ----------------------------------------------------------------------------
# Deterministic synthetic parameters (no checkpoint).  Eval-mode BN is folded.
# TODO(synk): dropout layers are inference no-ops and are omitted.
# ----------------------------------------------------------------------------
def _init_conv_bn(key, kh, kw, cin, cout):
    k1, k2, k3, k4, k5 = jax.random.split(key, 5)
    w = jax.random.normal(k1, (kh, kw, cin, cout), jnp.float32) / sqrt(kh * kw * cin)
    gamma = 1.0 + 0.1 * jax.random.normal(k2, (cout,), jnp.float32)
    beta = 0.1 * jax.random.normal(k3, (cout,), jnp.float32)
    mean = 0.1 * jax.random.normal(k4, (cout,), jnp.float32)
    var = 1.0 + 0.1 * jnp.abs(jax.random.normal(k5, (cout,), jnp.float32))
    scale = gamma * jax.lax.rsqrt(var + 1e-5)
    bias = beta - mean * scale
    return w, scale.reshape(1, cout), bias.reshape(1, cout)


def _init_transformer(key, *, depth, dim, heads, dim_head, mlp_dim):
    dh = dim_head
    ks = jax.random.split(key, 13)

    def nrm(k, shape, fan_in):
        return jax.random.normal(k, shape, jnp.float32) / sqrt(fan_in)

    return dict(
        g1=1.0 + 0.05 * jax.random.normal(ks[0], (depth, 1, dim), jnp.float32),
        b1=0.05 * jax.random.normal(ks[1], (depth, 1, dim), jnp.float32),
        wq=nrm(ks[2], (depth, heads, dim, dh), dim),
        wk=nrm(ks[3], (depth, heads, dim, dh), dim),
        wv=nrm(ks[4], (depth, heads, dim, dh), dim),
        wo=nrm(ks[5], (depth, heads, dh, dim), heads * dh),
        bo=0.05 * jax.random.normal(ks[6], (depth, 1, dim), jnp.float32),
        g2=1.0 + 0.05 * jax.random.normal(ks[7], (depth, 1, dim), jnp.float32),
        b2=0.05 * jax.random.normal(ks[8], (depth, 1, dim), jnp.float32),
        w1=nrm(ks[9], (depth, dim, mlp_dim), dim),
        bb1=0.05 * jax.random.normal(ks[10], (depth, 1, mlp_dim), jnp.float32),
        w2=nrm(ks[11], (depth, mlp_dim, dim), mlp_dim),
        bb2=0.05 * jax.random.normal(ks[12], (depth, 1, dim), jnp.float32),
    )


# ----------------------------------------------------------------------------
# Pure-JAX reference of the same forward pass (for a sanity check).
# ----------------------------------------------------------------------------
def _conv_bn_silu_ref(x, conv_params):
    w, scale, bias = conv_params
    KH, KW = w.shape[0], w.shape[1]
    y = jax.lax.conv_general_dilated(
        x, w, window_strides=(1, 1),
        padding=[(KH // 2, KH // 2), (KW // 2, KW // 2)],
        dimension_numbers=('NHWC', 'HWIO', 'NHWC'))
    y = y * scale[0] + bias[0]
    return jax.nn.silu(y)


def _transformer_ref(x, tp, *, heads, dim_head):
    depth = tp['wq'].shape[0]
    scale = dim_head ** (-0.5)

    def ln(z, g, b):
        mu = jnp.mean(z, -1, keepdims=True)
        var = jnp.mean((z - mu) ** 2, -1, keepdims=True)
        return (z - mu) / jnp.sqrt(var + 1e-5) * g + b

    for l in range(depth):
        xn = ln(x, tp['g1'][l], tp['b1'][l])
        q = jnp.einsum('bnd,hde->bhne', xn, tp['wq'][l])
        k = jnp.einsum('bnd,hde->bhne', xn, tp['wk'][l])
        v = jnp.einsum('bnd,hde->bhne', xn, tp['wv'][l])
        dots = jnp.einsum('bhne,bhme->bhnm', q, k) * scale
        attn = jax.nn.softmax(dots, axis=-1)
        o = jnp.einsum('bhnm,bhme->bhne', attn, v)
        x = x + jnp.einsum('bhne,hed->bnd', o, tp['wo'][l]) + tp['bo'][l]
        xn2 = ln(x, tp['g2'][l], tp['b2'][l])
        hh = jax.nn.gelu(xn2 @ tp['w1'][l] + tp['bb1'][l], approximate=False)
        x = x + hh @ tp['w2'][l] + tp['bb2'][l]
    return x


def reference_mobilevit(x_nchw, params, *, patch_size, heads, dim_head):
    ph, pw = patch_size
    x = jnp.transpose(x_nchw, (0, 2, 3, 1))
    y0 = x
    x = _conv_bn_silu_ref(x, params['conv1'])
    x = _conv_bn_silu_ref(x, params['conv2'])
    B, H, W, D = x.shape
    h, w = H // ph, W // pw
    t = jnp.transpose(x.reshape(B, h, ph, w, pw, D), (0, 2, 4, 1, 3, 5)).reshape(B * ph * pw, h * w, D)
    t = _transformer_ref(t, params['transformer'], heads=heads, dim_head=dim_head)
    x = jnp.transpose(t.reshape(B, ph, pw, h, w, D), (0, 3, 1, 4, 2, 5)).reshape(B, H, W, D)
    x = _conv_bn_silu_ref(x, params['conv3'])
    x = jnp.concatenate([x, y0], axis=-1)
    x = _conv_bn_silu_ref(x, params['conv4'])
    return jnp.transpose(x, (0, 3, 1, 2))


if __name__ == "__main__":
    # MobileViTBlock(dim=32, depth=2, channel=4, kernel_size=3, patch_size=(2,2), mlp_dim=64)
    B, C, H, W = 2, 4, 16, 16
    dim, depth, mlp_dim = 32, 2, 64
    heads, dim_head = 4, 8                      # fixed by the module (Transformer(dim, depth, 4, 8, ...))
    patch_size = (2, 2)

    key = jax.random.PRNGKey(0)
    kx, k1, k2, k3, k4, kt = jax.random.split(key, 6)
    x = jax.random.normal(kx, (B, C, H, W), jnp.float32)

    params = dict(
        conv1=_init_conv_bn(k1, 3, 3, C, C),
        conv2=_init_conv_bn(k2, 1, 1, C, dim),
        conv3=_init_conv_bn(k3, 1, 1, dim, C),
        conv4=_init_conv_bn(k4, 3, 3, 2 * C, C),
        transformer=_init_transformer(kt, depth=depth, dim=dim, heads=heads,
                                      dim_head=dim_head, mlp_dim=mlp_dim),
    )

    out = mobilevit_block_forward(x, params, patch_size=patch_size,
                                  heads=heads, dim_head=dim_head)
    out = jax.block_until_ready(out)

    ref = reference_mobilevit(x, params, patch_size=patch_size,
                              heads=heads, dim_head=dim_head)
    assert out.shape == (B, C, H, W)
    assert bool(jnp.all(jnp.isfinite(out)))
    err = float(jnp.max(jnp.abs(out - ref)))
    assert err < 5e-2, f"Pallas kernel mismatch vs JAX reference: {err}"

    print("KERNEL_OK")
</pallas_src>

<mosaic_0001>
module attributes {stable_mosaic.version = 11 : i64} {
  func.func @_conv_bn_silu_kernel(%arg0: memref<2x18x18x4xf32, #tpu.memory_space<vmem>>, %arg1: memref<3x3x4x4xf32, #tpu.memory_space<vmem>>, %arg2: memref<1x4xf32, #tpu.memory_space<vmem>>, %arg3: memref<1x4xf32, #tpu.memory_space<vmem>>, %arg4: memref<2x16x16x4xf32, #tpu.memory_space<vmem>>) attributes {dimension_semantics = [], scalar_prefetch = 0 : i64, scratch_operands = 0 : i64, tpu.core_type = #tpu.core_type<tc>} {
    %c0 = arith.constant 0 : index
    %c0_0 = arith.constant 0 : index
    %c0_1 = arith.constant 0 : index
    %c0_2 = arith.constant 0 : index
    %0 = vector.load %arg0[%c0, %c0_0, %c0_1, %c0_2] : memref<2x18x18x4xf32, #tpu.memory_space<vmem>>, vector<2x18x18x4xf32>
    %c0_3 = arith.constant 0 : index
    %c0_4 = arith.constant 0 : index
    %c0_5 = arith.constant 0 : index
    %c0_6 = arith.constant 0 : index
    %1 = vector.load %arg1[%c0_3, %c0_4, %c0_5, %c0_6] : memref<3x3x4x4xf32, #tpu.memory_space<vmem>>, vector<3x3x4x4xf32>
    %cst = arith.constant 0.000000e+00 : f32
    %2 = vector.broadcast %cst : f32 to vector<512x4xf32>
    %3 = vector.extract_strided_slice %0 {offsets = [0, 0, 0, 0], sizes = [2, 16, 16, 4], strides = [1, 1, 1, 1]} : vector<2x18x18x4xf32> to vector<2x16x16x4xf32>
    %4 = vector.shape_cast %3 : vector<2x16x16x4xf32> to vector<512x4xf32>
    %5 = vector.extract_strided_slice %1 {offsets = [0, 0, 0, 0], sizes = [1, 1, 4, 4], strides = [1, 1, 1, 1]} : vector<3x3x4x4xf32> to vector<1x1x4x4xf32>
    %6 = vector.shape_cast %5 : vector<1x1x4x4xf32> to vector<4x4xf32>
    %cst_7 = arith.constant dense<0.000000e+00> : vector<512x4xf32>
    %7 = tpu.matmul %4, %6, %cst_7 {dimension_numbers = #tpu.dot_dimension_numbers<[1], [0], [0], [1], [0, 0, 1, 1], [], []>} : vector<512x4xf32>, vector<4x4xf32>, vector<512x4xf32> -> vector<512x4xf32>
    %8 = arith.addf %2, %7 : vector<512x4xf32>
    %9 = vector.extract_strided_slice %0 {offsets = [0, 0, 1, 0], sizes = [2, 16, 16, 4], strides = [1, 1, 1, 1]} : vector<2x18x18x4xf32> to vector<2x16x16x4xf32>
    %10 = vector.shape_cast %9 : vector<2x16x16x4xf32> to vector<512x4xf32>
    %11 = vector.extract_strided_slice %1 {offsets = [0, 1, 0, 0], sizes = [1, 1, 4, 4], strides = [1, 1, 1, 1]} : vector<3x3x4x4xf32> to vector<1x1x4x4xf32>
    %12 = vector.shape_cast %11 : vector<1x1x4x4xf32> to vector<4x4xf32>
    %cst_8 = arith.constant dense<0.000000e+00> : vector<512x4xf32>
    %13 = tpu.matmul %10, %12, %cst_8 {dimension_numbers = #tpu.dot_dimension_numbers<[1], [0], [0], [1], [0, 0, 1, 1], [], []>} : vector<512x4xf32>, vector<4x4xf32>, vector<512x4xf32> -> vector<512x4xf32>
    %14 = arith.addf %8, %13 : vector<512x4xf32>
    %15 = vector.extract_strided_slice %0 {offsets = [0, 0, 2, 0], sizes = [2, 16, 16, 4], strides = [1, 1, 1, 1]} : vector<2x18x18x4xf32> to vector<2x16x16x4xf32>
    %16 = vector.shape_cast %15 : vector<2x16x16x4xf32> to vector<512x4xf32>
    %17 = vector.extract_strided_slice %1 {offsets = [0, 2, 0, 0], sizes = [1, 1, 4, 4], strides = [1, 1, 1, 1]} : vector<3x3x4x4xf32> to vector<1x1x4x4xf32>
    %18 = vector.shape_cast %17 : vector<1x1x4x4xf32> to vector<4x4xf32>
    %cst_9 = arith.constant dense<0.000000e+00> : vector<512x4xf32>
    %19 = tpu.matmul %16, %18, %cst_9 {dimension_numbers = #tpu.dot_dimension_numbers<[1], [0], [0], [1], [0, 0, 1, 1], [], []>} : vector<512x4xf32>, vector<4x4xf32>, vector<512x4xf32> -> vector<512x4xf32>
    %20 = arith.addf %14, %19 : vector<512x4xf32>
    %21 = vector.extract_strided_slice %0 {offsets = [0, 1, 0, 0], sizes = [2, 16, 16, 4], strides = [1, 1, 1, 1]} : vector<2x18x18x4xf32> to vector<2x16x16x4xf32>
    %22 = vector.shape_cast %21 : vector<2x16x16x4xf32> to vector<512x4xf32>
    %23 = vector.extract_strided_slice %1 {offsets = [1, 0, 0, 0], sizes = [1, 1, 4, 4], strides = [1, 1, 1, 1]} : vector<3x3x4x4xf32> to vector<1x1x4x4xf32>
    %24 = vector.shape_cast %23 : vector<1x1x4x4xf32> to vector<4x4xf32>
    %cst_10 = arith.constant dense<0.000000e+00> : vector<512x4xf32>
    %25 = tpu.matmul %22, %24, %cst_10 {dimension_numbers = #tpu.dot_dimension_numbers<[1], [0], [0], [1], [0, 0, 1, 1], [], []>} : vector<512x4xf32>, vector<4x4xf32>, vector<512x4xf32> -> vector<512x4xf32>
    %26 = arith.addf %20, %25 : vector<512x4xf32>
    %27 = vector.extract_strided_slice %0 {offsets = [0, 1, 1, 0], sizes = [2, 16, 16, 4], strides = [1, 1, 1, 1]} : vector<2x18x18x4xf32> to vector<2x16x16x4xf32>
    %28 = vector.shape_cast %27 : vector<2x16x16x4xf32> to vector<512x4xf32>
    %29 = vector.extract_strided_slice %1 {offsets = [1, 1, 0, 0], sizes = [1, 1, 4, 4], strides = [1, 1, 1, 1]} : vector<3x3x4x4xf32> to vector<1x1x4x4xf32>
    %30 = vector.shape_cast %29 : vector<1x1x4x4xf32> to vector<4x4xf32>
    %cst_11 = arith.constant dense<0.000000e+00> : vector<512x4xf32>
    %31 = tpu.matmul %28, %30, %cst_11 {dimension_numbers = #tpu.dot_dimension_numbers<[1], [0], [0], [1], [0, 0, 1, 1], [], []>} : vector<512x4xf32>, vector<4x4xf32>, vector<512x4xf32> -> vector<512x4xf32>
    %32 = arith.addf %26, %31 : vector<512x4xf32>
    %33 = vector.extract_strided_slice %0 {offsets = [0, 1, 2, 0], sizes = [2, 16, 16, 4], strides = [1, 1, 1, 1]} : vector<2x18x18x4xf32> to vector<2x16x16x4xf32>
    %34 = vector.shape_cast %33 : vector<2x16x16x4xf32> to vector<512x4xf32>
    %35 = vector.extract_strided_slice %1 {offsets = [1, 2, 0, 0], sizes = [1, 1, 4, 4], strides = [1, 1, 1, 1]} : vector<3x3x4x4xf32> to vector<1x1x4x4xf32>
    %36 = vector.shape_cast %35 : vector<1x1x4x4xf32> to vector<4x4xf32>
    %cst_12 = arith.constant dense<0.000000e+00> : vector<512x4xf32>
    %37 = tpu.matmul %34, %36, %cst_12 {dimension_numbers = #tpu.dot_dimension_numbers<[1], [0], [0], [1], [0, 0, 1, 1], [], []>} : vector<512x4xf32>, vector<4x4xf32>, vector<512x4xf32> -> vector<512x4xf32>
    %38 = arith.addf %32, %37 : vector<512x4xf32>
    %39 = vector.extract_strided_slice %0 {offsets = [0, 2, 0, 0], sizes = [2, 16, 16, 4], strides = [1, 1, 1, 1]} : vector<2x18x18x4xf32> to vector<2x16x16x4xf32>
    %40 = vector.shape_cast %39 : vector<2x16x16x4xf32> to vector<512x4xf32>
    %41 = vector.extract_strided_slice %1 {offsets = [2, 0, 0, 0], sizes = [1, 1, 4, 4], strides = [1, 1, 1, 1]} : vector<3x3x4x4xf32> to vector<1x1x4x4xf32>
    %42 = vector.shape_cast %41 : vector<1x1x4x4xf32> to vector<4x4xf32>
    %cst_13 = arith.constant dense<0.000000e+00> : vector<512x4xf32>
    %43 = tpu.matmul %40, %42, %cst_13 {dimension_numbers = #tpu.dot_dimension_numbers<[1], [0], [0], [1], [0, 0, 1, 1], [], []>} : vector<512x4xf32>, vector<4x4xf32>, vector<512x4xf32> -> vector<512x4xf32>
    %44 = arith.addf %38, %43 : vector<512x4xf32>
    %45 = vector.extract_strided_slice %0 {offsets = [0, 2, 1, 0], sizes = [2, 16, 16, 4], strides = [1, 1, 1, 1]} : vector<2x18x18x4xf32> to vector<2x16x16x4xf32>
    %46 = vector.shape_cast %45 : vector<2x16x16x4xf32> to vector<512x4xf32>
    %47 = vector.extract_strided_slice %1 {offsets = [2, 1, 0, 0], sizes = [1, 1, 4, 4], strides = [1, 1, 1, 1]} : vector<3x3x4x4xf32> to vector<1x1x4x4xf32>
    %48 = vector.shape_cast %47 : vector<1x1x4x4xf32> to vector<4x4xf32>
    %cst_14 = arith.constant dense<0.000000e+00> : vector<512x4xf32>
    %49 = tpu.matmul %46, %48, %cst_14 {dimension_numbers = #tpu.dot_dimension_numbers<[1], [0], [0], [1], [0, 0, 1, 1], [], []>} : vector<512x4xf32>, vector<4x4xf32>, vector<512x4xf32> -> vector<512x4xf32>
    %50 = arith.addf %44, %49 : vector<512x4xf32>
    %51 = vector.extract_strided_slice %0 {offsets = [0, 2, 2, 0], sizes = [2, 16, 16, 4], strides = [1, 1, 1, 1]} : vector<2x18x18x4xf32> to vector<2x16x16x4xf32>
    %52 = vector.shape_cast %51 : vector<2x16x16x4xf32> to vector<512x4xf32>
    %53 = vector.extract_strided_slice %1 {offsets = [2, 2, 0, 0], sizes = [1, 1, 4, 4], strides = [1, 1, 1, 1]} : vector<3x3x4x4xf32> to vector<1x1x4x4xf32>
    %54 = vector.shape_cast %53 : vector<1x1x4x4xf32> to vector<4x4xf32>
    %cst_15 = arith.constant dense<0.000000e+00> : vector<512x4xf32>
    %55 = tpu.matmul %52, %54, %cst_15 {dimension_numbers = #tpu.dot_dimension_numbers<[1], [0], [0], [1], [0, 0, 1, 1], [], []>} : vector<512x4xf32>, vector<4x4xf32>, vector<512x4xf32> -> vector<512x4xf32>
    %56 = arith.addf %50, %55 : vector<512x4xf32>
    %c0_16 = arith.constant 0 : index
    %c0_17 = arith.constant 0 : index
    %57 = vector.load %arg2[%c0_16, %c0_17] : memref<1x4xf32, #tpu.memory_space<vmem>>, vector<1x4xf32>
    %58 = vector.broadcast %57 : vector<1x4xf32> to vector<512x4xf32>
    %59 = arith.mulf %56, %58 : vector<512x4xf32>
    %c0_18 = arith.constant 0 : index
    %c0_19 = arith.constant 0 : index
    %60 = vector.load %arg3[%c0_18, %c0_19] : memref<1x4xf32, #tpu.memory_space<vmem>>, vector<1x4xf32>
    %61 = vector.broadcast %60 : vector<1x4xf32> to vector<512x4xf32>
    %62 = arith.addf %59, %61 : vector<512x4xf32>
    %63 = arith.negf %62 : vector<512x4xf32>
    %64 = math.exp %63 : vector<512x4xf32>
    %cst_20 = arith.constant 1.000000e+00 : f32
    %65 = vector.broadcast %cst_20 : f32 to vector<512x4xf32>
    %66 = arith.addf %65, %64 : vector<512x4xf32>
    %67 = arith.divf %65, %66 : vector<512x4xf32>
    %68 = arith.mulf %62, %67 : vector<512x4xf32>
    %69 = vector.shape_cast %68 : vector<512x4xf32> to vector<2x16x16x4xf32>
    %c0_21 = arith.constant 0 : index
    %c0_22 = arith.constant 0 : index
    %c0_23 = arith.constant 0 : index
    %c0_24 = arith.constant 0 : index
    %70 = vector.load %arg4[%c0_21, %c0_22, %c0_23, %c0_24] : memref<2x16x16x4xf32, #tpu.memory_space<vmem>>, vector<2x16x16x4xf32>
    tpu.vector_store %arg4[%c0_21, %c0_22, %c0_23, %c0_24], %69 {strides = array<i32>} : memref<2x16x16x4xf32, #tpu.memory_space<vmem>>, vector<2x16x16x4xf32>,
    return
  }
}

</mosaic_0001>

<bundles_post_ra>
// kernel: tpu_custom_call.1
= control target key start
LH: loop header
LB: loop body
LE: loop exit
PB: predicated region body
PF: predicated region fallthrough
CT: control target
= control target key end

     0   :  { %vm520_vm0 = vcmask 1043456   ;;  %vm230_vm1 = vcmask 1046528   ;;  %vm391_vm2 = vcmask 31744   ;;  %vm1425_vm3 = vcmask 1045504   ;;  %s11933_s1 = inlined_call_operand.vmem [shape: f32[3,3,4,4], index: 1, kind: input, shape index: {}]   ;;  %s11934_s0 = inlined_call_operand.vmem [shape: f32[2,18,18,4], index: 0, kind: input, shape index: {}]   ;;  %s11935_s2 = inlined_call_operand.vmem [shape: f32[1,4], index: 2, kind: input, shape index: {}]   ;;  %s11936_s3 = inlined_call_operand.vmem [shape: f32[1,4], index: 3, kind: input, shape index: {}]   ;;  %s11937_s4 = inlined_call_operand.vmem [shape: f32[2,16,16,4], index: 4, kind: output, shape index: {}]  }
   0x1   :  { %v126_v0 = vld [vmem:[%s11933_s1 + $0x4] sm:$0xf]  ;;  %v129_v1 = vld [vmem:[%s11933_s1 + $0x10] sm:$0xf]  ;;  %v8636_v3 = vld [vmem:[%s11934_s0 + $0x8] sm:$0xff] }
   0x2   :  { %v8629_v2 = vld [vmem:[%s11934_s0] sm:$0xff]  ;;  %6872 = vmatprep.subr.msk.mxu1 %vm520_vm0, %v126_v0  ;;  %7264 = vmatprep.subr.msk.mxu0 %vm520_vm0, %v129_v1  ;;  %12183 = vst [vmem:[#allocation3_spill] sm:$0xff] %v8636_v3  ;;  %v8645_v6 = vld [vmem:[%s11934_s0 + $0x18] sm:$0xff]  ;;  %v232_v7 = vrot.slane %v8636_v3, 1  ;;  %v130_v10 = vld [vmem:[%s11933_s1 + $0x14] sm:$0xf] }
   0x3   :  { %12182 = vst [vmem:[#allocation2_spill] sm:$0xff] %v8629_v2  ;;  %v231_v4 = vrot.slane %v8629_v2, 1  ;;  %v125_v5 = vld [vmem:[%s11933_s1] sm:$0xf]  ;;  %12184 = vst [vmem:[#allocation4_spill] sm:$0xff] %v8645_v6  ;;  %6873 = vmatpush3.msk.msra.mxu1 %vm520_vm0, %v126_v0  ;;  %7265 = vmatpush3.msk.msra.mxu0 %vm520_vm0, %v129_v1  ;;  %v236_v9 = vrot.slane %v8645_v6, 1 }
   0x4   :  { %v8653_v8 = vld [vmem:[%s11934_s0 + $0x20] sm:$0xff]  ;;  %v8662_v11 = vld [vmem:[%s11934_s0 + $0x30] sm:$0xff]  ;;  %6970 = vmatprep.subr.msk.mxu1 %vm520_vm0, %v125_v5  ;;  %7362 = vmatprep.subr.msk.mxu0 %vm520_vm0, %v130_v10  ;;  %v8673_v14 = vld [vmem:[%s11934_s0 + $0x28] sm:$0x3] }
   0x5   :  { %12185 = vst [vmem:[#allocation5_spill] sm:$0xff] %v8653_v8  ;;  %v237_v12 = vrot.slane %v8653_v8, 1  ;;  %v19_v13 = vld [vmem:[%s11934_s0 + $0x10] sm:$0x3]  ;;  %v8678_v15 = vld [vmem:[%s11934_s0 + $0x38] sm:$0xff]  ;;  %v233_v16 = vsel %vm230_vm1, %v231_v4, %v232_v7  ;;  %v239_v18 = vrot.slane %v8673_v14, 1 }
   0x6   :  { %12186 = vst [vmem:[#allocation6_spill] sm:$0xff] %v8678_v15  ;;  %v234_v17 = vrot.slane %v19_v13, 1  ;;  %v8685_v19 = vld [vmem:[%s11934_s0 + $0x40] sm:$0x3]  ;;  %v8690_v20 = vld [vmem:[%s11934_s0 + $0x48] sm:$0xff]  ;;  %6874 = vmatprep.mubr.msk.f32.mxu1 %vm391_vm2, %v233_v16  ;;  %v241_v22 = vrot.slane %v8662_v11, 1 }
   0x7   :  { %12187 = vst [vmem:[#allocation7_spill] sm:$0xff] %v8690_v20  ;;  %v238_v21 = vsel %vm230_vm1, %v236_v9, %v237_v12  ;;  %v242_v23 = vrot.slane %v8678_v15, 1  ;;  %v8699_v24 = vld [vmem:[%s11934_s0 + $0x50] sm:$0xff]  ;;  %v8704_v25 = vld [vmem:[%s11934_s0 + $0x58] sm:$0x3]  ;;  %v240_v27 = vsel %vm230_vm1, %v237_v12, %v239_v18  ;;  %v244_v28 = vrot.slane %v8685_v19, 1 }
   0x8   :  { %12188 = vst [vmem:[#allocation8_spill] sm:$0xff] %v8699_v24  ;;  %7266 = vmatprep.mubr.msk.f32.mxu0 %vm391_vm2, %v238_v21  ;;  %v235_v26 = vsel %vm230_vm1, %v232_v7, %v234_v17  ;;  %v246_v29 = vrot.slane %v8690_v20, 1  ;;  %v8714_v30 = vld [vmem:[%s11934_s0 + $0x60] sm:$0xff]  ;;  %v8719_v31 = vld [vmem:[%s11934_s0 + $0x68] sm:$0xff]  ;;  %v247_v33 = vrot.slane %v8699_v24, 1  ;;  %v249_v35 = vrot.slane %v8704_v25, 1 }
   0x9   :  { %12189 = vst [vmem:[#allocation9_spill] sm:$0xff] %v8719_v31  ;;  %6875 = vmatmul.mubr.msk.f32.vlgmr.msra.gmra.mrb[0].mxu1 %vm391_vm2, %v235_v26  ;;  %7267 = vmatmul.mubr.msk.f32.vlgmr.msra.gmra.mrb[0].mxu0 %vm391_vm2, %v240_v27  ;;  %v8724_v32 = vsel %vm230_vm1, %v241_v22, %v242_v23  ;;  %v8730_v34 = vsel %vm230_vm1, %v242_v23, %v244_v28  ;;  %v251_v37 = vrot.slane %v8714_v30, 1  ;;  %v252_v38 = vrot.slane %v8719_v31, 1  ;;  %v8744_v39 = vld [vmem:[%s11934_s0 + $0x70] sm:$0x3]  ;;  %v8749_v40 = vld [vmem:[%s11934_s0 + $0x78] sm:$0xff] }
   0xa   :  { %12190 = vst [vmem:[#allocation10_spill] sm:$0xff] %v8724_v32  ;;  %6971 = vmatpush3.msk.msra.mxu1 %vm520_vm0, %v125_v5  ;;  %7363 = vmatpush3.msk.msra.mxu0 %vm520_vm0, %v130_v10  ;;  %12191 = vst [vmem:[#allocation11_spill] sm:$0xff] %v8730_v34  ;;  %v8737_v36 = vsel %vm230_vm1, %v246_v29, %v247_v33  ;;  %v8754_v41 = vld [vmem:[%s11934_s0 + $0x80] sm:$0xff]  ;;  %v8764_v42 = vsel %vm230_vm1, %v247_v33, %v249_v35  ;;  %v254_v43 = vrot.slane %v8744_v39, 1  ;;  %v8775_v47 = vld [vmem:[%s11934_s0 + $0x88] sm:$0x3] }
   0xb   :  { %6877 = vmatprep.mubr.msk.f32.mxu1 %vm391_vm2, %v238_v21  ;;  %7269 = vmatprep.mubr.msk.f32.mxu0 %vm391_vm2, %v8724_v32  ;;  %12192 = vst [vmem:[#allocation12_spill] sm:$0xff] %v8737_v36  ;;  %12193 = vst [vmem:[#allocation13_spill] sm:$0xff] %v8754_v41  ;;  %v8768_v44 = vsel %vm230_vm1, %v251_v37, %v252_v38  ;;  %v256_v45 = vrot.slane %v8749_v40, 1  ;;  %v257_v46 = vrot.slane %v8754_v41, 1  ;;  %v8780_v48 = vld [vmem:[%s11934_s0 + $0x90] sm:$0xff]  ;;  %v8785_v49 = vld [vmem:[%s11934_s0 + $0x98] sm:$0xff] }
   0xc   :  { %12194 = vst [vmem:[#allocation14_spill] sm:$0xff] %v8764_v42  ;;  %12195 = vst [vmem:[#allocation15_spill] sm:$0xff] %v8768_v44  ;;  %v8796_v50 = vsel %vm230_vm1, %v252_v38, %v254_v43  ;;  %v259_v51 = vrot.slane %v8775_v47, 1  ;;  %v261_v53 = vrot.slane %v8780_v48, 1  ;;  %v262_v54 = vrot.slane %v8785_v49, 1  ;;  %v8812_v56 = vld [vmem:[%s11934_s0 + $0xa8] sm:$0xff] }
   0xd   :  { %6878 = vmatmul.mubr.msk.f32.gmra.mrb[2].mxu1 %vm391_vm2, %v240_v27  ;;  %7270 = vmatmul.mubr.msk.f32.gmra.mrb[2].mxu0 %vm391_vm2, %v8730_v34  ;;  %12196 = vst [vmem:[#allocation16_spill] sm:$0xff] %v8780_v48  ;;  %12197 = vst [vmem:[#allocation17_spill] sm:$0xff] %v8785_v49  ;;  %v8800_v52 = vsel %vm230_vm1, %v256_v45, %v257_v46  ;;  %v8807_v55 = vld [vmem:[%s11934_s0 + $0xa0] sm:$0x3]  ;;  %v8817_v57 = vld [vmem:[%s11934_s0 + $0xb0] sm:$0xff]  ;;  %v266_v61 = vrot.slane %v8812_v56, 1 }
   0xe   :  { %6880 = vmatprep.mubr.msk.f32.mxu1 %vm391_vm2, %v8724_v32  ;;  %7272 = vmatprep.mubr.msk.f32.mxu0 %vm391_vm2, %v8737_v36  ;;  %12198 = vst [vmem:[#allocation18_spill] sm:$0xff] %v8796_v50  ;;  %12199 = vst [vmem:[#allocation19_spill] sm:$0xff] %v8800_v52  ;;  %v8828_v58 = vsel %vm230_vm1, %v257_v46, %v259_v51  ;;  %v264_v59 = vrot.slane %v8807_v55, 1  ;;  %v8832_v60 = vsel %vm230_vm1, %v261_v53, %v262_v54  ;;  %v8839_v63 = vld [vmem:[%s11934_s0 + $0xb8] sm:$0x3]  ;;  %v8849_v1 = vld [vmem:[%s11934_s0 + $0xc0] sm:$0xff] }
   0xf   :  { %12200 = vst [vmem:[#allocation20_spill] sm:$0xff] %v8812_v56  ;;  %12201 = vst [vmem:[#allocation21_spill] sm:$0xff] %v8817_v57  ;;  %v267_v62 = vrot.slane %v8817_v57, 1  ;;  %v8844_v0 = vld [vmem:[%s11933_s1 + $0x18] sm:$0xf]  ;;  %v8854_v4 = vld [vmem:[%s11934_s0 + $0xc8] sm:$0xff] }
  0x10   :  { %12202 = vst [vmem:[#allocation22_spill] sm:$0xff] %v8828_v58  ;;  %12203 = vst [vmem:[#allocation23_spill] sm:$0xff] %v8832_v60  ;;  %7460 = vmatprep.subr.msk.mxu0 %vm520_vm0, %v8844_v0  ;;  %v8867_v5 = vsel %vm230_vm1, %v262_v54, %v264_v59  ;;  %v269_v7 = vrot.slane %v8839_v63, 1  ;;  %v271_v10 = vrot.slane %v8849_v1, 1  ;;  %v272_v12 = vrot.slane %v8854_v4, 1  ;;  %v8883_v16 = vld [vmem:[%s11934_s0 + $0xd8] sm:$0xff] }
  0x11   :  { %6881 = vmatmul.mubr.msk.f32.gmra.mrb[4].mxu1 %vm391_vm2, %v8730_v34  ;;  %7273 = vmatmul.mubr.msk.f32.gmra.mrb[4].mxu0 %vm391_vm2, %v8764_v42  ;;  %12204 = vst [vmem:[#allocation24_spill] sm:$0xff] %v8849_v1  ;;  %12205 = vst [vmem:[#allocation25_spill] sm:$0xff] %v8854_v4  ;;  %v8871_v9 = vsel %vm230_vm1, %v266_v61, %v267_v62  ;;  %v8878_v13 = vld [vmem:[%s11934_s0 + $0xd0] sm:$0x3]  ;;  %v8888_v17 = vld [vmem:[%s11934_s0 + $0xe0] sm:$0xff]  ;;  %v276_v23 = vrot.slane %v8883_v16, 1 }
  0x12   :  { %6883 = vmatprep.mubr.msk.f32.mxu1 %vm391_vm2, %v8737_v36  ;;  %7275 = vmatprep.mubr.msk.f32.mxu0 %vm391_vm2, %v8768_v44  ;;  %12206 = vst [vmem:[#allocation26_spill] sm:$0xff] %v8867_v5  ;;  %12207 = vst [vmem:[#allocation27_spill] sm:$0xff] %v8871_v9  ;;  %v8899_v18 = vsel %vm230_vm1, %v267_v62, %v269_v7  ;;  %v274_v21 = vrot.slane %v8878_v13, 1  ;;  %v8903_v22 = vsel %vm230_vm1, %v271_v10, %v272_v12  ;;  %v8910_v27 = vld [vmem:[%s11934_s0 + $0xe8] sm:$0x3]  ;;  %v8915_v28 = vld [vmem:[%s11934_s0 + $0xf0] sm:$0xff] }
  0x13   :  { %12208 = vst [vmem:[#allocation28_spill] sm:$0xff] %v8883_v16  ;;  %12209 = vst [vmem:[#allocation29_spill] sm:$0xff] %v8888_v17  ;;  %v277_v26 = vrot.slane %v8888_v17, 1  ;;  %v8920_v29 = vld [vmem:[%s11934_s0 + $0xf8] sm:$0xff]  ;;  %v279_v35 = vrot.slane %v8910_v27, 1  ;;  %v281_v38 = vrot.slane %v8915_v28, 1 }
  0x14   :  { %12210 = vst [vmem:[#allocation30_spill] sm:$0xff] %v8899_v18  ;;  %12211 = vst [vmem:[#allocation31_spill] sm:$0xff] %v8903_v22  ;;  %v8931_v33 = vsel %vm230_vm1, %v272_v12, %v274_v21  ;;  %v282_v43 = vrot.slane %v8920_v29, 1  ;;  %v8942_v45 = vld [vmem:[%s11934_s0 + $0x100] sm:$0x3]  ;;  %v8947_v46 = vld [vmem:[%s11934_s0 + $0x108] sm:$0xff] }
  0x15   :  { %6884 = vmatmul.mubr.msk.f32.gmra.mrb[6].mxu1 %vm391_vm2, %v8764_v42  ;;  %7276 = vmatmul.mubr.msk.f32.gmra.mrb[6].mxu0 %vm391_vm2, %v8796_v50  ;;  %12212 = vst [vmem:[#allocation32_spill] sm:$0xff] %v8915_v28  ;;  %12213 = vst [vmem:[#allocation33_spill] sm:$0xff] %v8920_v29  ;;  %v8935_v37 = vsel %vm230_vm1, %v276_v23, %v277_v26  ;;  %v8952_v51 = vld [vmem:[%s11934_s0 + $0x110] sm:$0xff]  ;;  %v8963_v53 = vsel %vm230_vm1, %v277_v26, %v279_v35  ;;  %v284_v54 = vrot.slane %v8942_v45, 1  ;;  %v8974_v7 = vld [vmem:[%s11934_s0 + $0x118] sm:$0x3] }
  0x16   :  { %6886 = vmatprep.mubr.msk.f32.mxu1 %vm391_vm2, %v8768_v44  ;;  %7278 = vmatprep.mubr.msk.f32.mxu0 %vm391_vm2, %v8800_v52  ;;  %12214 = vst [vmem:[#allocation34_spill] sm:$0xff] %v8931_v33  ;;  %12215 = vst [vmem:[#allocation35_spill] sm:$0xff] %v8935_v37  ;;  %v8967_v59 = vsel %vm230_vm1, %v281_v38, %v282_v43  ;;  %v286_v61 = vrot.slane %v8947_v46, 1  ;;  %v287_v62 = vrot.slane %v8952_v51, 1  ;;  %v8979_v10 = vld [vmem:[%s11934_s0 + $0x120] sm:$0xff]  ;;  %v8984_v12 = vld [vmem:[%s11934_s0 + $0x128] sm:$0xff] }
  0x17   :  { %12216 = vst [vmem:[#allocation36_spill] sm:$0xff] %v8947_v46  ;;  %12217 = vst [vmem:[#allocation37_spill] sm:$0xff] %v8952_v51  ;;  %v8993_v21 = vld [vmem:[%s11933_s1 + $0x8] sm:$0xf]  ;;  %v9000_v23 = vsel %vm230_vm1, %v282_v43, %v284_v54  ;;  %v289_v26 = vrot.slane %v8974_v7, 1  ;;  %v291_v38 = vrot.slane %v8979_v10, 1 }
  0x18   :  { %12218 = vst [vmem:[#allocation38_spill] sm:$0xff] %v8963_v53  ;;  %12219 = vst [vmem:[#allocation39_spill] sm:$0xff] %v8967_v59  ;;  %v9004_v35 = vsel %vm230_vm1, %v286_v61, %v287_v62  ;;  %7068 = vmatprep.subr.msk.mxu1 %vm520_vm0, %v8993_v21  ;;  %v9018_v43 = vld [vmem:[%s11934_s0 + $0x138] sm:$0xff]  ;;  %v9023_v54 = vld [vmem:[%s11934_s0 + $0x140] sm:$0xff] }
  0x19   :  { %6887 = vmatmul.mubr.msk.f32.gmra.mrb[8].mxu1 %vm391_vm2, %v8796_v50  ;;  %7279 = vmatmul.mubr.msk.f32.gmra.mrb[8].mxu0 %vm391_vm2, %v8828_v58  ;;  %12220 = vst [vmem:[#allocation40_spill] sm:$0xff] %v8979_v10  ;;  %12221 = vst [vmem:[#allocation41_spill] sm:$0xff] %v8984_v12  ;;  %v9034_v61 = vsel %vm230_vm1, %v287_v62, %v289_v26  ;;  %v9055_v62 = vld [vmem:[%s11934_s0 + $0x158] sm:$0xff]  ;;  %v9141_v32 = vld [vmem:[%s11934_s0 + $0x190] sm:$0x3] }
  0x1a   :  { %6889 = vmatprep.mubr.msk.f32.mxu1 %vm391_vm2, %v8800_v52  ;;  %7281 = vmatprep.mubr.msk.f32.mxu0 %vm391_vm2, %v8832_v60  ;;  %12222 = vst [vmem:[#allocation42_spill] sm:$0xff] %v8993_v21  ;;  %12223 = vst [vmem:[#allocation43_spill] sm:$0xff] %v9000_v23  ;;  %v9077_v52 = vld [vmem:[%s11934_s0 + $0x160] sm:$0x3]  ;;  %v9109_v42 = vld [vmem:[%s11934_s0 + $0x178] sm:$0x3] }
  0x1b   :  { %12224 = vst [vmem:[#allocation44_spill] sm:$0xff] %v9004_v35  ;;  %12225 = vst [vmem:[#allocation45_spill] sm:$0xff] %v9018_v43 }
  0x1c   :  { %12226 = vst [vmem:[#allocation46_spill] sm:$0xff] %v9023_v54  ;;  %12227 = vst [vmem:[#allocation47_spill] sm:$0xff] %v9034_v61 }
  0x1d   :  { %6890 = vmatmul.mubr.msk.f32.gmra.mrb[10].mxu1 %vm391_vm2, %v8828_v58  ;;  %7282 = vmatmul.mubr.msk.f32.gmra.mrb[10].mxu0 %vm391_vm2, %v8867_v5  ;;  %12230 = vst [vmem:[#allocation50_spill] sm:$0xff] %v9055_v62 }
  0x1e   :  { %6892 = vmatprep.mubr.msk.f32.mxu1 %vm391_vm2, %v8832_v60  ;;  %7284 = vmatprep.mubr.msk.f32.mxu0 %vm391_vm2, %v8871_v9 }
  0x21   :  { %6893 = vmatmul.mubr.msk.f32.gmra.mrb[12].mxu1 %vm391_vm2, %v8867_v5  ;;  %7285 = vmatmul.mubr.msk.f32.gmra.mrb[12].mxu0 %vm391_vm2, %v8899_v18  ;;  %v9045_v5 = vld [vmem:[%s11934_s0 + $0x148] sm:$0x3] }
  0x22   :  { %6895 = vmatprep.mubr.msk.f32.mxu1 %vm391_vm2, %v8871_v9  ;;  %7287 = vmatprep.mubr.msk.f32.mxu0 %vm391_vm2, %v8903_v22  ;;  %v296_v9 = vrot.slane %v9018_v43, 1 }
  0x25   :  { %6896 = vmatmul.mubr.msk.f32.gmra.mrb[14].mxu1 %vm391_vm2, %v8899_v18  ;;  %7288 = vmatmul.mubr.msk.f32.gmra.mrb[14].mxu0 %vm391_vm2, %v8931_v33 }
  0x26   :  { %6898 = vmatprep.mubr.msk.f32.mxu1 %vm391_vm2, %v8903_v22  ;;  %7290 = vmatprep.mubr.msk.f32.mxu0 %vm391_vm2, %v8935_v37  ;;  %v9011_v22 = vld [vmem:[%s11934_s0 + $0x130] sm:$0x3] }
  0x29   :  { %6899 = vmatmul.mubr.msk.f32.gmra.mrb[16].mxu1 %vm391_vm2, %v8931_v33  ;;  %7291 = vmatmul.mubr.msk.f32.gmra.mrb[16].mxu0 %vm391_vm2, %v8963_v53  ;;  %v292_v33 = vrot.slane %v8984_v12, 1 }
  0x2a   :  { %6901 = vmatprep.mubr.msk.f32.mxu1 %vm391_vm2, %v8935_v37  ;;  %7293 = vmatprep.mubr.msk.f32.mxu0 %vm391_vm2, %v8967_v59  ;;  %v294_v37 = vrot.slane %v9011_v22, 1 }
  0x2b   :  { %v9038_v18 = vsel %vm230_vm1, %v291_v38, %v292_v33  ;;  %v299_v38 = vrot.slane %v9045_v5, 1 }
  0x2c   :  { %12228 = vst [vmem:[#allocation48_spill] sm:$0xff] %v9038_v18  ;;  %v9066_v26 = vsel %vm230_vm1, %v292_v33, %v294_v37  ;;  %v9087_v33 = vld [vmem:[%s11934_s0 + $0x170] sm:$0xff]  ;;  %v304_v37 = vrot.slane %v9077_v52, 1 }
  0x2d   :  { %6902 = vmatmul.mubr.msk.f32.gmra.mrb[18].mxu1 %vm391_vm2, %v8963_v53  ;;  %7294 = vmatmul.mubr.msk.f32.gmra.mrb[18].mxu0 %vm391_vm2, %v9000_v23  ;;  %v297_v53 = vrot.slane %v9023_v54, 1  ;;  %12231 = vst [vmem:[#allocation51_spill] sm:$0xff] %v9066_v26  ;;  %12234 = vst [vmem:[#allocation54_spill] sm:$0xff] %v9087_v33 }
  0x2e   :  { %6904 = vmatprep.mubr.msk.f32.mxu1 %vm391_vm2, %v8967_v59  ;;  %7296 = vmatprep.mubr.msk.f32.mxu0 %vm391_vm2, %v9004_v35  ;;  %v9050_v59 = vld [vmem:[%s11934_s0 + $0x150] sm:$0xff] }
  0x2f   :  { %12229 = vst [vmem:[#allocation49_spill] sm:$0xff] %v9050_v59  ;;  %v9070_v60 = vsel %vm230_vm1, %v296_v9, %v297_v53  ;;  %v301_v58 = vrot.slane %v9050_v59, 1  ;;  %v9098_v9 = vsel %vm230_vm1, %v297_v53, %v299_v38  ;;  %v9119_v53 = vld [vmem:[%s11934_s0 + $0x188] sm:$0xff]  ;;  %v309_v38 = vrot.slane %v9109_v42, 1 }
  0x30   :  { %12232 = vst [vmem:[#allocation52_spill] sm:$0xff] %v9070_v60  ;;  %12235 = vst [vmem:[#allocation55_spill] sm:$0xff] %v9098_v9 }
  0x31   :  { %6905 = vmatmul.mubr.msk.f32.gmra.mrb[20].mxu1 %vm391_vm2, %v9000_v23  ;;  %7297 = vmatmul.mubr.msk.f32.gmra.mrb[20].mxu0 %vm391_vm2, %v9034_v61  ;;  %v302_v23 = vrot.slane %v9055_v62, 1  ;;  %12237 = vst [vmem:[#allocation57_spill] sm:$0xff] %v9119_v53 }
  0x32   :  { %6907 = vmatprep.mubr.msk.f32.mxu1 %vm391_vm2, %v9004_v35  ;;  %7299 = vmatprep.mubr.msk.f32.mxu0 %vm391_vm2, %v9038_v18  ;;  %v9082_v35 = vld [vmem:[%s11934_s0 + $0x168] sm:$0xff] }
  0x33   :  { %12233 = vst [vmem:[#allocation53_spill] sm:$0xff] %v9082_v35  ;;  %v9102_v50 = vsel %vm230_vm1, %v301_v58, %v302_v23  ;;  %v306_v44 = vrot.slane %v9082_v35, 1  ;;  %v9130_v58 = vsel %vm230_vm1, %v302_v23, %v304_v37  ;;  %v9151_v23 = vld [vmem:[%s11934_s0 + $0x1b8] sm:$0xff]  ;;  %v2635_v37 = vrot.slane %v9141_v32, 1 }
  0x34   :  { %12236 = vst [vmem:[#allocation56_spill] sm:$0xff] %v9102_v50  ;;  %12238 = vst [vmem:[#allocation58_spill] sm:$0xff] %v9130_v58  ;;  %v312_v2 = vrot.slane %v9151_v23, 1 }
  0x35   :  { %6908 = vmatmul.mubr.msk.f32.gmra.mrb[22].mxu1 %vm391_vm2, %v9034_v61  ;;  %7300 = vmatmul.mubr.msk.f32.gmra.mrb[22].mxu0 %vm391_vm2, %v9066_v26  ;;  %v307_v61 = vrot.slane %v9087_v33, 1  ;;  %12241 = vst [vmem:[#allocation61_spill] sm:$0xff] %v9151_v23 }
  0x36   :  { %6910 = vmatprep.mubr.msk.f32.mxu1 %vm391_vm2, %v9038_v18  ;;  %7302 = vmatprep.mubr.msk.f32.mxu0 %vm391_vm2, %v9070_v60  ;;  %v9114_v18 = vld [vmem:[%s11934_s0 + $0x180] sm:$0xff] }
  0x37   :  { %v9134_v36 = vsel %vm230_vm1, %v306_v44, %v307_v61  ;;  %v2632_v34 = vrot.slane %v9114_v18, 1  ;;  %v9162_v44 = vsel %vm230_vm1, %v307_v61, %v309_v38  ;;  %v9178_v61 = vld [vmem:[%s11934_s0 + $0x1c8] sm:$0xff]  ;;  %v9183_v38 = vld [vmem:[%s11934_s0 + $0x1d0] sm:$0xff] }
  0x38   :  { %12239 = vst [vmem:[#allocation59_spill] sm:$0xff] %v9134_v36  ;;  %12242 = vst [vmem:[#allocation62_spill] sm:$0xff] %v9162_v44 }
  0x39   :  { %6911 = vmatmul.mubr.msk.f32.gmra.mrb[24].mxu1 %vm391_vm2, %v9066_v26  ;;  %7303 = vmatmul.mubr.msk.f32.gmra.mrb[24].mxu0 %vm391_vm2, %v9098_v9  ;;  %v2633_v26 = vrot.slane %v9119_v53, 1  ;;  %v1432_v53 = vrot.slane %v8653_v8, 2  ;;  %12244 = vst [vmem:[#allocation64_spill] sm:$0xff] %v9178_v61  ;;  %12245 = vst [vmem:[#allocation65_spill] sm:$0xff] %v9183_v38 }
  0x3a   :  { %6913 = vmatprep.mubr.msk.f32.mxu1 %vm391_vm2, %v9070_v60  ;;  %7305 = vmatprep.mubr.msk.f32.mxu0 %vm391_vm2, %v9102_v50  ;;  %v9146_v60 = vld [vmem:[%s11934_s0 + $0x1b0] sm:$0xff] }
  0x3b   :  { %12240 = vst [vmem:[#allocation60_spill] sm:$0xff] %v9146_v60  ;;  %v311_v21 = vrot.slane %v9146_v60, 1  ;;  %v9170_v3 = vsel %vm230_vm1, %v2632_v34, %v2633_v26  ;;  %v1434_v34 = vrot.slane %v8673_v14, 2  ;;  %v9195_v60 = vsel %vm230_vm1, %v2633_v26, %v2635_v37  ;;  %v9200_v14 = vld [vmem:[%s11934_s0 + $0x1d8] sm:$0x3]  ;;  %v9216_v26 = vld [vmem:[%s11934_s0 + $0x1e8] sm:$0xff] }
  0x3c   :  { %12243 = vst [vmem:[#allocation63_spill] sm:$0xff] %v9170_v3  ;;  %12246 = vst [vmem:[#allocation66_spill] sm:$0xff] %v9195_v60  ;;  %v1436_v37 = vrot.slane %v8662_v11, 2 }
  0x3d   :  { %6914 = vmatmul.mubr.msk.f32.gmra.mrb[26].mxu1 %vm391_vm2, %v9098_v9  ;;  %7306 = vmatmul.mubr.msk.f32.gmra.mrb[26].mxu0 %vm391_vm2, %v9130_v58  ;;  %v73_v9 = vld [vmem:[%s11934_s0 + $0x1c0] sm:$0x3] }
  0x3e   :  { %6916 = vmatprep.mubr.msk.f32.mxu1 %vm391_vm2, %v9102_v50  ;;  %7308 = vmatprep.mubr.msk.f32.mxu0 %vm391_vm2, %v9134_v36  ;;  %v1431_v50 = vrot.slane %v8645_v6, 2  ;;  %v314_v23 = vrot.slane %v73_v9, 1  ;;  %v316_v9 = vrot.slane %v9178_v61, 1  ;;  %v9226_v6 = vsel %vm1425_vm3, %v1432_v53, %v1434_v34  ;;  %v9256_v34 = vld [vmem:[%s11934_s0 + $0x200] sm:$0xff] }
  0x3f   :  { %12248 = vst [vmem:[#allocation68_spill] sm:$0xff] %v9226_v6  ;;  %v1439_v61 = vrot.slane %v8685_v19, 2 }
  0x40   :  { %v9204_v8 = vsel %vm1425_vm3, %v1431_v50, %v1432_v53  ;;  %v315_v50 = vsel %vm230_vm1, %v312_v2, %v314_v23  ;;  %v9240_v53 = vld [vmem:[%s11934_s0 + $0x1f0] sm:$0x3]  ;;  %v9251_v23 = vld [vmem:[%s11934_s0 + $0x1f8] sm:$0xff] }
  0x41   :  { %6917 = vmatmul.mubr.msk.f32.gmra.mrb[28].mxu1 %vm391_vm2, %v9130_v58  ;;  %7309 = vmatmul.mubr.msk.f32.gmra.mrb[28].mxu0 %vm391_vm2, %v9162_v44  ;;  %v313_v58 = vsel %vm230_vm1, %v311_v21, %v312_v2  ;;  %12247 = vst [vmem:[#allocation67_spill] sm:$0xff] %v9204_v8  ;;  %v1437_v21 = vrot.slane %v8678_v15, 2  ;;  %v1442_v2 = vrot.slane %v8699_v24, 2  ;;  %v1444_v24 = vrot.slane %v8704_v25, 2 }
  0x42   :  { %6919 = vmatprep.mubr.msk.f32.mxu1 %vm391_vm2, %v9134_v36  ;;  %7311 = vmatprep.mubr.msk.f32.mxu0 %vm391_vm2, %v9170_v3  ;;  %v317_v36 = vrot.slane %v9183_v38, 1  ;;  %v9211_v3 = vld [vmem:[%s11934_s0 + $0x1e0] sm:$0xff]  ;;  %v319_v38 = vrot.slane %v9200_v14, 1  ;;  %v326_v25 = vrot.slane %v9251_v23, 1 }
  0x43   :  { %v321_v15 = vrot.slane %v9211_v3, 1 }
  0x44   :  { %v9243_v19 = vsel %vm230_vm1, %v316_v9, %v317_v36  ;;  %v9267_v9 = vsel %vm230_vm1, %v317_v36, %v319_v38  ;;  %v9287_v36 = vld [vmem:[%s11934_s0 + $0x208] sm:$0x3]  ;;  %v9303_v38 = vld [vmem:[%s11934_s0 + $0x218] sm:$0xff] }
  0x45   :  { %6920 = vmatmul.mubr.msk.f32.gmra.mrb[30].mxu1 %vm391_vm2, %v9162_v44  ;;  %7312 = vmatmul.mubr.msk.f32.gmra.mrb[30].mxu0 %vm391_vm2, %v9195_v60  ;;  %v322_v44 = vrot.slane %v9216_v26, 1  ;;  %v1441_v60 = vrot.slane %v8690_v20, 2  ;;  %12249 = vst [vmem:[#allocation69_spill] sm:$0xff] %v9243_v19  ;;  %12252 = vst [vmem:[#allocation72_spill] sm:$0xff] %v9267_v9  ;;  %v9276_v20 = vsel %vm1425_vm3, %v1437_v21, %v1439_v61  ;;  %v1446_v61 = vrot.slane %v8714_v30, 2 }
  0x46   :  { %6922 = vmatprep.mubr.msk.f32.mxu1 %vm391_vm2, %v313_v58  ;;  %7364 = vmatprep.mubr.msk.f32.mxu0 %vm391_vm2, %v9204_v8  ;;  %v9246_v58 = vsel %vm1425_vm3, %v1436_v37, %v1437_v21  ;;  %v9261_v8 = vld [vmem:[%s11933_s1 + $0x1c] sm:$0xf]  ;;  %v324_v37 = vrot.slane %v9240_v53, 1  ;;  %12253 = vst [vmem:[#allocation73_spill] sm:$0xff] %v9276_v20 }
  0x47   :  { %12250 = vst [vmem:[#allocation70_spill] sm:$0xff] %v9246_v58  ;;  %12251 = vst [vmem:[#allocation71_spill] sm:$0xff] %v9261_v8 }
  0x48   :  { %v9312_v21 = vsel %vm230_vm1, %v322_v44, %v324_v37  ;;  %v1452_v37 = vrot.slane %v8754_v41, 2 }
  0x49   :  { %6923 = vmatmul.mubr.msk.f32.gmra.mrb[32].mxu1 %vm391_vm2, %v315_v50  ;;  %7365 = vmatmul.mubr.msk.f32.vlgmr.msra.gmra.mrb[0].mxu0 %vm391_vm2, %v9226_v6  ;;  %v9279_v50 = vsel %vm230_vm1, %v321_v15, %v322_v44  ;;  %v9282_v6 = vsel %vm1425_vm3, %v1441_v60, %v1442_v2  ;;  %v1447_v15 = vrot.slane %v8719_v31, 2  ;;  %v9298_v60 = vld [vmem:[%s11934_s0 + $0x210] sm:$0xff]  ;;  %12256 = vst [vmem:[#allocation76_spill] sm:$0xff] %v9312_v21  ;;  %v1449_v31 = vrot.slane %v8744_v39, 2 }
  0x4a   :  { %7461 = vmatpush3.msk.msra.mxu0 %vm520_vm0, %v8844_v0  ;;  %6925 = vmatprep.mubr.msk.f32.mxu1 %vm391_vm2, %v9243_v19  ;;  %12254 = vst [vmem:[#allocation74_spill] sm:$0xff] %v9279_v50  ;;  %12255 = vst [vmem:[#allocation75_spill] sm:$0xff] %v9282_v6  ;;  %v327_v0 = vrot.slane %v9256_v34, 1  ;;  %v9315_v19 = vsel %vm1425_vm3, %v1442_v2, %v1444_v24  ;;  %v1451_v44 = vrot.slane %v8749_v40, 2  ;;  %v9330_v24 = vld [vmem:[%s11934_s0 + $0x220] sm:$0x3] }
  0x4b   :  { %7367 = vmatprep.mubr.msk.f32.mxu0 %vm391_vm2, %v9246_v58  ;;  %7558 = vmatprep.subr.msk.mxu0 %vm520_vm0, %v9261_v8  ;;  %12257 = vst [vmem:[#allocation77_spill] sm:$0xff] %v9315_v19  ;;  %v329_v58 = vrot.slane %v9287_v36, 1  ;;  %v9336_v2 = vsel %vm1425_vm3, %v1446_v61, %v1447_v15  ;;  %v334_v61 = vrot.slane %v9330_v24, 1  ;;  %v1454_v8 = vrot.slane %v8775_v47, 2 }
  0x4c   :  { %v9333_v39 = vsel %vm230_vm1, %v326_v25, %v327_v0  ;;  %12259 = vst [vmem:[#allocation79_spill] sm:$0xff] %v9336_v2  ;;  %v9362_v41 = vsel %vm1425_vm3, %v1447_v15, %v1449_v31  ;;  %v1457_v31 = vrot.slane %v8785_v49, 2  ;;  %v9387_v15 = vld [vmem:[%s11934_s0 + $0x248] sm:$0xff] }
  0x4d   :  { %6926 = vmatmul.mubr.msk.f32.gmra.mrb[34].mxu1 %vm391_vm2, %v9267_v9  ;;  %7368 = vmatmul.mubr.msk.f32.gmra.mrb[2].mxu0 %vm391_vm2, %v9276_v20  ;;  %v331_v9 = vrot.slane %v9298_v60, 1  ;;  %v332_v20 = vrot.slane %v9303_v38, 1  ;;  %12258 = vst [vmem:[#allocation78_spill] sm:$0xff] %v9333_v39  ;;  %v9353_v25 = vsel %vm230_vm1, %v327_v0, %v329_v58  ;;  %12261 = vst [vmem:[#allocation81_spill] sm:$0xff] %v9362_v41  ;;  %v9373_v58 = vld [vmem:[%s11934_s0 + $0x238] sm:$0x3] }
  0x4e   :  { %6928 = vmatprep.mubr.msk.f32.mxu1 %vm391_vm2, %v9279_v50  ;;  %7370 = vmatprep.mubr.msk.f32.mxu0 %vm391_vm2, %v9282_v6  ;;  %v9341_v50 = vld [vmem:[%s11934_s0 + $0x228] sm:$0xff]  ;;  %v9346_v6 = vld [vmem:[%s11934_s0 + $0x230] sm:$0xff]  ;;  %12260 = vst [vmem:[#allocation80_spill] sm:$0xff] %v9353_v25  ;;  %v339_v49 = vrot.slane %v9373_v58, 1 }
  0x4f   :  { %v336_v47 = vrot.slane %v9341_v50, 1  ;;  %v337_v0 = vrot.slane %v9346_v6, 1 }
  0x51   :  { %6929 = vmatmul.mubr.msk.f32.gmra.mrb[36].mxu1 %vm391_vm2, %v9312_v21  ;;  %7371 = vmatmul.mubr.msk.f32.gmra.mrb[4].mxu0 %vm391_vm2, %v9315_v19  ;;  %v9365_v21 = vsel %vm230_vm1, %v331_v9, %v332_v20  ;;  %v9368_v19 = vsel %vm1425_vm3, %v1451_v44, %v1452_v37  ;;  %v9382_v9 = vld [vmem:[%s11934_s0 + $0x240] sm:$0xff]  ;;  %v9394_v44 = vsel %vm230_vm1, %v332_v20, %v334_v61  ;;  %v1461_v20 = vrot.slane %v8812_v56, 2 }
  0x52   :  { %6931 = vmatprep.mubr.msk.f32.mxu1 %vm391_vm2, %v9333_v39  ;;  %7373 = vmatprep.mubr.msk.f32.mxu0 %vm391_vm2, %v9336_v2  ;;  %12262 = vst [vmem:[#allocation82_spill] sm:$0xff] %v9365_v21  ;;  %12263 = vst [vmem:[#allocation83_spill] sm:$0xff] %v9368_v19  ;;  %v1456_v39 = vrot.slane %v8780_v48, 2  ;;  %v9397_v2 = vsel %vm1425_vm3, %v1452_v37, %v1454_v8  ;;  %v1459_v48 = vrot.slane %v8807_v55, 2  ;;  %v1462_v61 = vrot.slane %v8817_v57, 2 }
  0x53   :  { %12264 = vst [vmem:[#allocation84_spill] sm:$0xff] %v9394_v44  ;;  %12265 = vst [vmem:[#allocation85_spill] sm:$0xff] %v9397_v2  ;;  %v9412_v8 = vld [vmem:[%s11934_s0 + $0x250] sm:$0x3]  ;;  %v9415_v55 = vsel %vm230_vm1, %v336_v47, %v337_v0  ;;  %v9435_v47 = vsel %vm230_vm1, %v337_v0, %v339_v49  ;;  %v1464_v57 = vrot.slane %v8839_v63, 2 }
  0x54   :  { %12266 = vst [vmem:[#allocation86_spill] sm:$0xff] %v9415_v55  ;;  %v9418_v37 = vsel %vm1425_vm3, %v1456_v39, %v1457_v31  ;;  %12268 = vst [vmem:[#allocation88_spill] sm:$0xff] %v9435_v47  ;;  %v344_v39 = vrot.slane %v9412_v8, 1  ;;  %v9444_v56 = vsel %vm1425_vm3, %v1457_v31, %v1459_v48  ;;  %v9455_v49 = vld [vmem:[%s11934_s0 + $0x268] sm:$0x3]  ;;  %v1467_v48 = vrot.slane %v8854_v4, 2 }
  0x55   :  { %6932 = vmatmul.mubr.msk.f32.gmra.mrb[38].mxu1 %vm391_vm2, %v9353_v25  ;;  %7374 = vmatmul.mubr.msk.f32.gmra.mrb[6].mxu0 %vm391_vm2, %v9362_v41  ;;  %v341_v25 = vrot.slane %v9382_v9, 1  ;;  %v342_v41 = vrot.slane %v9387_v15, 1  ;;  %12267 = vst [vmem:[#allocation87_spill] sm:$0xff] %v9418_v37  ;;  %12269 = vst [vmem:[#allocation89_spill] sm:$0xff] %v9444_v56  ;;  %v9469_v31 = vld [vmem:[%s11934_s0 + $0x278] sm:$0xff]  ;;  %v349_v4 = vrot.slane %v9455_v49, 1 }
  0x56   :  { %6934 = vmatprep.mubr.msk.f32.mxu1 %vm391_vm2, %v9365_v21  ;;  %7376 = vmatprep.mubr.msk.f32.mxu0 %vm391_vm2, %v9368_v19  ;;  %v9423_v21 = vld [vmem:[%s11934_s0 + $0x258] sm:$0xff]  ;;  %v9428_v19 = vld [vmem:[%s11934_s0 + $0x260] sm:$0xff] }
  0x57   :  { %v346_v63 = vrot.slane %v9423_v21, 1  ;;  %v347_v0 = vrot.slane %v9428_v19, 1 }
  0x59   :  { %6935 = vmatmul.mubr.msk.f32.gmra.mrb[40].mxu1 %vm391_vm2, %v9394_v44  ;;  %7377 = vmatmul.mubr.msk.f32.gmra.mrb[8].mxu0 %vm391_vm2, %v9397_v2  ;;  %v9447_v44 = vsel %vm230_vm1, %v341_v25, %v342_v41  ;;  %v9450_v2 = vsel %vm1425_vm3, %v1461_v20, %v1462_v61  ;;  %v9464_v25 = vld [vmem:[%s11934_s0 + $0x270] sm:$0xff]  ;;  %v9476_v20 = vsel %vm230_vm1, %v342_v41, %v344_v39  ;;  %v1471_v41 = vrot.slane %v8883_v16, 2 }
  0x5a   :  { %6937 = vmatprep.mubr.msk.f32.mxu1 %vm391_vm2, %v9415_v55  ;;  %7379 = vmatprep.mubr.msk.f32.mxu0 %vm391_vm2, %v9418_v37  ;;  %12270 = vst [vmem:[#allocation90_spill] sm:$0xff] %v9447_v44  ;;  %12271 = vst [vmem:[#allocation91_spill] sm:$0xff] %v9450_v2  ;;  %v1466_v55 = vrot.slane %v8849_v1, 2  ;;  %v9479_v37 = vsel %vm1425_vm3, %v1462_v61, %v1464_v57  ;;  %v1469_v1 = vrot.slane %v8878_v13, 2  ;;  %v1472_v39 = vrot.slane %v8888_v17, 2 }
  0x5b   :  { %12272 = vst [vmem:[#allocation92_spill] sm:$0xff] %v9476_v20  ;;  %12273 = vst [vmem:[#allocation93_spill] sm:$0xff] %v9479_v37  ;;  %v9494_v57 = vld [vmem:[%s11934_s0 + $0x280] sm:$0x3]  ;;  %v9497_v13 = vsel %vm230_vm1, %v346_v63, %v347_v0  ;;  %v9517_v63 = vsel %vm230_vm1, %v347_v0, %v349_v4  ;;  %v1474_v17 = vrot.slane %v8910_v27, 2 }
  0x5c   :  { %12274 = vst [vmem:[#allocation94_spill] sm:$0xff] %v9497_v13  ;;  %v9500_v61 = vsel %vm1425_vm3, %v1466_v55, %v1467_v48  ;;  %12276 = vst [vmem:[#allocation96_spill] sm:$0xff] %v9517_v63  ;;  %v354_v55 = vrot.slane %v9494_v57, 1  ;;  %v9526_v16 = vsel %vm1425_vm3, %v1467_v48, %v1469_v1  ;;  %v9537_v4 = vld [vmem:[%s11934_s0 + $0x298] sm:$0x3]  ;;  %v1477_v1 = vrot.slane %v8920_v29, 2 }
  0x5d   :  { %6938 = vmatmul.mubr.msk.f32.gmra.mrb[42].mxu1 %vm391_vm2, %v9435_v47  ;;  %7380 = vmatmul.mubr.msk.f32.gmra.mrb[10].mxu0 %vm391_vm2, %v9444_v56  ;;  %v351_v47 = vrot.slane %v9464_v25, 1  ;;  %v352_v56 = vrot.slane %v9469_v31, 1  ;;  %12275 = vst [vmem:[#allocation95_spill] sm:$0xff] %v9500_v61  ;;  %12277 = vst [vmem:[#allocation97_spill] sm:$0xff] %v9526_v16  ;;  %v9551_v48 = vld [vmem:[%s11934_s0 + $0x2a8] sm:$0xff]  ;;  %v359_v29 = vrot.slane %v9537_v4, 1 }
  0x5e   :  { %6940 = vmatprep.mubr.msk.f32.mxu1 %vm391_vm2, %v9447_v44  ;;  %7382 = vmatprep.mubr.msk.f32.mxu0 %vm391_vm2, %v9450_v2  ;;  %v9505_v44 = vld [vmem:[%s11934_s0 + $0x288] sm:$0xff]  ;;  %v9510_v2 = vld [vmem:[%s11934_s0 + $0x290] sm:$0xff] }
  0x5f   :  { %v356_v27 = vrot.slane %v9505_v44, 1  ;;  %v357_v0 = vrot.slane %v9510_v2, 1 }
  0x61   :  { %6941 = vmatmul.mubr.msk.f32.gmra.mrb[44].mxu1 %vm391_vm2, %v9476_v20  ;;  %7383 = vmatmul.mubr.msk.f32.gmra.mrb[12].mxu0 %vm391_vm2, %v9479_v37  ;;  %v9529_v20 = vsel %vm230_vm1, %v351_v47, %v352_v56  ;;  %v9532_v37 = vsel %vm1425_vm3, %v1471_v41, %v1472_v39  ;;  %v9546_v47 = vld [vmem:[%s11934_s0 + $0x2a0] sm:$0xff]  ;;  %v9558_v41 = vsel %vm230_vm1, %v352_v56, %v354_v55  ;;  %v1481_v56 = vrot.slane %v8947_v46, 2 }
  0x62   :  { %6943 = vmatprep.mubr.msk.f32.mxu1 %vm391_vm2, %v9497_v13  ;;  %7385 = vmatprep.mubr.msk.f32.mxu0 %vm391_vm2, %v9500_v61  ;;  %12278 = vst [vmem:[#allocation98_spill] sm:$0xff] %v9529_v20  ;;  %12279 = vst [vmem:[#allocation99_spill] sm:$0xff] %v9532_v37  ;;  %v1476_v13 = vrot.slane %v8915_v28, 2  ;;  %v9561_v61 = vsel %vm1425_vm3, %v1472_v39, %v1474_v17  ;;  %v1479_v28 = vrot.slane %v8942_v45, 2  ;;  %v1482_v55 = vrot.slane %v8952_v51, 2 }
  0x63   :  { %12280 = vst [vmem:[#allocation100_spill] sm:$0xff] %v9558_v41  ;;  %12281 = vst [vmem:[#allocation101_spill] sm:$0xff] %v9561_v61  ;;  %v9576_v17 = vld [vmem:[%s11934_s0 + $0x2b0] sm:$0x3]  ;;  %v9579_v45 = vsel %vm230_vm1, %v356_v27, %v357_v0  ;;  %v9599_v27 = vsel %vm230_vm1, %v357_v0, %v359_v29  ;;  %v1484_v51 = vrot.slane %v8974_v7, 2 }
  0x64   :  { %12282 = vst [vmem:[#allocation102_spill] sm:$0xff] %v9579_v45  ;;  %v9582_v39 = vsel %vm1425_vm3, %v1476_v13, %v1477_v1  ;;  %12284 = vst [vmem:[#allocation104_spill] sm:$0xff] %v9599_v27  ;;  %v364_v13 = vrot.slane %v9576_v17, 1  ;;  %v9608_v46 = vsel %vm1425_vm3, %v1477_v1, %v1479_v28  ;;  %v9619_v29 = vld [vmem:[%s11934_s0 + $0x2c8] sm:$0x3]  ;;  %v1487_v28 = vrot.slane %v8984_v12, 2 }
  0x65   :  { %6944 = vmatmul.mubr.msk.f32.gmra.mrb[46].mxu1 %vm391_vm2, %v9517_v63  ;;  %7386 = vmatmul.mubr.msk.f32.gmra.mrb[14].mxu0 %vm391_vm2, %v9526_v16  ;;  %v361_v63 = vrot.slane %v9546_v47, 1  ;;  %v362_v16 = vrot.slane %v9551_v48, 1  ;;  %12283 = vst [vmem:[#allocation103_spill] sm:$0xff] %v9582_v39  ;;  %12285 = vst [vmem:[#allocation105_spill] sm:$0xff] %v9608_v46  ;;  %v9633_v1 = vld [vmem:[%s11934_s0 + $0x2d8] sm:$0xff]  ;;  %v369_v12 = vrot.slane %v9619_v29, 1 }
  0x66   :  { %6946 = vmatprep.mubr.msk.f32.mxu1 %vm391_vm2, %v9529_v20  ;;  %7388 = vmatprep.mubr.msk.f32.mxu0 %vm391_vm2, %v9532_v37  ;;  %v9587_v20 = vld [vmem:[%s11934_s0 + $0x2b8] sm:$0xff]  ;;  %v9592_v37 = vld [vmem:[%s11934_s0 + $0x2c0] sm:$0xff] }
  0x67   :  { %v366_v7 = vrot.slane %v9587_v20, 1  ;;  %v367_v0 = vrot.slane %v9592_v37, 1 }
  0x69   :  { %6947 = vmatmul.mubr.msk.f32.gmra.mrb[48].mxu1 %vm391_vm2, %v9558_v41  ;;  %7389 = vmatmul.mubr.msk.f32.gmra.mrb[16].mxu0 %vm391_vm2, %v9561_v61  ;;  %v9611_v41 = vsel %vm230_vm1, %v361_v63, %v362_v16  ;;  %v9614_v61 = vsel %vm1425_vm3, %v1481_v56, %v1482_v55  ;;  %v9628_v63 = vld [vmem:[%s11934_s0 + $0x2d0] sm:$0xff]  ;;  %v9640_v56 = vsel %vm230_vm1, %v362_v16, %v364_v13  ;;  %v1491_v16 = vrot.slane %v9018_v43, 2 }
  0x6a   :  { %6949 = vmatprep.mubr.msk.f32.mxu1 %vm391_vm2, %v9579_v45  ;;  %7391 = vmatprep.mubr.msk.f32.mxu0 %vm391_vm2, %v9582_v39  ;;  %12286 = vst [vmem:[#allocation106_spill] sm:$0xff] %v9611_v41  ;;  %12287 = vst [vmem:[#allocation107_spill] sm:$0xff] %v9614_v61  ;;  %v1486_v45 = vrot.slane %v8979_v10, 2  ;;  %v9643_v39 = vsel %vm1425_vm3, %v1482_v55, %v1484_v51  ;;  %v1489_v10 = vrot.slane %v9011_v22, 2  ;;  %v1492_v13 = vrot.slane %v9023_v54, 2 }
  0x6b   :  { %12288 = vst [vmem:[#allocation108_spill] sm:$0xff] %v9640_v56  ;;  %12289 = vst [vmem:[#allocation109_spill] sm:$0xff] %v9643_v39  ;;  %v9658_v51 = vld [vmem:[%s11934_s0 + $0x2e0] sm:$0x3]  ;;  %v9661_v22 = vsel %vm230_vm1, %v366_v7, %v367_v0  ;;  %v9681_v7 = vsel %vm230_vm1, %v367_v0, %v369_v12  ;;  %v1494_v54 = vrot.slane %v9045_v5, 2 }
  0x6c   :  { %12290 = vst [vmem:[#allocation110_spill] sm:$0xff] %v9661_v22  ;;  %v9664_v55 = vsel %vm1425_vm3, %v1486_v45, %v1487_v28  ;;  %12292 = vst [vmem:[#allocation112_spill] sm:$0xff] %v9681_v7  ;;  %v374_v45 = vrot.slane %v9658_v51, 1  ;;  %v9690_v43 = vsel %vm1425_vm3, %v1487_v28, %v1489_v10  ;;  %v9701_v12 = vld [vmem:[%s11934_s0 + $0x2f8] sm:$0x3]  ;;  %v1497_v10 = vrot.slane %v9055_v62, 2 }
  0x6d   :  { %6950 = vmatmul.mubr.msk.f32.gmra.mrb[50].mxu1 %vm391_vm2, %v9599_v27  ;;  %7392 = vmatmul.mubr.msk.f32.gmra.mrb[18].mxu0 %vm391_vm2, %v9608_v46  ;;  %v371_v27 = vrot.slane %v9628_v63, 1  ;;  %v372_v46 = vrot.slane %v9633_v1, 1  ;;  %12291 = vst [vmem:[#allocation111_spill] sm:$0xff] %v9664_v55  ;;  %12293 = vst [vmem:[#allocation113_spill] sm:$0xff] %v9690_v43  ;;  %v9715_v28 = vld [vmem:[%s11934_s0 + $0x308] sm:$0xff]  ;;  %v379_v62 = vrot.slane %v9701_v12, 1 }
  0x6e   :  { %6952 = vmatprep.mubr.msk.f32.mxu1 %vm391_vm2, %v9611_v41  ;;  %7394 = vmatprep.mubr.msk.f32.mxu0 %vm391_vm2, %v9614_v61  ;;  %v9669_v41 = vld [vmem:[%s11934_s0 + $0x2e8] sm:$0xff]  ;;  %v9674_v61 = vld [vmem:[%s11934_s0 + $0x2f0] sm:$0xff] }
  0x6f   :  { %v376_v5 = vrot.slane %v9669_v41, 1  ;;  %v377_v0 = vrot.slane %v9674_v61, 1 }
  0x71   :  { %6953 = vmatmul.mubr.msk.f32.gmra.mrb[52].mxu1 %vm391_vm2, %v9640_v56  ;;  %7395 = vmatmul.mubr.msk.f32.gmra.mrb[20].mxu0 %vm391_vm2, %v9643_v39  ;;  %v9693_v56 = vsel %vm230_vm1, %v371_v27, %v372_v46  ;;  %v9696_v39 = vsel %vm1425_vm3, %v1491_v16, %v1492_v13  ;;  %v9710_v27 = vld [vmem:[%s11934_s0 + $0x300] sm:$0xff]  ;;  %v9722_v16 = vsel %vm230_vm1, %v372_v46, %v374_v45  ;;  %v1501_v46 = vrot.slane %v9082_v35, 2 }
  0x72   :  { %6955 = vmatprep.mubr.msk.f32.mxu1 %vm391_vm2, %v9661_v22  ;;  %7397 = vmatprep.mubr.msk.f32.mxu0 %vm391_vm2, %v9664_v55  ;;  %12294 = vst [vmem:[#allocation114_spill] sm:$0xff] %v9693_v56  ;;  %12295 = vst [vmem:[#allocation115_spill] sm:$0xff] %v9696_v39  ;;  %v1496_v22 = vrot.slane %v9050_v59, 2  ;;  %v9725_v55 = vsel %vm1425_vm3, %v1492_v13, %v1494_v54  ;;  %v1499_v59 = vrot.slane %v9077_v52, 2  ;;  %v1502_v45 = vrot.slane %v9087_v33, 2 }
  0x73   :  { %12296 = vst [vmem:[#allocation116_spill] sm:$0xff] %v9722_v16  ;;  %12297 = vst [vmem:[#allocation117_spill] sm:$0xff] %v9725_v55  ;;  %v9738_v54 = vsel %vm230_vm1, %v376_v5, %v377_v0  ;;  %v9746_v52 = vld [vmem:[%s11934_s0 + $0x310] sm:$0x3] }
  0x74   :  { %12298 = vst [vmem:[#allocation118_spill] sm:$0xff] %v9738_v54  ;;  %v9741_v13 = vsel %vm1425_vm3, %v1496_v22, %v1497_v10  ;;  %v9763_v22 = vsel %vm230_vm1, %v377_v0, %v379_v62  ;;  %v9766_v5 = vsel %vm1425_vm3, %v1497_v10, %v1499_v59  ;;  %v1504_v62 = vrot.slane %v9109_v42, 2 }
  0x75   :  { %6956 = vmatmul.mubr.msk.f32.gmra.mrb[54].mxu1 %vm391_vm2, %v9681_v7  ;;  %7398 = vmatmul.mubr.msk.f32.gmra.mrb[22].mxu0 %vm391_vm2, %v9690_v43  ;;  %v381_v7 = vrot.slane %v9710_v27, 1  ;;  %v382_v43 = vrot.slane %v9715_v28, 1  ;;  %12299 = vst [vmem:[#allocation119_spill] sm:$0xff] %v9741_v13  ;;  %12301 = vst [vmem:[#allocation121_spill] sm:$0xff] %v9763_v22  ;;  %v3102_v10 = vrot.slane %v9114_v18, 2 }
  0x76   :  { %6958 = vmatprep.mubr.msk.f32.mxu1 %vm391_vm2, %v9693_v56  ;;  %7400 = vmatprep.mubr.msk.f32.mxu0 %vm391_vm2, %v9696_v39  ;;  %v9751_v56 = vld [vmem:[%s11934_s0 + $0x318] sm:$0xff]  ;;  %v9756_v39 = vld [vmem:[%s11934_s0 + $0x320] sm:$0xff]  ;;  %12302 = vst [vmem:[#allocation122_spill] sm:$0xff] %v9766_v5  ;;  %v9801_v18 = vsel %vm1425_vm3, %v1502_v45, %v1504_v62  ;;  %v1516_v62 = vrot.slane %v9211_v3, 2 }
  0x77   :  { %12300 = vst [vmem:[#allocation120_spill] sm:$0xff] %v9756_v39  ;;  %v9773_v33 = vsel %vm230_vm1, %v381_v7, %v382_v43  ;;  %v386_v0 = vrot.slane %v9751_v56, 1  ;;  %v387_v59 = vrot.slane %v9756_v39, 1  ;;  %v9787_v7 = vld [vmem:[%s11934_s0 + $0x328] sm:$0x3]  ;;  %v12310_v39 = vld [vmem:[#allocation65_spill] sm:$0xff] }
  0x78   :  { %12303 = vst [vmem:[#allocation123_spill] sm:$0xff] %v9773_v33 }
  0x79   :  { %6959 = vmatmul.mubr.msk.f32.gmra.mrb[56].mxu1 %vm391_vm2, %v9722_v16  ;;  %7401 = vmatmul.mubr.msk.f32.gmra.mrb[24].mxu0 %vm391_vm2, %v9725_v55  ;;  %v9776_v16 = vsel %vm1425_vm3, %v1501_v46, %v1502_v45  ;;  %v384_v55 = vrot.slane %v9746_v52, 1  ;;  %v389_v46 = vrot.slane %v9787_v7, 1 }
  0x7a   :  { %6961 = vmatprep.mubr.msk.f32.mxu1 %vm391_vm2, %v9738_v54  ;;  %7403 = vmatprep.mubr.msk.f32.mxu0 %vm391_vm2, %v9741_v13  ;;  %12304 = vst [vmem:[#allocation124_spill] sm:$0xff] %v9776_v16  ;;  %v12305_v54 = vld [vmem:[#allocation57_spill] sm:$0xff] }
  0x7b   :  { %v3103_v35 = vrot.slane %v12305_v54, 2  ;;  %v9798_v42 = vsel %vm230_vm1, %v382_v43, %v384_v55  ;;  %v3105_v54 = vrot.slane %v9141_v32, 2  ;;  %v9822_v32 = vsel %vm230_vm1, %v387_v59, %v389_v46 }
  0x7c   :  { %12306 = vst [vmem:[#allocation57_spill] sm:$0xff] %v9798_v42  ;;  %v1514_v55 = vrot.slane %v9200_v14, 2  ;;  %v1519_v14 = vrot.slane %v9240_v53, 2  ;;  %v12316_v53 = vld [vmem:[#allocation4_spill] sm:$0xff] }
  0x7d   :  { %6962 = vmatmul.mubr.msk.f32.gmra.mrb[58].mxu1 %vm391_vm2, %v9763_v22  ;;  %7404 = vmatmul.mubr.msk.f32.gmra.mrb[26].mxu0 %vm391_vm2, %v9766_v5  ;;  %v9806_v22 = vsel %vm230_vm1, %v386_v0, %v387_v59  ;;  %v9809_v5 = vsel %vm1425_vm3, %v3102_v10, %v3103_v35  ;;  %v9825_v43 = vsel %vm1425_vm3, %v3103_v35, %v3105_v54  ;;  %v1517_v0 = vrot.slane %v9216_v26, 2  ;;  %v12313_v59 = vld [vmem:[#allocation2_spill] sm:$0xff]  ;;  %v9853_v54 = vld [vmem:[%s11933_s1 + $0xc] sm:$0xf] }
  0x7e   :  { %6964 = vmatprep.mubr.msk.f32.mxu1 %vm391_vm2, %v9773_v33  ;;  %7406 = vmatprep.mubr.msk.f32.mxu0 %vm391_vm2, %v9776_v16  ;;  %12307 = vst [vmem:[#allocation125_spill] sm:$0xff] %v9806_v22  ;;  %12308 = vst [vmem:[#allocation126_spill] sm:$0xff] %v9809_v5  ;;  %v12309_v33 = vld [vmem:[#allocation64_spill] sm:$0xff]  ;;  %v1512_v16 = vrot.slane %v12310_v39, 2  ;;  %v1522_v10 = vrot.slane %v9256_v34, 2 }
  0x7f   :  { %v1511_v13 = vrot.slane %v12309_v33, 2  ;;  %12311 = vst [vmem:[#allocation64_spill] sm:$0xff] %v9822_v32  ;;  %12312 = vst [vmem:[#allocation65_spill] sm:$0xff] %v9825_v43  ;;  %v9848_v46 = vsel %vm1425_vm3, %v1516_v62, %v1517_v0  ;;  %v1524_v62 = vrot.slane %v9287_v36, 2 }
  0x80   :  { %v9842_v35 = vsel %vm1425_vm3, %v1512_v16, %v1514_v55  ;;  %v9864_v55 = vsel %vm1425_vm3, %v1517_v0, %v1519_v14  ;;  %v1529_v0 = vrot.slane %v9330_v24, 2 }
  0x81   :  { %6965 = vmatmul.mubr.msk.f32.gmra.mrb[60].mxu1 %vm391_vm2, %v9798_v42  ;;  %7407 = vmatmul.mubr.msk.f32.gmra.mrb[28].mxu0 %vm391_vm2, %v9801_v18  ;;  %v9829_v45 = vsel %vm1425_vm3, %v1511_v13, %v1512_v16  ;;  %v1521_v13 = vrot.slane %v9251_v23, 2  ;;  %v12315_v16 = vld [vmem:[#allocation42_spill] sm:$0xff]  ;;  %v9885_v36 = vsel %vm1425_vm3, %v1522_v10, %v1524_v62  ;;  %v12330_v42 = vld [vmem:[#allocation21_spill] sm:$0xff] }
  0x82   :  { %6967 = vmatprep.mubr.msk.f32.mxu1 %vm391_vm2, %v9806_v22  ;;  %7409 = vmatprep.mubr.msk.f32.mxu0 %vm391_vm2, %v9809_v5  ;;  %v1527_v5 = vrot.slane %v9303_v38, 2  ;;  %v12326_v22 = vld [vmem:[#allocation17_spill] sm:$0xff] }
  0x84   :  { %v9902_v24 = vsel %vm1425_vm3, %v1527_v5, %v1529_v0 }
  0x85   :  { %6968 = vmatmul.mubr.msk.f32.gmra.mrb[62].mxu1 %vm391_vm2, %v9822_v32  ;;  %7410 = vmatmul.mubr.msk.f32.gmra.mrb[30].mxu0 %vm391_vm2, %v9825_v43  ;;  %v9870_v43 = vsel %vm1425_vm3, %v1521_v13, %v1522_v10  ;;  %v1531_v13 = vrot.slane %v9341_v50, 2  ;;  %v1534_v10 = vrot.slane %v9373_v58, 2  ;;  %v12320_v32 = vld [vmem:[#allocation8_spill] sm:$0xff] }
  0x86   :  { %6972 = vmatprep.mubr.msk.f32.mxu1 %vm391_vm2, %v12313_v59  ;;  %7412 = vmatprep.mubr.msk.f32.mxu0 %vm391_vm2, %v9829_v45  ;;  %v12314_v59 = vld [vmem:[#allocation3_spill] sm:$0xff] }
  0x89   :  { %6973 = vmatmul.mubr.msk.f32.vlgmr.msra.gmra.mrb[0].mxu1 %vm391_vm2, %v12314_v59  ;;  %7413 = vmatmul.mubr.msk.f32.gmra.mrb[32].mxu0 %vm391_vm2, %v9842_v35  ;;  %v1526_v59 = vrot.slane %v9298_v60, 2 }
  0x8a   :  { %7069 = vmatpush3.msk.msra.mxu1 %vm520_vm0, %v12315_v16  ;;  %6975 = vmatprep.mubr.msk.f32.mxu1 %vm391_vm2, %v12316_v53  ;;  %v12317_v16 = vld [vmem:[#allocation5_spill] sm:$0xff]  ;;  %v1532_v53 = vrot.slane %v9346_v6, 2 }
  0x8b   :  { %7415 = vmatprep.mubr.msk.f32.mxu0 %vm391_vm2, %v9848_v46  ;;  %7166 = vmatprep.subr.msk.mxu1 %vm520_vm0, %v9853_v54  ;;  %v9889_v14 = vsel %vm1425_vm3, %v1526_v59, %v1527_v5  ;;  %v1536_v59 = vrot.slane %v9382_v9, 2  ;;  %v1539_v5 = vrot.slane %v9412_v8, 2  ;;  %v1544_v8 = vrot.slane %v9455_v49, 2 }
  0x8c   :  { %v9906_v62 = vsel %vm1425_vm3, %v1531_v13, %v1532_v53  ;;  %v9919_v58 = vsel %vm1425_vm3, %v1532_v53, %v1534_v10  ;;  %v1541_v13 = vrot.slane %v9423_v21, 2  ;;  %v1546_v10 = vrot.slane %v9464_v25, 2 }
  0x8d   :  { %6976 = vmatmul.mubr.msk.f32.gmra.mrb[2].mxu1 %vm391_vm2, %v12317_v16  ;;  %7416 = vmatmul.mubr.msk.f32.gmra.mrb[34].mxu0 %vm391_vm2, %v9864_v55  ;;  %v12318_v16 = vld [vmem:[#allocation6_spill] sm:$0xff] }
  0x8e   :  { %6978 = vmatprep.mubr.msk.f32.mxu1 %vm391_vm2, %v8662_v11  ;;  %7418 = vmatprep.mubr.msk.f32.mxu0 %vm391_vm2, %v9870_v43  ;;  %v12319_v11 = vld [vmem:[#allocation7_spill] sm:$0xff] }
  0x91   :  { %6979 = vmatmul.mubr.msk.f32.gmra.mrb[4].mxu1 %vm391_vm2, %v12318_v16  ;;  %7419 = vmatmul.mubr.msk.f32.gmra.mrb[36].mxu0 %vm391_vm2, %v9885_v36  ;;  %v1537_v16 = vrot.slane %v9387_v15, 2 }
  0x92   :  { %6981 = vmatprep.mubr.msk.f32.mxu1 %vm391_vm2, %v12319_v11  ;;  %7421 = vmatprep.mubr.msk.f32.mxu0 %vm391_vm2, %v9889_v14  ;;  %v12321_v11 = vld [vmem:[#allocation9_spill] sm:$0xff] }
  0x93   :  { %v9923_v0 = vsel %vm1425_vm3, %v1536_v59, %v1537_v16  ;;  %v1547_v59 = vrot.slane %v9469_v31, 2 }
  0x95   :  { %6982 = vmatmul.mubr.msk.f32.gmra.mrb[6].mxu1 %vm391_vm2, %v12320_v32  ;;  %7422 = vmatmul.mubr.msk.f32.gmra.mrb[38].mxu0 %vm391_vm2, %v9902_v24  ;;  %v1542_v32 = vrot.slane %v9428_v19, 2 }
  0x96   :  { %6984 = vmatprep.mubr.msk.f32.mxu1 %vm391_vm2, %v8714_v30  ;;  %7424 = vmatprep.mubr.msk.f32.mxu0 %vm391_vm2, %v9906_v62  ;;  %v9936_v30 = vsel %vm1425_vm3, %v1537_v16, %v1539_v5  ;;  %v1549_v16 = vrot.slane %v9494_v57, 2  ;;  %v9957_v5 = vsel %vm1425_vm3, %v1546_v10, %v1547_v59  ;;  %v1556_v10 = vrot.slane %v9546_v47, 2 }
  0x97   :  { %v9940_v53 = vsel %vm1425_vm3, %v1541_v13, %v1542_v32  ;;  %v9953_v49 = vsel %vm1425_vm3, %v1542_v32, %v1544_v8  ;;  %12325 = vst [vmem:[#allocation3_spill] sm:$0xff] %v9957_v5  ;;  %v1551_v13 = vrot.slane %v9505_v44, 2  ;;  %v1554_v32 = vrot.slane %v9537_v4, 2 }
  0x98   :  { %12324 = vst [vmem:[#allocation2_spill] sm:$0xff] %v9953_v49  ;;  %v9970_v57 = vsel %vm1425_vm3, %v1547_v59, %v1549_v16  ;;  %v1559_v59 = vrot.slane %v9576_v17, 2 }
  0x99   :  { %6985 = vmatmul.mubr.msk.f32.gmra.mrb[8].mxu1 %vm391_vm2, %v12321_v11  ;;  %7425 = vmatmul.mubr.msk.f32.gmra.mrb[40].mxu0 %vm391_vm2, %v9919_v58  ;;  %v12322_v11 = vld [vmem:[#allocation13_spill] sm:$0xff]  ;;  %12328 = vst [vmem:[#allocation42_spill] sm:$0xff] %v9970_v57 }
  0x9a   :  { %6987 = vmatprep.mubr.msk.f32.mxu1 %vm391_vm2, %v8749_v40  ;;  %7427 = vmatprep.mubr.msk.f32.mxu0 %vm391_vm2, %v9923_v0  ;;  %v12323_v40 = vld [vmem:[#allocation16_spill] sm:$0xff] }
  0x9d   :  { %6988 = vmatmul.mubr.msk.f32.gmra.mrb[10].mxu1 %vm391_vm2, %v12322_v11  ;;  %7428 = vmatmul.mubr.msk.f32.gmra.mrb[42].mxu0 %vm391_vm2, %v9936_v30  ;;  %v1552_v11 = vrot.slane %v9510_v2, 2 }
  0x9e   :  { %6990 = vmatprep.mubr.msk.f32.mxu1 %vm391_vm2, %v12323_v40  ;;  %7430 = vmatprep.mubr.msk.f32.mxu0 %vm391_vm2, %v9940_v53  ;;  %v12327_v40 = vld [vmem:[#allocation20_spill] sm:$0xff] }
  0x9f   :  { %v9974_v8 = vsel %vm1425_vm3, %v1551_v13, %v1552_v11  ;;  %v9987_v4 = vsel %vm1425_vm3, %v1552_v11, %v1554_v32  ;;  %v1561_v13 = vrot.slane %v9587_v20, 2  ;;  %v1564_v11 = vrot.slane %v9619_v29, 2 }
  0xa0   :  { %12329 = vst [vmem:[#allocation4_spill] sm:$0xff] %v9974_v8  ;;  %12332 = vst [vmem:[#allocation5_spill] sm:$0xff] %v9987_v4 }
  0xa1   :  { %6991 = vmatmul.mubr.msk.f32.gmra.mrb[12].mxu1 %vm391_vm2, %v12326_v22  ;;  %7431 = vmatmul.mubr.msk.f32.gmra.mrb[44].mxu0 %vm391_vm2, %v9953_v49  ;;  %v1557_v22 = vrot.slane %v9551_v48, 2 }
  0xa2   :  { %6993 = vmatprep.mubr.msk.f32.mxu1 %vm391_vm2, %v12327_v40  ;;  %7433 = vmatprep.mubr.msk.f32.mxu0 %vm391_vm2, %v9957_v5  ;;  %v12331_v40 = vld [vmem:[#allocation24_spill] sm:$0xff]  ;;  %v12334_v5 = vld [vmem:[#allocation25_spill] sm:$0xff] }
  0xa3   :  { %v9991_v16 = vsel %vm1425_vm3, %v1556_v10, %v1557_v22  ;;  %v10004_v17 = vsel %vm1425_vm3, %v1557_v22, %v1559_v59  ;;  %v1566_v10 = vrot.slane %v9628_v63, 2  ;;  %v1569_v22 = vrot.slane %v9658_v51, 2 }
  0xa4   :  { %12333 = vst [vmem:[#allocation6_spill] sm:$0xff] %v9991_v16  ;;  %12336 = vst [vmem:[#allocation7_spill] sm:$0xff] %v10004_v17 }
  0xa5   :  { %6994 = vmatmul.mubr.msk.f32.gmra.mrb[14].mxu1 %vm391_vm2, %v12330_v42  ;;  %7434 = vmatmul.mubr.msk.f32.gmra.mrb[46].mxu0 %vm391_vm2, %v9970_v57  ;;  %v1562_v42 = vrot.slane %v9592_v37, 2 }
  0xa6   :  { %6996 = vmatprep.mubr.msk.f32.mxu1 %vm391_vm2, %v12331_v40  ;;  %7436 = vmatprep.mubr.msk.f32.mxu0 %vm391_vm2, %v9974_v8  ;;  %v12335_v40 = vld [vmem:[#allocation28_spill] sm:$0xff]  ;;  %v12338_v8 = vld [vmem:[#allocation29_spill] sm:$0xff] }
  0xa7   :  { %v10008_v32 = vsel %vm1425_vm3, %v1561_v13, %v1562_v42  ;;  %v10021_v29 = vsel %vm1425_vm3, %v1562_v42, %v1564_v11  ;;  %v1571_v13 = vrot.slane %v9669_v41, 2  ;;  %v1574_v42 = vrot.slane %v9701_v12, 2 }
  0xa8   :  { %12337 = vst [vmem:[#allocation8_spill] sm:$0xff] %v10008_v32  ;;  %12340 = vst [vmem:[#allocation9_spill] sm:$0xff] %v10021_v29 }
  0xa9   :  { %6997 = vmatmul.mubr.msk.f32.gmra.mrb[16].mxu1 %vm391_vm2, %v12334_v5  ;;  %7437 = vmatmul.mubr.msk.f32.gmra.mrb[48].mxu0 %vm391_vm2, %v9987_v4  ;;  %v1567_v5 = vrot.slane %v9633_v1, 2 }
  0xaa   :  { %6999 = vmatprep.mubr.msk.f32.mxu1 %vm391_vm2, %v12335_v40  ;;  %7439 = vmatprep.mubr.msk.f32.mxu0 %vm391_vm2, %v9991_v16  ;;  %v12339_v40 = vld [vmem:[#allocation32_spill] sm:$0xff]  ;;  %v12342_v16 = vld [vmem:[#allocation33_spill] sm:$0xff] }
  0xab   :  { %v10025_v59 = vsel %vm1425_vm3, %v1566_v10, %v1567_v5  ;;  %v10038_v51 = vsel %vm1425_vm3, %v1567_v5, %v1569_v22  ;;  %v1576_v10 = vrot.slane %v9710_v27, 2  ;;  %v1579_v5 = vrot.slane %v9746_v52, 2  ;;  %v12352_v52 = vld [vmem:[#allocation45_spill] sm:$0xff] }
  0xac   :  { %12341 = vst [vmem:[#allocation13_spill] sm:$0xff] %v10025_v59  ;;  %12344 = vst [vmem:[#allocation16_spill] sm:$0xff] %v10038_v51 }
  0xad   :  { %7000 = vmatmul.mubr.msk.f32.gmra.mrb[18].mxu1 %vm391_vm2, %v12338_v8  ;;  %7440 = vmatmul.mubr.msk.f32.gmra.mrb[50].mxu0 %vm391_vm2, %v10004_v17  ;;  %v1572_v8 = vrot.slane %v9674_v61, 2 }
  0xae   :  { %7002 = vmatprep.mubr.msk.f32.mxu1 %vm391_vm2, %v12339_v40  ;;  %7442 = vmatprep.mubr.msk.f32.mxu0 %vm391_vm2, %v10008_v32  ;;  %v12343_v40 = vld [vmem:[#allocation36_spill] sm:$0xff]  ;;  %v12346_v32 = vld [vmem:[#allocation37_spill] sm:$0xff] }
  0xaf   :  { %v10042_v11 = vsel %vm1425_vm3, %v1571_v13, %v1572_v8  ;;  %v10055_v12 = vsel %vm1425_vm3, %v1572_v8, %v1574_v42  ;;  %v1581_v13 = vrot.slane %v9751_v56, 2  ;;  %v12351_v8 = vld [vmem:[#allocation41_spill] sm:$0xff] }
  0xb0   :  { %12345 = vst [vmem:[#allocation17_spill] sm:$0xff] %v10042_v11  ;;  %12348 = vst [vmem:[#allocation20_spill] sm:$0xff] %v10055_v12 }
  0xb1   :  { %7003 = vmatmul.mubr.msk.f32.gmra.mrb[20].mxu1 %vm391_vm2, %v12342_v16  ;;  %7443 = vmatmul.mubr.msk.f32.gmra.mrb[52].mxu0 %vm391_vm2, %v10021_v29  ;;  %v1577_v16 = vrot.slane %v9715_v28, 2 }
  0xb2   :  { %7005 = vmatprep.mubr.msk.f32.mxu1 %vm391_vm2, %v12343_v40  ;;  %7445 = vmatprep.mubr.msk.f32.mxu0 %vm391_vm2, %v10025_v59  ;;  %v12347_v40 = vld [vmem:[#allocation40_spill] sm:$0xff] }
  0xb3   :  { %v10059_v22 = vsel %vm1425_vm3, %v1576_v10, %v1577_v16  ;;  %v10082_v42 = vsel %vm1425_vm3, %v1577_v16, %v1579_v5  ;;  %v1584_v10 = vrot.slane %v9787_v7, 2  ;;  %v12357_v16 = vld [vmem:[#allocation49_spill] sm:$0xff] }
  0xb4   :  { %12349 = vst [vmem:[#allocation21_spill] sm:$0xff] %v10059_v22  ;;  %12353 = vst [vmem:[#allocation24_spill] sm:$0xff] %v10082_v42 }
  0xb5   :  { %7006 = vmatmul.mubr.msk.f32.gmra.mrb[22].mxu1 %vm391_vm2, %v12346_v32  ;;  %7446 = vmatmul.mubr.msk.f32.gmra.mrb[54].mxu0 %vm391_vm2, %v10038_v51  ;;  %v12350_v32 = vld [vmem:[#allocation120_spill] sm:$0xff] }
  0xb6   :  { %7008 = vmatprep.mubr.msk.f32.mxu1 %vm391_vm2, %v12347_v40  ;;  %7448 = vmatprep.mubr.msk.f32.mxu0 %vm391_vm2, %v10042_v11  ;;  %v1582_v59 = vrot.slane %v12350_v32, 2  ;;  %v10066_v51 = vld [vmem:[%s11934_s0 + $0x330] sm:$0xff]  ;;  %v10071_v40 = vld [vmem:[%s11934_s0 + $0x338] sm:$0xff] }
  0xb7   :  { %v3107_v29 = vrot.slane %v10066_v51, 2 }
  0xb8   :  { %v10086_v11 = vsel %vm1425_vm3, %v1581_v13, %v1582_v59  ;;  %v10104_v7 = vsel %vm1425_vm3, %v1582_v59, %v1584_v10  ;;  %v12363_v10 = vld [vmem:[#allocation54_spill] sm:$0xff] }
  0xb9   :  { %7009 = vmatmul.mubr.msk.f32.gmra.mrb[24].mxu1 %vm391_vm2, %v12351_v8  ;;  %7449 = vmatmul.mubr.msk.f32.gmra.mrb[56].mxu0 %vm391_vm2, %v10055_v12  ;;  %12354 = vst [vmem:[#allocation25_spill] sm:$0xff] %v10086_v11  ;;  %v3108_v8 = vrot.slane %v10071_v40, 2  ;;  %v10093_v12 = vld [vmem:[%s11934_s0 + $0x340] sm:$0x3]  ;;  %12358 = vst [vmem:[#allocation29_spill] sm:$0xff] %v10104_v7 }
  0xba   :  { %7011 = vmatprep.mubr.msk.f32.mxu1 %vm391_vm2, %v12352_v52  ;;  %7451 = vmatprep.mubr.msk.f32.mxu0 %vm391_vm2, %v10059_v22  ;;  %12355 = vst [vmem:[#allocation28_spill] sm:$0xff] %v10093_v12  ;;  %v12356_v52 = vld [vmem:[#allocation46_spill] sm:$0xff]  ;;  %v3110_v5 = vrot.slane %v10093_v12, 2  ;;  %v10229_v12 = vld [vmem:[%s11934_s0 + $0xa8] sm:$0xff] }
  0xbb   :  { %v10108_v13 = vsel %vm1425_vm3, %v3107_v29, %v3108_v8  ;;  %v12360_v22 = vld [vmem:[#allocation50_spill] sm:$0xff]  ;;  %v12364_v29 = vld [vmem:[#allocation60_spill] sm:$0xff]  ;;  %12374 = vst [vmem:[#allocation49_spill] sm:$0xff] %v10229_v12 }
  0xbc   :  { %12359 = vst [vmem:[#allocation32_spill] sm:$0xff] %v10108_v13  ;;  %v10119_v59 = vsel %vm1425_vm3, %v3108_v8, %v3110_v5  ;;  %v10137_v8 = vld [vmem:[%s11933_s1 + $0x20] sm:$0xf]  ;;  %v10144_v5 = vld [vmem:[%s11934_s0 + $0x38] sm:$0xff] }
  0xbd   :  { %7012 = vmatmul.mubr.msk.f32.gmra.mrb[26].mxu1 %vm391_vm2, %v12356_v52  ;;  %7452 = vmatmul.mubr.msk.f32.gmra.mrb[58].mxu0 %vm391_vm2, %v10082_v42  ;;  %v12361_v52 = vld [vmem:[#allocation53_spill] sm:$0xff]  ;;  %12362 = vst [vmem:[#allocation33_spill] sm:$0xff] %v10119_v59 }
  0xbe   :  { %7014 = vmatprep.mubr.msk.f32.mxu1 %vm391_vm2, %v12357_v16  ;;  %7454 = vmatprep.mubr.msk.f32.mxu0 %vm391_vm2, %v10086_v11  ;;  %v12365_v16 = vld [vmem:[#allocation61_spill] sm:$0xff] }
  0xc1   :  { %7015 = vmatmul.mubr.msk.f32.gmra.mrb[28].mxu1 %vm391_vm2, %v12360_v22  ;;  %7455 = vmatmul.mubr.msk.f32.gmra.mrb[60].mxu0 %vm391_vm2, %v10104_v7  ;;  %v10130_v22 = vld [vmem:[%s11934_s0 + $0x30] sm:$0xff] }
  0xc2   :  { %7017 = vmatprep.mubr.msk.f32.mxu1 %vm391_vm2, %v12361_v52  ;;  %7457 = vmatprep.mubr.msk.f32.mxu0 %vm391_vm2, %v10108_v13  ;;  %v12366_v52 = vld [vmem:[#allocation71_spill] sm:$0xff]  ;;  %v10220_v13 = vld [vmem:[%s11934_s0 + $0x98] sm:$0xff] }
  0xc3   :  { %12373 = vst [vmem:[#allocation46_spill] sm:$0xff] %v10220_v13 }
  0xc5   :  { %7018 = vmatmul.mubr.msk.f32.gmra.mrb[30].mxu1 %vm391_vm2, %v12363_v10  ;;  %7458 = vmatmul.mubr.msk.f32.gmra.mrb[62].mxu0 %vm391_vm2, %v10119_v59  ;;  %v10155_v10 = vld [vmem:[%s11934_s0 + $0x48] sm:$0xff]  ;;  %v10211_v59 = vld [vmem:[%s11934_s0 + $0x90] sm:$0xff] }
  0xc6   :  { %7020 = vmatprep.mubr.msk.f32.mxu1 %vm391_vm2, %v12364_v29  ;;  %7462 = vmatprep.mubr.msk.f32.mxu0 %vm391_vm2, %v10130_v22  ;;  %v10166_v29 = vld [vmem:[%s11934_s0 + $0x50] sm:$0xff]  ;;  %12372 = vst [vmem:[#allocation45_spill] sm:$0xff] %v10211_v59 }
  0xc7   :  { %12367 = vst [vmem:[#allocation36_spill] sm:$0xff] %v10166_v29 }
  0xc9   :  { %7021 = vmatmul.mubr.msk.f32.gmra.mrb[32].mxu1 %vm391_vm2, %v12365_v16  ;;  %7463 = vmatmul.mubr.msk.f32.vlgmr.msra.gmra.mrb[0].mxu0 %vm391_vm2, %v10144_v5  ;;  %v10193_v16 = vld [vmem:[%s11934_s0 + $0x78] sm:$0xff] }
  0xca   :  { %7559 = vmatpush3.msk.msra.mxu0 %vm520_vm0, %v12366_v52  ;;  %7023 = vmatprep.mubr.msk.f32.mxu1 %vm391_vm2, %v12309_v33  ;;  %v10175_v33 = vld [vmem:[%s11934_s0 + $0x60] sm:$0xff]  ;;  %12370 = vst [vmem:[#allocation120_spill] sm:$0xff] %v10193_v16 }
  0xcb   :  { %7465 = vmatprep.mubr.msk.f32.mxu0 %vm391_vm2, %v10155_v10  ;;  %7656 = vmatprep.subr.msk.mxu0 %vm520_vm0, %v10137_v8  ;;  %12368 = vst [vmem:[#allocation37_spill] sm:$0xff] %v10175_v33  ;;  %v10202_v52 = vld [vmem:[%s11934_s0 + $0x80] sm:$0xff] }
  0xcc   :  { %12371 = vst [vmem:[#allocation41_spill] sm:$0xff] %v10202_v52 }
  0xcd   :  { %7024 = vmatmul.mubr.msk.f32.gmra.mrb[34].mxu1 %vm391_vm2, %v12310_v39  ;;  %7466 = vmatmul.mubr.msk.f32.gmra.mrb[2].mxu0 %vm391_vm2, %v10166_v29  ;;  %v10184_v39 = vld [vmem:[%s11934_s0 + $0x68] sm:$0xff] }
  0xce   :  { %7026 = vmatprep.mubr.msk.f32.mxu1 %vm391_vm2, %v9211_v3  ;;  %7468 = vmatprep.mubr.msk.f32.mxu0 %vm391_vm2, %v10175_v33  ;;  %12369 = vst [vmem:[#allocation40_spill] sm:$0xff] %v10184_v39 }
  0xd1   :  { %7027 = vmatmul.mubr.msk.f32.gmra.mrb[36].mxu1 %vm391_vm2, %v9216_v26  ;;  %7469 = vmatmul.mubr.msk.f32.gmra.mrb[4].mxu0 %vm391_vm2, %v10184_v39 }
  0xd2   :  { %7029 = vmatprep.mubr.msk.f32.mxu1 %vm391_vm2, %v9251_v23  ;;  %7471 = vmatprep.mubr.msk.f32.mxu0 %vm391_vm2, %v10193_v16  ;;  %v8554_v16 = vld [vmem:[%s11934_s0 + $0x8] sm:$0xff] }
  0xd3   :  { %v1427_v39 = vrot.slane %v8554_v16, 2  ;;  %v10425_v16 = vld [vmem:[%s11934_s0 + $0x1a0] sm:$0xff] }
  0xd5   :  { %7030 = vmatmul.mubr.msk.f32.gmra.mrb[38].mxu1 %vm391_vm2, %v9256_v34  ;;  %7472 = vmatmul.mubr.msk.f32.gmra.mrb[6].mxu0 %vm391_vm2, %v10202_v52 }
  0xd6   :  { %7032 = vmatprep.mubr.msk.f32.mxu1 %vm391_vm2, %v9298_v60  ;;  %7474 = vmatprep.mubr.msk.f32.mxu0 %vm391_vm2, %v10211_v59  ;;  %v10238_v59 = vld [vmem:[%s11934_s0 + $0xb0] sm:$0xff] }
  0xd7   :  { %12375 = vst [vmem:[#allocation50_spill] sm:$0xff] %v10238_v59 }
  0xd9   :  { %7033 = vmatmul.mubr.msk.f32.gmra.mrb[40].mxu1 %vm391_vm2, %v9303_v38  ;;  %7475 = vmatmul.mubr.msk.f32.gmra.mrb[8].mxu0 %vm391_vm2, %v10220_v13  ;;  %v10247_v13 = vld [vmem:[%s11934_s0 + $0xc0] sm:$0xff] }
  0xda   :  { %7035 = vmatprep.mubr.msk.f32.mxu1 %vm391_vm2, %v9341_v50  ;;  %7477 = vmatprep.mubr.msk.f32.mxu0 %vm391_vm2, %v10229_v12  ;;  %12376 = vst [vmem:[#allocation53_spill] sm:$0xff] %v10247_v13  ;;  %v10256_v12 = vld [vmem:[%s11934_s0 + $0xc8] sm:$0xff] }
  0xdb   :  { %12377 = vst [vmem:[#allocation54_spill] sm:$0xff] %v10256_v12 }
  0xdd   :  { %7036 = vmatmul.mubr.msk.f32.gmra.mrb[42].mxu1 %vm391_vm2, %v9346_v6  ;;  %7478 = vmatmul.mubr.msk.f32.gmra.mrb[10].mxu0 %vm391_vm2, %v10238_v59  ;;  %v10265_v59 = vld [vmem:[%s11934_s0 + $0xd8] sm:$0xff] }
  0xde   :  { %7038 = vmatprep.mubr.msk.f32.mxu1 %vm391_vm2, %v9382_v9  ;;  %7480 = vmatprep.mubr.msk.f32.mxu0 %vm391_vm2, %v10247_v13  ;;  %12378 = vst [vmem:[#allocation60_spill] sm:$0xff] %v10265_v59  ;;  %v10274_v13 = vld [vmem:[%s11934_s0 + $0xe0] sm:$0xff] }
  0xdf   :  { %12379 = vst [vmem:[#allocation61_spill] sm:$0xff] %v10274_v13 }
  0xe1   :  { %7039 = vmatmul.mubr.msk.f32.gmra.mrb[44].mxu1 %vm391_vm2, %v9387_v15  ;;  %7481 = vmatmul.mubr.msk.f32.gmra.mrb[12].mxu0 %vm391_vm2, %v10256_v12  ;;  %v10283_v12 = vld [vmem:[%s11934_s0 + $0xf0] sm:$0xff] }
  0xe2   :  { %7041 = vmatprep.mubr.msk.f32.mxu1 %vm391_vm2, %v9423_v21  ;;  %7483 = vmatprep.mubr.msk.f32.mxu0 %vm391_vm2, %v10265_v59  ;;  %12380 = vst [vmem:[#allocation71_spill] sm:$0xff] %v10283_v12  ;;  %v10292_v59 = vld [vmem:[%s11934_s0 + $0xf8] sm:$0xff] }
  0xe3   :  { %12381 = vst [vmem:[#allocation127_spill] sm:$0xff] %v10292_v59 }
  0xe5   :  { %7042 = vmatmul.mubr.msk.f32.gmra.mrb[46].mxu1 %vm391_vm2, %v9428_v19  ;;  %7484 = vmatmul.mubr.msk.f32.gmra.mrb[14].mxu0 %vm391_vm2, %v10274_v13  ;;  %v10301_v13 = vld [vmem:[%s11934_s0 + $0x108] sm:$0xff] }
  0xe6   :  { %7044 = vmatprep.mubr.msk.f32.mxu1 %vm391_vm2, %v9464_v25  ;;  %7486 = vmatprep.mubr.msk.f32.mxu0 %vm391_vm2, %v10283_v12  ;;  %12382 = vst [vmem:[#allocation128_spill] sm:$0xff] %v10301_v13  ;;  %v10310_v12 = vld [vmem:[%s11934_s0 + $0x110] sm:$0xff] }
  0xe7   :  { %12383 = vst [vmem:[#allocation129_spill] sm:$0xff] %v10310_v12 }
  0xe9   :  { %7045 = vmatmul.mubr.msk.f32.gmra.mrb[48].mxu1 %vm391_vm2, %v9469_v31  ;;  %7487 = vmatmul.mubr.msk.f32.gmra.mrb[16].mxu0 %vm391_vm2, %v10292_v59  ;;  %v10319_v59 = vld [vmem:[%s11934_s0 + $0x120] sm:$0xff] }
  0xea   :  { %7047 = vmatprep.mubr.msk.f32.mxu1 %vm391_vm2, %v9505_v44  ;;  %7489 = vmatprep.mubr.msk.f32.mxu0 %vm391_vm2, %v10301_v13  ;;  %12384 = vst [vmem:[#allocation130_spill] sm:$0xff] %v10319_v59  ;;  %v10328_v13 = vld [vmem:[%s11934_s0 + $0x128] sm:$0xff] }
  0xeb   :  { %12385 = vst [vmem:[#allocation131_spill] sm:$0xff] %v10328_v13 }
  0xed   :  { %7048 = vmatmul.mubr.msk.f32.gmra.mrb[50].mxu1 %vm391_vm2, %v9510_v2  ;;  %7490 = vmatmul.mubr.msk.f32.gmra.mrb[18].mxu0 %vm391_vm2, %v10310_v12  ;;  %v10337_v12 = vld [vmem:[%s11934_s0 + $0x138] sm:$0xff] }
  0xee   :  { %7050 = vmatprep.mubr.msk.f32.mxu1 %vm391_vm2, %v9546_v47  ;;  %7492 = vmatprep.mubr.msk.f32.mxu0 %vm391_vm2, %v10319_v59  ;;  %12386 = vst [vmem:[#allocation132_spill] sm:$0xff] %v10337_v12  ;;  %v10346_v59 = vld [vmem:[%s11934_s0 + $0x140] sm:$0xff] }
  0xef   :  { %12387 = vst [vmem:[#allocation133_spill] sm:$0xff] %v10346_v59 }
  0xf1   :  { %7051 = vmatmul.mubr.msk.f32.gmra.mrb[52].mxu1 %vm391_vm2, %v9551_v48  ;;  %7493 = vmatmul.mubr.msk.f32.gmra.mrb[20].mxu0 %vm391_vm2, %v10328_v13  ;;  %v10355_v13 = vld [vmem:[%s11934_s0 + $0x150] sm:$0xff] }
  0xf2   :  { %7053 = vmatprep.mubr.msk.f32.mxu1 %vm391_vm2, %v9587_v20  ;;  %7495 = vmatprep.mubr.msk.f32.mxu0 %vm391_vm2, %v10337_v12  ;;  %12388 = vst [vmem:[#allocation134_spill] sm:$0xff] %v10355_v13  ;;  %v10364_v12 = vld [vmem:[%s11934_s0 + $0x158] sm:$0xff] }
  0xf3   :  { %12389 = vst [vmem:[#allocation135_spill] sm:$0xff] %v10364_v12 }
  0xf5   :  { %7054 = vmatmul.mubr.msk.f32.gmra.mrb[54].mxu1 %vm391_vm2, %v9592_v37  ;;  %7496 = vmatmul.mubr.msk.f32.gmra.mrb[22].mxu0 %vm391_vm2, %v10346_v59  ;;  %v10373_v59 = vld [vmem:[%s11934_s0 + $0x168] sm:$0xff] }
  0xf6   :  { %7056 = vmatprep.mubr.msk.f32.mxu1 %vm391_vm2, %v9628_v63  ;;  %7498 = vmatprep.mubr.msk.f32.mxu0 %vm391_vm2, %v10355_v13  ;;  %12390 = vst [vmem:[#allocation136_spill] sm:$0xff] %v10373_v59  ;;  %v10382_v13 = vld [vmem:[%s11934_s0 + $0x170] sm:$0xff] }
  0xf7   :  { %12391 = vst [vmem:[#allocation137_spill] sm:$0xff] %v10382_v13 }
  0xf9   :  { %7057 = vmatmul.mubr.msk.f32.gmra.mrb[56].mxu1 %vm391_vm2, %v9633_v1  ;;  %7499 = vmatmul.mubr.msk.f32.gmra.mrb[24].mxu0 %vm391_vm2, %v10364_v12  ;;  %v10391_v12 = vld [vmem:[%s11934_s0 + $0x180] sm:$0xff] }
  0xfa   :  { %7059 = vmatprep.mubr.msk.f32.mxu1 %vm391_vm2, %v9669_v41  ;;  %7501 = vmatprep.mubr.msk.f32.mxu0 %vm391_vm2, %v10373_v59  ;;  %12392 = vst [vmem:[#allocation138_spill] sm:$0xff] %v10391_v12  ;;  %v10398_v59 = vld [vmem:[%s11934_s0 + $0x198] sm:$0xff] }
  0xfd   :  { %7060 = vmatmul.mubr.msk.f32.gmra.mrb[58].mxu1 %vm391_vm2, %v9674_v61  ;;  %7502 = vmatmul.mubr.msk.f32.gmra.mrb[26].mxu0 %vm391_vm2, %v10382_v13  ;;  %v8553_v13 = vld [vmem:[%s11934_s0] sm:$0xff] }
  0xfe   :  { %7062 = vmatprep.mubr.msk.f32.mxu1 %vm391_vm2, %v9710_v27  ;;  %7504 = vmatprep.mubr.msk.f32.mxu0 %vm391_vm2, %v10391_v12  ;;  %v1426_v52 = vrot.slane %v8553_v13, 2  ;;  %v10411_v12 = vld [vmem:[%s11934_s0 + $0x188] sm:$0xff]  ;;  %v8556_v13 = vld [vmem:[%s11934_s0 + $0x10] sm:$0x3] }
  0xff   :  { %v1429_v33 = vrot.slane %v8556_v13, 2 }
 0x100   :  { %v1428_v29 = vsel %vm1425_vm3, %v1426_v52, %v1427_v39  ;;  %v12393_v52 = vld [vmem:[#allocation67_spill] sm:$0xff] }
 0x101   :  { %7063 = vmatmul.mubr.msk.f32.gmra.mrb[60].mxu1 %vm391_vm2, %v9715_v28  ;;  %7505 = vmatmul.mubr.msk.f32.gmra.mrb[28].mxu0 %vm391_vm2, %v10411_v12  ;;  %v1430_v13 = vsel %vm1425_vm3, %v1427_v39, %v1429_v33  ;;  %v12398_v33 = vld [vmem:[#allocation77_spill] sm:$0xff] }
 0x102   :  { %7065 = vmatprep.mubr.msk.f32.mxu1 %vm391_vm2, %v9751_v56  ;;  %7507 = vmatprep.mubr.msk.f32.mxu0 %vm391_vm2, %v10398_v59 }
 0x105   :  { %7066 = vmatmul.mubr.msk.f32.gmra.mrb[62].mxu1 %vm391_vm2, %v12350_v32  ;;  %7508 = vmatmul.mubr.msk.f32.gmra.mrb[30].mxu0 %vm391_vm2, %v10425_v16 }
 0x106   :  { %7070 = vmatprep.mubr.msk.f32.mxu1 %vm391_vm2, %v1428_v29  ;;  %7510 = vmatprep.mubr.msk.f32.mxu0 %vm391_vm2, %v9211_v3  ;;  %v10448_v3 = vld [vmem:[%s11933_s1 + $0x10] sm:$0xf] }
 0x107   :  { %v12394_v29 = vld [vmem:[#allocation68_spill] sm:$0xff] }
 0x109   :  { %7071 = vmatmul.mubr.msk.f32.vlgmr.msra.gmra.mrb[0].mxu1 %vm391_vm2, %v1430_v13  ;;  %7511 = vmatmul.mubr.msk.f32.gmra.mrb[32].mxu0 %vm391_vm2, %v9216_v26  ;;  %v12395_v26 = vld [vmem:[#allocation70_spill] sm:$0xff] }
 0x10a   :  { %7167 = vmatpush3.msk.msra.mxu1 %vm520_vm0, %v9853_v54  ;;  %7073 = vmatprep.mubr.msk.f32.mxu1 %vm391_vm2, %v12393_v52  ;;  %v12397_v54 = vld [vmem:[#allocation75_spill] sm:$0xff]  ;;  %v12421_v13 = vld [vmem:[#allocation122_spill] sm:$0xff]  ;;  %v12422_v52 = vld [vmem:[#allocation124_spill] sm:$0xff] }
 0x10b   :  { %7513 = vmatprep.mubr.msk.f32.mxu0 %vm391_vm2, %v9251_v23  ;;  %7754 = vmatprep.subr.msk.mxu1 %vm520_vm0, %v10448_v3  ;;  %v12396_v23 = vld [vmem:[#allocation73_spill] sm:$0xff] }
 0x10d   :  { %7074 = vmatmul.mubr.msk.f32.gmra.mrb[2].mxu1 %vm391_vm2, %v12394_v29  ;;  %7514 = vmatmul.mubr.msk.f32.gmra.mrb[34].mxu0 %vm391_vm2, %v9256_v34  ;;  %v12399_v34 = vld [vmem:[#allocation79_spill] sm:$0xff]  ;;  %v10578_v29 = vld [vmem:[%s11934_s0 + $0x350] sm:$0xff] }
 0x10e   :  { %7076 = vmatprep.mubr.msk.f32.mxu1 %vm391_vm2, %v12395_v26  ;;  %7516 = vmatprep.mubr.msk.f32.mxu0 %vm391_vm2, %v9298_v60  ;;  %v12400_v60 = vld [vmem:[#allocation81_spill] sm:$0xff]  ;;  %12423 = vst [vmem:[#allocation68_spill] sm:$0xff] %v10578_v29 }
 0x111   :  { %7077 = vmatmul.mubr.msk.f32.gmra.mrb[4].mxu1 %vm391_vm2, %v12396_v23  ;;  %7517 = vmatmul.mubr.msk.f32.gmra.mrb[36].mxu0 %vm391_vm2, %v9303_v38  ;;  %v12401_v38 = vld [vmem:[#allocation83_spill] sm:$0xff] }
 0x112   :  { %7079 = vmatprep.mubr.msk.f32.mxu1 %vm391_vm2, %v12397_v54  ;;  %7519 = vmatprep.mubr.msk.f32.mxu0 %vm391_vm2, %v9341_v50  ;;  %v12402_v50 = vld [vmem:[#allocation85_spill] sm:$0xff] }
 0x115   :  { %7080 = vmatmul.mubr.msk.f32.gmra.mrb[6].mxu1 %vm391_vm2, %v12398_v33  ;;  %7520 = vmatmul.mubr.msk.f32.gmra.mrb[38].mxu0 %vm391_vm2, %v9346_v6  ;;  %v12403_v6 = vld [vmem:[#allocation87_spill] sm:$0xff] }
 0x116   :  { %7082 = vmatprep.mubr.msk.f32.mxu1 %vm391_vm2, %v12399_v34  ;;  %7522 = vmatprep.mubr.msk.f32.mxu0 %vm391_vm2, %v9382_v9  ;;  %v12404_v9 = vld [vmem:[#allocation89_spill] sm:$0xff] }
 0x119   :  { %7083 = vmatmul.mubr.msk.f32.gmra.mrb[8].mxu1 %vm391_vm2, %v12400_v60  ;;  %7523 = vmatmul.mubr.msk.f32.gmra.mrb[40].mxu0 %vm391_vm2, %v9387_v15  ;;  %v12405_v15 = vld [vmem:[#allocation91_spill] sm:$0xff] }
 0x11a   :  { %7085 = vmatprep.mubr.msk.f32.mxu1 %vm391_vm2, %v12401_v38  ;;  %7525 = vmatprep.mubr.msk.f32.mxu0 %vm391_vm2, %v9423_v21  ;;  %v12406_v21 = vld [vmem:[#allocation93_spill] sm:$0xff] }
 0x11d   :  { %7086 = vmatmul.mubr.msk.f32.gmra.mrb[10].mxu1 %vm391_vm2, %v12402_v50  ;;  %7526 = vmatmul.mubr.msk.f32.gmra.mrb[42].mxu0 %vm391_vm2, %v9428_v19  ;;  %v12407_v19 = vld [vmem:[#allocation95_spill] sm:$0xff] }
 0x11e   :  { %7088 = vmatprep.mubr.msk.f32.mxu1 %vm391_vm2, %v12403_v6  ;;  %7528 = vmatprep.mubr.msk.f32.mxu0 %vm391_vm2, %v9464_v25  ;;  %v12408_v25 = vld [vmem:[#allocation97_spill] sm:$0xff] }
 0x121   :  { %7089 = vmatmul.mubr.msk.f32.gmra.mrb[12].mxu1 %vm391_vm2, %v12404_v9  ;;  %7529 = vmatmul.mubr.msk.f32.gmra.mrb[44].mxu0 %vm391_vm2, %v9469_v31  ;;  %v12409_v31 = vld [vmem:[#allocation99_spill] sm:$0xff] }
 0x122   :  { %7091 = vmatprep.mubr.msk.f32.mxu1 %vm391_vm2, %v12405_v15  ;;  %7531 = vmatprep.mubr.msk.f32.mxu0 %vm391_vm2, %v9505_v44  ;;  %v12410_v44 = vld [vmem:[#allocation101_spill] sm:$0xff] }
 0x125   :  { %7092 = vmatmul.mubr.msk.f32.gmra.mrb[14].mxu1 %vm391_vm2, %v12406_v21  ;;  %7532 = vmatmul.mubr.msk.f32.gmra.mrb[46].mxu0 %vm391_vm2, %v9510_v2  ;;  %v12411_v2 = vld [vmem:[#allocation103_spill] sm:$0xff] }
 0x126   :  { %7094 = vmatprep.mubr.msk.f32.mxu1 %vm391_vm2, %v12407_v19  ;;  %7534 = vmatprep.mubr.msk.f32.mxu0 %vm391_vm2, %v9546_v47  ;;  %v12412_v47 = vld [vmem:[#allocation105_spill] sm:$0xff] }
 0x129   :  { %7095 = vmatmul.mubr.msk.f32.gmra.mrb[16].mxu1 %vm391_vm2, %v12408_v25  ;;  %7535 = vmatmul.mubr.msk.f32.gmra.mrb[48].mxu0 %vm391_vm2, %v9551_v48  ;;  %v12413_v48 = vld [vmem:[#allocation107_spill] sm:$0xff] }
 0x12a   :  { %7097 = vmatprep.mubr.msk.f32.mxu1 %vm391_vm2, %v12409_v31  ;;  %7537 = vmatprep.mubr.msk.f32.mxu0 %vm391_vm2, %v9587_v20  ;;  %v12414_v20 = vld [vmem:[#allocation109_spill] sm:$0xff] }
 0x12d   :  { %7098 = vmatmul.mubr.msk.f32.gmra.mrb[18].mxu1 %vm391_vm2, %v12410_v44  ;;  %7538 = vmatmul.mubr.msk.f32.gmra.mrb[50].mxu0 %vm391_vm2, %v9592_v37  ;;  %v12415_v37 = vld [vmem:[#allocation111_spill] sm:$0xff] }
 0x12e   :  { %7100 = vmatprep.mubr.msk.f32.mxu1 %vm391_vm2, %v12411_v2  ;;  %7540 = vmatprep.mubr.msk.f32.mxu0 %vm391_vm2, %v9628_v63  ;;  %v12416_v63 = vld [vmem:[#allocation113_spill] sm:$0xff] }
 0x131   :  { %7101 = vmatmul.mubr.msk.f32.gmra.mrb[20].mxu1 %vm391_vm2, %v12412_v47  ;;  %7541 = vmatmul.mubr.msk.f32.gmra.mrb[52].mxu0 %vm391_vm2, %v9633_v1  ;;  %v12417_v1 = vld [vmem:[#allocation115_spill] sm:$0xff] }
 0x132   :  { %7103 = vmatprep.mubr.msk.f32.mxu1 %vm391_vm2, %v12413_v48  ;;  %7543 = vmatprep.mubr.msk.f32.mxu0 %vm391_vm2, %v9669_v41  ;;  %v12418_v41 = vld [vmem:[#allocation117_spill] sm:$0xff] }
 0x135   :  { %7104 = vmatmul.mubr.msk.f32.gmra.mrb[22].mxu1 %vm391_vm2, %v12414_v20  ;;  %7544 = vmatmul.mubr.msk.f32.gmra.mrb[54].mxu0 %vm391_vm2, %v9674_v61  ;;  %v12419_v61 = vld [vmem:[#allocation119_spill] sm:$0xff] }
 0x136   :  { %7106 = vmatprep.mubr.msk.f32.mxu1 %vm391_vm2, %v12415_v37  ;;  %7546 = vmatprep.mubr.msk.f32.mxu0 %vm391_vm2, %v9710_v27  ;;  %v10559_v27 = vld [vmem:[%s11934_s0 + $0x348] sm:$0xff] }
 0x137   :  { %12420 = vst [vmem:[#allocation67_spill] sm:$0xff] %v10559_v27 }
 0x139   :  { %7107 = vmatmul.mubr.msk.f32.gmra.mrb[24].mxu1 %vm391_vm2, %v12416_v63  ;;  %7547 = vmatmul.mubr.msk.f32.gmra.mrb[56].mxu0 %vm391_vm2, %v9715_v28 }
 0x13a   :  { %7109 = vmatprep.mubr.msk.f32.mxu1 %vm391_vm2, %v12417_v1  ;;  %7549 = vmatprep.mubr.msk.f32.mxu0 %vm391_vm2, %v9751_v56  ;;  %v8558_v56 = vld [vmem:[%s11934_s0 + $0x1b0] sm:$0xff] }
 0x13b   :  { %v1506_v28 = vrot.slane %v8558_v56, 2  ;;  %v8560_v56 = vld [vmem:[%s11934_s0 + $0x1c0] sm:$0x3] }
 0x13d   :  { %7110 = vmatmul.mubr.msk.f32.gmra.mrb[26].mxu1 %vm391_vm2, %v12418_v41  ;;  %7550 = vmatmul.mubr.msk.f32.gmra.mrb[58].mxu0 %vm391_vm2, %v12350_v32  ;;  %v8559_v32 = vld [vmem:[%s11934_s0 + $0x1b8] sm:$0xff]  ;;  %v12425_v41 = vld [vmem:[#allocation11_spill] sm:$0xff] }
 0x13e   :  { %7112 = vmatprep.mubr.msk.f32.mxu1 %vm391_vm2, %v12419_v61  ;;  %7552 = vmatprep.mubr.msk.f32.mxu0 %vm391_vm2, %v10066_v51  ;;  %v1507_v39 = vrot.slane %v8559_v32, 2  ;;  %v1509_v32 = vrot.slane %v8560_v56, 2  ;;  %v12435_v56 = vld [vmem:[#allocation30_spill] sm:$0xff] }
 0x140   :  { %v1510_v61 = vsel %vm1425_vm3, %v1507_v39, %v1509_v32  ;;  %v12436_v32 = vld [vmem:[#allocation31_spill] sm:$0xff] }
 0x141   :  { %7113 = vmatmul.mubr.msk.f32.gmra.mrb[28].mxu1 %vm391_vm2, %v12421_v13  ;;  %7553 = vmatmul.mubr.msk.f32.gmra.mrb[60].mxu0 %vm391_vm2, %v10071_v40  ;;  %v1508_v13 = vsel %vm1425_vm3, %v1506_v28, %v1507_v39  ;;  %v12426_v28 = vld [vmem:[#allocation12_spill] sm:$0xff]  ;;  %v12433_v39 = vld [vmem:[#allocation26_spill] sm:$0xff] }
 0x142   :  { %7115 = vmatprep.mubr.msk.f32.mxu1 %vm391_vm2, %v12422_v52  ;;  %7555 = vmatprep.mubr.msk.f32.mxu0 %vm391_vm2, %v10559_v27  ;;  %v12424_v52 = vld [vmem:[#allocation10_spill] sm:$0xff] }
 0x145   :  { %7116 = vmatmul.mubr.msk.f32.gmra.mrb[30].mxu1 %vm391_vm2, %v9801_v18  ;;  %7556 = vmatmul.mubr.msk.f32.gmra.mrb[62].mxu0 %vm391_vm2, %v10578_v29 }
 0x146   :  { %7118 = vmatprep.mubr.msk.f32.mxu1 %vm391_vm2, %v1508_v13  ;;  %7560 = vmatprep.mubr.msk.f32.mxu0 %vm391_vm2, %v12424_v52  ;;  %v12427_v13 = vld [vmem:[#allocation14_spill] sm:$0xff]  ;;  %v12434_v52 = vld [vmem:[#allocation27_spill] sm:$0xff] }
 0x149   :  { %7119 = vmatmul.mubr.msk.f32.gmra.mrb[32].mxu1 %vm391_vm2, %v1510_v61  ;;  %7561 = vmatmul.mubr.msk.f32.vlgmr.msra.gmra.mrb[0].mxu0 %vm391_vm2, %v12425_v41  ;;  %v12428_v61 = vld [vmem:[#allocation15_spill] sm:$0xff] }
 0x14a   :  { %7657 = vmatpush3.msk.msra.mxu0 %vm520_vm0, %v10137_v8  ;;  %7121 = vmatprep.mubr.msk.f32.mxu1 %vm391_vm2, %v9829_v45  ;;  %v12429_v8 = vld [vmem:[#allocation18_spill] sm:$0xff]  ;;  %v12430_v45 = vld [vmem:[#allocation19_spill] sm:$0xff] }
 0x14b   :  { %7563 = vmatprep.mubr.msk.f32.mxu0 %vm391_vm2, %v12426_v28  ;;  %v12432_v41 = vld [vmem:[#allocation23_spill] sm:$0xff]  ;;  %v12437_v28 = vld [vmem:[#allocation34_spill] sm:$0xff] }
 0x14d   :  { %7122 = vmatmul.mubr.msk.f32.gmra.mrb[34].mxu1 %vm391_vm2, %v9842_v35  ;;  %7564 = vmatmul.mubr.msk.f32.gmra.mrb[2].mxu0 %vm391_vm2, %v12427_v13  ;;  %v12431_v35 = vld [vmem:[#allocation22_spill] sm:$0xff]  ;;  %v12438_v13 = vld [vmem:[#allocation35_spill] sm:$0xff] }
 0x14e   :  { %7124 = vmatprep.mubr.msk.f32.mxu1 %vm391_vm2, %v9848_v46  ;;  %7566 = vmatprep.mubr.msk.f32.mxu0 %vm391_vm2, %v12428_v61  ;;  %v12439_v61 = vld [vmem:[#allocation38_spill] sm:$0xff] }
 0x151   :  { %7125 = vmatmul.mubr.msk.f32.gmra.mrb[36].mxu1 %vm391_vm2, %v9864_v55  ;;  %7567 = vmatmul.mubr.msk.f32.gmra.mrb[4].mxu0 %vm391_vm2, %v12429_v8  ;;  %v12440_v8 = vld [vmem:[#allocation3_spill] sm:$0xff] }
 0x152   :  { %7127 = vmatprep.mubr.msk.f32.mxu1 %vm391_vm2, %v9870_v43  ;;  %7569 = vmatprep.mubr.msk.f32.mxu0 %vm391_vm2, %v12430_v45  ;;  %v12441_v45 = vld [vmem:[#allocation39_spill] sm:$0xff] }
 0x155   :  { %7128 = vmatmul.mubr.msk.f32.gmra.mrb[38].mxu1 %vm391_vm2, %v9885_v36  ;;  %7570 = vmatmul.mubr.msk.f32.gmra.mrb[6].mxu0 %vm391_vm2, %v12431_v35  ;;  %v12442_v35 = vld [vmem:[#allocation43_spill] sm:$0xff] }
 0x156   :  { %7130 = vmatprep.mubr.msk.f32.mxu1 %vm391_vm2, %v9889_v14  ;;  %7572 = vmatprep.mubr.msk.f32.mxu0 %vm391_vm2, %v12432_v41  ;;  %v12443_v41 = vld [vmem:[#allocation4_spill] sm:$0xff] }
 0x159   :  { %7131 = vmatmul.mubr.msk.f32.gmra.mrb[40].mxu1 %vm391_vm2, %v9902_v24  ;;  %7573 = vmatmul.mubr.msk.f32.gmra.mrb[8].mxu0 %vm391_vm2, %v12433_v39  ;;  %v12444_v39 = vld [vmem:[#allocation44_spill] sm:$0xff] }
 0x15a   :  { %7133 = vmatprep.mubr.msk.f32.mxu1 %vm391_vm2, %v9906_v62  ;;  %7575 = vmatprep.mubr.msk.f32.mxu0 %vm391_vm2, %v12434_v52  ;;  %v12445_v52 = vld [vmem:[#allocation47_spill] sm:$0xff] }
 0x15d   :  { %7134 = vmatmul.mubr.msk.f32.gmra.mrb[42].mxu1 %vm391_vm2, %v9919_v58  ;;  %7576 = vmatmul.mubr.msk.f32.gmra.mrb[10].mxu0 %vm391_vm2, %v12435_v56  ;;  %v12446_v56 = vld [vmem:[#allocation6_spill] sm:$0xff] }
 0x15e   :  { %7136 = vmatprep.mubr.msk.f32.mxu1 %vm391_vm2, %v9923_v0  ;;  %7578 = vmatprep.mubr.msk.f32.mxu0 %vm391_vm2, %v12436_v32  ;;  %v12447_v32 = vld [vmem:[#allocation48_spill] sm:$0xff] }
 0x161   :  { %7137 = vmatmul.mubr.msk.f32.gmra.mrb[44].mxu1 %vm391_vm2, %v9936_v30  ;;  %7579 = vmatmul.mubr.msk.f32.gmra.mrb[12].mxu0 %vm391_vm2, %v12437_v28  ;;  %v12448_v28 = vld [vmem:[#allocation51_spill] sm:$0xff] }
 0x162   :  { %7139 = vmatprep.mubr.msk.f32.mxu1 %vm391_vm2, %v9940_v53  ;;  %7581 = vmatprep.mubr.msk.f32.mxu0 %vm391_vm2, %v12438_v13  ;;  %v12449_v13 = vld [vmem:[#allocation8_spill] sm:$0xff] }
 0x165   :  { %7140 = vmatmul.mubr.msk.f32.gmra.mrb[46].mxu1 %vm391_vm2, %v9953_v49  ;;  %7582 = vmatmul.mubr.msk.f32.gmra.mrb[14].mxu0 %vm391_vm2, %v12439_v61  ;;  %v12450_v61 = vld [vmem:[#allocation52_spill] sm:$0xff] }
 0x166   :  { %7142 = vmatprep.mubr.msk.f32.mxu1 %vm391_vm2, %v12440_v8  ;;  %7584 = vmatprep.mubr.msk.f32.mxu0 %vm391_vm2, %v12441_v45  ;;  %v12451_v45 = vld [vmem:[#allocation9_spill] sm:$0xff] }
 0x169   :  { %7143 = vmatmul.mubr.msk.f32.gmra.mrb[48].mxu1 %vm391_vm2, %v9970_v57  ;;  %7585 = vmatmul.mubr.msk.f32.gmra.mrb[16].mxu0 %vm391_vm2, %v12442_v35  ;;  %v12452_v35 = vld [vmem:[#allocation55_spill] sm:$0xff]  ;;  %v12488_v57 = vld [vmem:[#allocation102_spill] sm:$0xff] }
 0x16a   :  { %7145 = vmatprep.mubr.msk.f32.mxu1 %vm391_vm2, %v12443_v41  ;;  %7587 = vmatprep.mubr.msk.f32.mxu0 %vm391_vm2, %v12444_v39  ;;  %v12453_v39 = vld [vmem:[#allocation13_spill] sm:$0xff]  ;;  %v12486_v41 = vld [vmem:[#allocation100_spill] sm:$0xff] }
 0x16d   :  { %7146 = vmatmul.mubr.msk.f32.gmra.mrb[50].mxu1 %vm391_vm2, %v9987_v4  ;;  %7588 = vmatmul.mubr.msk.f32.gmra.mrb[18].mxu0 %vm391_vm2, %v12445_v52  ;;  %v12454_v52 = vld [vmem:[#allocation56_spill] sm:$0xff]  ;;  %v12484_v4 = vld [vmem:[#allocation98_spill] sm:$0xff] }
 0x16e   :  { %7148 = vmatprep.mubr.msk.f32.mxu1 %vm391_vm2, %v12446_v56  ;;  %7590 = vmatprep.mubr.msk.f32.mxu0 %vm391_vm2, %v12447_v32  ;;  %v12455_v32 = vld [vmem:[#allocation16_spill] sm:$0xff]  ;;  %v12463_v56 = vld [vmem:[#allocation66_spill] sm:$0xff] }
 0x171   :  { %7149 = vmatmul.mubr.msk.f32.gmra.mrb[52].mxu1 %vm391_vm2, %v10004_v17  ;;  %7591 = vmatmul.mubr.msk.f32.gmra.mrb[20].mxu0 %vm391_vm2, %v12448_v28  ;;  %v12456_v28 = vld [vmem:[#allocation58_spill] sm:$0xff] }
 0x172   :  { %7151 = vmatprep.mubr.msk.f32.mxu1 %vm391_vm2, %v12449_v13  ;;  %7593 = vmatprep.mubr.msk.f32.mxu0 %vm391_vm2, %v12450_v61  ;;  %v12457_v13 = vld [vmem:[#allocation17_spill] sm:$0xff]  ;;  %v12458_v61 = vld [vmem:[#allocation59_spill] sm:$0xff] }
 0x175   :  { %7152 = vmatmul.mubr.msk.f32.gmra.mrb[54].mxu1 %vm391_vm2, %v12451_v45  ;;  %7594 = vmatmul.mubr.msk.f32.gmra.mrb[22].mxu0 %vm391_vm2, %v12452_v35  ;;  %v4038_v35 = vrot.slane %v10398_v59, 1  ;;  %v4039_v45 = vrot.slane %v10425_v16, 1 }
 0x176   :  { %7154 = vmatprep.mubr.msk.f32.mxu1 %vm391_vm2, %v12453_v39  ;;  %7596 = vmatprep.mubr.msk.f32.mxu0 %vm391_vm2, %v12454_v52  ;;  %v10702_v52 = vld [vmem:[%s11934_s0 + $0x1a8] sm:$0x3]  ;;  %v12459_v39 = vld [vmem:[#allocation20_spill] sm:$0xff] }
 0x177   :  { %v4040_v17 = vsel %vm230_vm1, %v4038_v35, %v4039_v45  ;;  %v12464_v35 = vld [vmem:[#allocation74_spill] sm:$0xff] }
 0x179   :  { %7155 = vmatmul.mubr.msk.f32.gmra.mrb[56].mxu1 %vm391_vm2, %v12455_v32  ;;  %7597 = vmatmul.mubr.msk.f32.gmra.mrb[24].mxu0 %vm391_vm2, %v12456_v28  ;;  %v12460_v32 = vld [vmem:[#allocation62_spill] sm:$0xff]  ;;  %v12461_v28 = vld [vmem:[#allocation21_spill] sm:$0xff] }
 0x17a   :  { %7157 = vmatprep.mubr.msk.f32.mxu1 %vm391_vm2, %v12457_v13  ;;  %7599 = vmatprep.mubr.msk.f32.mxu0 %vm391_vm2, %v12458_v61  ;;  %v12462_v13 = vld [vmem:[#allocation63_spill] sm:$0xff]  ;;  %v4041_v61 = vrot.slane %v10702_v52, 1 }
 0x17d   :  { %7158 = vmatmul.mubr.msk.f32.gmra.mrb[58].mxu1 %vm391_vm2, %v12459_v39  ;;  %7600 = vmatmul.mubr.msk.f32.gmra.mrb[26].mxu0 %vm391_vm2, %v12460_v32  ;;  %v4042_v32 = vsel %vm230_vm1, %v4039_v45, %v4041_v61  ;;  %v12466_v45 = vld [vmem:[#allocation78_spill] sm:$0xff]  ;;  %v12467_v61 = vld [vmem:[#allocation80_spill] sm:$0xff] }
 0x17e   :  { %7160 = vmatprep.mubr.msk.f32.mxu1 %vm391_vm2, %v12461_v28  ;;  %7602 = vmatprep.mubr.msk.f32.mxu0 %vm391_vm2, %v12462_v13  ;;  %v8561_v13 = vld [vmem:[%s11934_s0 + $0x18] sm:$0xff]  ;;  %v12480_v28 = vld [vmem:[#allocation94_spill] sm:$0xff]  ;;  %v12482_v39 = vld [vmem:[#allocation96_spill] sm:$0xff] }
 0x181   :  { %7161 = vmatmul.mubr.msk.f32.gmra.mrb[60].mxu1 %vm391_vm2, %v10082_v42  ;;  %7603 = vmatmul.mubr.msk.f32.gmra.mrb[28].mxu0 %vm391_vm2, %v12463_v56  ;;  %v12465_v56 = vld [vmem:[#allocation76_spill] sm:$0xff] }
 0x182   :  { %7163 = vmatprep.mubr.msk.f32.mxu1 %vm391_vm2, %v10086_v11  ;;  %7605 = vmatprep.mubr.msk.f32.mxu0 %vm391_vm2, %v4040_v17  ;;  %v8562_v17 = vld [vmem:[%s11934_s0 + $0x20] sm:$0xff]  ;;  %v12478_v42 = vld [vmem:[#allocation92_spill] sm:$0xff] }
 0x183   :  { %v12476_v11 = vld [vmem:[#allocation90_spill] sm:$0xff] }
 0x185   :  { %7164 = vmatmul.mubr.msk.f32.gmra.mrb[62].mxu1 %vm391_vm2, %v10104_v7  ;;  %7606 = vmatmul.mubr.msk.f32.gmra.mrb[30].mxu0 %vm391_vm2, %v4042_v32  ;;  %v12468_v32 = vld [vmem:[#allocation82_spill] sm:$0xff]  ;;  %v12474_v7 = vld [vmem:[#allocation88_spill] sm:$0xff] }
 0x186   :  { %7168 = vmatprep.mubr.msk.f32.mxu1 %vm391_vm2, %v8561_v13  ;;  %7608 = vmatprep.mubr.msk.f32.mxu0 %vm391_vm2, %v12464_v35  ;;  %v12469_v13 = vld [vmem:[#allocation36_spill] sm:$0xff] }
 0x189   :  { %7169 = vmatmul.mubr.msk.f32.vlgmr.msra.gmra.mrb[0].mxu1 %vm391_vm2, %v8562_v17  ;;  %7609 = vmatmul.mubr.msk.f32.gmra.mrb[32].mxu0 %vm391_vm2, %v12465_v56  ;;  %v12472_v17 = vld [vmem:[#allocation86_spill] sm:$0xff] }
 0x18a   :  { %7755 = vmatpush3.msk.msra.mxu1 %vm520_vm0, %v10448_v3  ;;  %7171 = vmatprep.mubr.msk.f32.mxu1 %vm391_vm2, %v10130_v22  ;;  %v12470_v3 = vld [vmem:[#allocation84_spill] sm:$0xff]  ;;  %v12471_v22 = vld [vmem:[#allocation37_spill] sm:$0xff] }
 0x18b   :  { %7611 = vmatprep.mubr.msk.f32.mxu0 %vm391_vm2, %v12466_v45 }
 0x18d   :  { %7172 = vmatmul.mubr.msk.f32.gmra.mrb[2].mxu1 %vm391_vm2, %v10144_v5  ;;  %7612 = vmatmul.mubr.msk.f32.gmra.mrb[34].mxu0 %vm391_vm2, %v12467_v61  ;;  %v12473_v5 = vld [vmem:[#allocation40_spill] sm:$0xff] }
 0x18e   :  { %7174 = vmatprep.mubr.msk.f32.mxu1 %vm391_vm2, %v10155_v10  ;;  %7614 = vmatprep.mubr.msk.f32.mxu0 %vm391_vm2, %v12468_v32  ;;  %v12475_v10 = vld [vmem:[#allocation120_spill] sm:$0xff] }
 0x191   :  { %7175 = vmatmul.mubr.msk.f32.gmra.mrb[4].mxu1 %vm391_vm2, %v12469_v13  ;;  %7615 = vmatmul.mubr.msk.f32.gmra.mrb[36].mxu0 %vm391_vm2, %v12470_v3  ;;  %v12477_v13 = vld [vmem:[#allocation41_spill] sm:$0xff] }
 0x192   :  { %7177 = vmatprep.mubr.msk.f32.mxu1 %vm391_vm2, %v12471_v22  ;;  %7617 = vmatprep.mubr.msk.f32.mxu0 %vm391_vm2, %v12472_v17  ;;  %v12479_v22 = vld [vmem:[#allocation45_spill] sm:$0xff] }
 0x195   :  { %7178 = vmatmul.mubr.msk.f32.gmra.mrb[6].mxu1 %vm391_vm2, %v12473_v5  ;;  %7618 = vmatmul.mubr.msk.f32.gmra.mrb[38].mxu0 %vm391_vm2, %v12474_v7  ;;  %v12481_v5 = vld [vmem:[#allocation46_spill] sm:$0xff] }
 0x196   :  { %7180 = vmatprep.mubr.msk.f32.mxu1 %vm391_vm2, %v12475_v10  ;;  %7620 = vmatprep.mubr.msk.f32.mxu0 %vm391_vm2, %v12476_v11  ;;  %v12483_v10 = vld [vmem:[#allocation49_spill] sm:$0xff] }
 0x199   :  { %7181 = vmatmul.mubr.msk.f32.gmra.mrb[8].mxu1 %vm391_vm2, %v12477_v13  ;;  %7621 = vmatmul.mubr.msk.f32.gmra.mrb[40].mxu0 %vm391_vm2, %v12478_v42  ;;  %v12485_v13 = vld [vmem:[#allocation50_spill] sm:$0xff] }
 0x19a   :  { %7183 = vmatprep.mubr.msk.f32.mxu1 %vm391_vm2, %v12479_v22  ;;  %7623 = vmatprep.mubr.msk.f32.mxu0 %vm391_vm2, %v12480_v28  ;;  %v12487_v22 = vld [vmem:[#allocation53_spill] sm:$0xff]  ;;  %v4044_v28 = vrot.slane %v10578_v29, 1 }
 0x19d   :  { %7184 = vmatmul.mubr.msk.f32.gmra.mrb[10].mxu1 %vm391_vm2, %v12481_v5  ;;  %7624 = vmatmul.mubr.msk.f32.gmra.mrb[42].mxu0 %vm391_vm2, %v12482_v39  ;;  %v12489_v5 = vld [vmem:[#allocation54_spill] sm:$0xff]  ;;  %v12490_v39 = vld [vmem:[#allocation104_spill] sm:$0xff] }
 0x19e   :  { %7186 = vmatprep.mubr.msk.f32.mxu1 %vm391_vm2, %v12483_v10  ;;  %7626 = vmatprep.mubr.msk.f32.mxu0 %vm391_vm2, %v12484_v4  ;;  %v12491_v10 = vld [vmem:[#allocation60_spill] sm:$0xff]  ;;  %v12492_v4 = vld [vmem:[#allocation106_spill] sm:$0xff] }
 0x1a1   :  { %7187 = vmatmul.mubr.msk.f32.gmra.mrb[12].mxu1 %vm391_vm2, %v12485_v13  ;;  %7627 = vmatmul.mubr.msk.f32.gmra.mrb[44].mxu0 %vm391_vm2, %v12486_v41  ;;  %v12493_v13 = vld [vmem:[#allocation61_spill] sm:$0xff]  ;;  %v12494_v41 = vld [vmem:[#allocation108_spill] sm:$0xff] }
 0x1a2   :  { %7189 = vmatprep.mubr.msk.f32.mxu1 %vm391_vm2, %v12487_v22  ;;  %7629 = vmatprep.mubr.msk.f32.mxu0 %vm391_vm2, %v12488_v57  ;;  %v12495_v22 = vld [vmem:[#allocation71_spill] sm:$0xff]  ;;  %v12496_v57 = vld [vmem:[#allocation110_spill] sm:$0xff] }
 0x1a5   :  { %7190 = vmatmul.mubr.msk.f32.gmra.mrb[14].mxu1 %vm391_vm2, %v12489_v5  ;;  %7630 = vmatmul.mubr.msk.f32.gmra.mrb[46].mxu0 %vm391_vm2, %v12490_v39  ;;  %v12497_v5 = vld [vmem:[#allocation127_spill] sm:$0xff]  ;;  %v12498_v39 = vld [vmem:[#allocation112_spill] sm:$0xff] }
 0x1a6   :  { %7192 = vmatprep.mubr.msk.f32.mxu1 %vm391_vm2, %v12491_v10  ;;  %7632 = vmatprep.mubr.msk.f32.mxu0 %vm391_vm2, %v12492_v4  ;;  %v12499_v10 = vld [vmem:[#allocation128_spill] sm:$0xff]  ;;  %v12500_v4 = vld [vmem:[#allocation114_spill] sm:$0xff] }
 0x1a9   :  { %7193 = vmatmul.mubr.msk.f32.gmra.mrb[16].mxu1 %vm391_vm2, %v12493_v13  ;;  %7633 = vmatmul.mubr.msk.f32.gmra.mrb[48].mxu0 %vm391_vm2, %v12494_v41  ;;  %v12501_v13 = vld [vmem:[#allocation129_spill] sm:$0xff]  ;;  %v12502_v41 = vld [vmem:[#allocation116_spill] sm:$0xff] }
 0x1aa   :  { %7195 = vmatprep.mubr.msk.f32.mxu1 %vm391_vm2, %v12495_v22  ;;  %7635 = vmatprep.mubr.msk.f32.mxu0 %vm391_vm2, %v12496_v57  ;;  %v12503_v22 = vld [vmem:[#allocation130_spill] sm:$0xff] }
 0x1ab   :  { %v12504_v57 = vld [vmem:[#allocation118_spill] sm:$0xff] }
 0x1ad   :  { %7196 = vmatmul.mubr.msk.f32.gmra.mrb[18].mxu1 %vm391_vm2, %v12497_v5  ;;  %7636 = vmatmul.mubr.msk.f32.gmra.mrb[50].mxu0 %vm391_vm2, %v12498_v39  ;;  %v12505_v5 = vld [vmem:[#allocation131_spill] sm:$0xff]  ;;  %v12506_v39 = vld [vmem:[#allocation121_spill] sm:$0xff] }
 0x1ae   :  { %7198 = vmatprep.mubr.msk.f32.mxu1 %vm391_vm2, %v12499_v10  ;;  %7638 = vmatprep.mubr.msk.f32.mxu0 %vm391_vm2, %v12500_v4  ;;  %v12507_v10 = vld [vmem:[#allocation132_spill] sm:$0xff]  ;;  %v12508_v4 = vld [vmem:[#allocation123_spill] sm:$0xff] }
 0x1b1   :  { %7199 = vmatmul.mubr.msk.f32.gmra.mrb[20].mxu1 %vm391_vm2, %v12501_v13  ;;  %7639 = vmatmul.mubr.msk.f32.gmra.mrb[52].mxu0 %vm391_vm2, %v12502_v41  ;;  %v2637_v13 = vrot.slane %v10066_v51, 1  ;;  %v2638_v41 = vrot.slane %v10071_v40, 1 }
 0x1b2   :  { %7201 = vmatprep.mubr.msk.f32.mxu1 %vm391_vm2, %v12503_v22  ;;  %7641 = vmatprep.mubr.msk.f32.mxu0 %vm391_vm2, %v12504_v57  ;;  %v12509_v22 = vld [vmem:[#allocation133_spill] sm:$0xff] }
 0x1b3   :  { %v12510_v57 = vld [vmem:[#allocation57_spill] sm:$0xff]  ;;  %v10845_v49 = vsel %vm230_vm1, %v2637_v13, %v2638_v41 }
 0x1b5   :  { %7202 = vmatmul.mubr.msk.f32.gmra.mrb[22].mxu1 %vm391_vm2, %v12505_v5  ;;  %7642 = vmatmul.mubr.msk.f32.gmra.mrb[54].mxu0 %vm391_vm2, %v12506_v39  ;;  %v12511_v5 = vld [vmem:[#allocation134_spill] sm:$0xff]  ;;  %v12512_v39 = vld [vmem:[#allocation125_spill] sm:$0xff] }
 0x1b6   :  { %7204 = vmatprep.mubr.msk.f32.mxu1 %vm391_vm2, %v12507_v10  ;;  %7644 = vmatprep.mubr.msk.f32.mxu0 %vm391_vm2, %v12508_v4  ;;  %v12513_v10 = vld [vmem:[#allocation28_spill] sm:$0xff]  ;;  %v4043_v4 = vrot.slane %v10559_v27, 1  ;;  %v12517_v27 = vld [vmem:[#allocation137_spill] sm:$0xff] }
 0x1b7   :  { %v2640_v8 = vrot.slane %v12513_v10, 1 }
 0x1b8   :  { %v4045_v29 = vsel %vm230_vm1, %v4043_v4, %v4044_v28  ;;  %v8563_v4 = vld [vmem:[%s11934_s0 + $0x1c8] sm:$0xff] }
 0x1b9   :  { %7205 = vmatmul.mubr.msk.f32.gmra.mrb[24].mxu1 %vm391_vm2, %v12509_v22  ;;  %7645 = vmatmul.mubr.msk.f32.gmra.mrb[56].mxu0 %vm391_vm2, %v12510_v57  ;;  %v10850_v22 = vld [vmem:[%s11934_s0 + $0x358] sm:$0x3]  ;;  %v12514_v57 = vld [vmem:[#allocation135_spill] sm:$0xff]  ;;  %v10861_v13 = vsel %vm230_vm1, %v2638_v41, %v2640_v8  ;;  %v12521_v41 = vld [vmem:[#allocation122_spill] sm:$0xff] }
 0x1ba   :  { %7207 = vmatprep.mubr.msk.f32.mxu1 %vm391_vm2, %v12511_v5  ;;  %7647 = vmatprep.mubr.msk.f32.mxu0 %vm391_vm2, %v12512_v39  ;;  %v12515_v5 = vld [vmem:[#allocation64_spill] sm:$0xff]  ;;  %v4046_v10 = vrot.slane %v10850_v22, 1  ;;  %v12520_v8 = vld [vmem:[#allocation119_spill] sm:$0xff] }
 0x1bb   :  { %v12516_v39 = vld [vmem:[#allocation136_spill] sm:$0xff] }
 0x1bd   :  { %7208 = vmatmul.mubr.msk.f32.gmra.mrb[26].mxu1 %vm391_vm2, %v12514_v57  ;;  %7648 = vmatmul.mubr.msk.f32.gmra.mrb[58].mxu0 %vm391_vm2, %v12515_v5  ;;  %v12518_v57 = vld [vmem:[#allocation138_spill] sm:$0xff] }
 0x1be   :  { %7210 = vmatprep.mubr.msk.f32.mxu1 %vm391_vm2, %v12516_v39  ;;  %7650 = vmatprep.mubr.msk.f32.mxu0 %vm391_vm2, %v10845_v49  ;;  %v4047_v39 = vsel %vm230_vm1, %v4044_v28, %v4046_v10  ;;  %v8589_v28 = vld [vmem:[%s11934_s0 + $0x300] sm:$0xff]  ;;  %v12522_v10 = vld [vmem:[#allocation124_spill] sm:$0xff] }
 0x1c1   :  { %7211 = vmatmul.mubr.msk.f32.gmra.mrb[28].mxu1 %vm391_vm2, %v12517_v27  ;;  %7651 = vmatmul.mubr.msk.f32.gmra.mrb[60].mxu0 %vm391_vm2, %v10861_v13  ;;  %v8564_v27 = vld [vmem:[%s11934_s0 + $0x1d0] sm:$0xff] }
 0x1c2   :  { %7213 = vmatprep.mubr.msk.f32.mxu1 %vm391_vm2, %v12518_v57  ;;  %7653 = vmatprep.mubr.msk.f32.mxu0 %vm391_vm2, %v4045_v29  ;;  %v12519_v29 = vld [vmem:[#allocation117_spill] sm:$0xff]  ;;  %v4508_v57 = vrot.slane %v10398_v59, 2  ;;  %v4511_v59 = vrot.slane %v10702_v52, 2 }
 0x1c3   :  { %v12525_v52 = vld [vmem:[#allocation69_spill] sm:$0xff] }
 0x1c5   :  { %7214 = vmatmul.mubr.msk.f32.gmra.mrb[30].mxu1 %vm391_vm2, %v10411_v12  ;;  %7654 = vmatmul.mubr.msk.f32.gmra.mrb[62].mxu0 %vm391_vm2, %v4047_v39  ;;  %v8565_v12 = vld [vmem:[%s11934_s0 + $0x1e0] sm:$0xff]  ;;  %v4509_v39 = vrot.slane %v10425_v16, 2 }
 0x1c6   :  { %7216 = vmatprep.mubr.msk.f32.mxu1 %vm391_vm2, %v8563_v4  ;;  %7658 = vmatprep.mubr.msk.f32.mxu0 %vm391_vm2, %v12395_v26  ;;  %v8566_v26 = vld [vmem:[%s11934_s0 + $0x1e8] sm:$0xff] }
 0x1c7   :  { %v8590_v4 = vld [vmem:[%s11934_s0 + $0x308] sm:$0xff]  ;;  %v4510_v16 = vsel %vm1425_vm3, %v4508_v57, %v4509_v39 }
 0x1c9   :  { %7217 = vmatmul.mubr.msk.f32.gmra.mrb[32].mxu1 %vm391_vm2, %v8564_v27  ;;  %7659 = vmatmul.mubr.msk.f32.vlgmr.msra.gmra.mrb[0].mxu0 %vm391_vm2, %v12396_v23  ;;  %v8567_v23 = vld [vmem:[%s11934_s0 + $0x1f8] sm:$0xff] }
 0x1ca   :  { %7219 = vmatprep.mubr.msk.f32.mxu1 %vm391_vm2, %v8565_v12  ;;  %7661 = vmatprep.mubr.msk.f32.mxu0 %vm391_vm2, %v12397_v54  ;;  %v8568_v54 = vld [vmem:[%s11934_s0 + $0x200] sm:$0xff]  ;;  %v8591_v27 = vld [vmem:[%s11934_s0 + $0x318] sm:$0xff] }
 0x1cb   :  { %v12523_v12 = vld [vmem:[#allocation126_spill] sm:$0xff] }
 0x1cd   :  { %7220 = vmatmul.mubr.msk.f32.gmra.mrb[34].mxu1 %vm391_vm2, %v8566_v26  ;;  %7662 = vmatmul.mubr.msk.f32.gmra.mrb[2].mxu0 %vm391_vm2, %v12398_v33  ;;  %v8569_v33 = vld [vmem:[%s11934_s0 + $0x210] sm:$0xff]  ;;  %v8592_v26 = vld [vmem:[%s11934_s0 + $0x320] sm:$0xff] }
 0x1ce   :  { %7222 = vmatprep.mubr.msk.f32.mxu1 %vm391_vm2, %v8567_v23  ;;  %7664 = vmatprep.mubr.msk.f32.mxu0 %vm391_vm2, %v12399_v34  ;;  %v8570_v34 = vld [vmem:[%s11934_s0 + $0x218] sm:$0xff]  ;;  %v4512_v23 = vsel %vm1425_vm3, %v4509_v39, %v4511_v59 }
 0x1d1   :  { %7223 = vmatmul.mubr.msk.f32.gmra.mrb[36].mxu1 %vm391_vm2, %v8568_v54  ;;  %7665 = vmatmul.mubr.msk.f32.gmra.mrb[4].mxu0 %vm391_vm2, %v12400_v60  ;;  %v8571_v60 = vld [vmem:[%s11934_s0 + $0x228] sm:$0xff]  ;;  %v12526_v54 = vld [vmem:[#allocation72_spill] sm:$0xff] }
 0x1d2   :  { %7225 = vmatprep.mubr.msk.f32.mxu1 %vm391_vm2, %v8569_v33  ;;  %7667 = vmatprep.mubr.msk.f32.mxu0 %vm391_vm2, %v12401_v38  ;;  %v8572_v38 = vld [vmem:[%s11934_s0 + $0x230] sm:$0xff] }
 0x1d3   :  { %v12550_v33 = vld [vmem:[#allocation116_spill] sm:$0xff] }
 0x1d5   :  { %7226 = vmatmul.mubr.msk.f32.gmra.mrb[38].mxu1 %vm391_vm2, %v8570_v34  ;;  %7668 = vmatmul.mubr.msk.f32.gmra.mrb[6].mxu0 %vm391_vm2, %v12402_v50  ;;  %v8573_v50 = vld [vmem:[%s11934_s0 + $0x240] sm:$0xff]  ;;  %v12551_v34 = vld [vmem:[#allocation20_spill] sm:$0xff] }
 0x1d6   :  { %7228 = vmatprep.mubr.msk.f32.mxu1 %vm391_vm2, %v8571_v60  ;;  %7670 = vmatprep.mubr.msk.f32.mxu0 %vm391_vm2, %v12403_v6  ;;  %v8574_v6 = vld [vmem:[%s11934_s0 + $0x248] sm:$0xff]  ;;  %v12552_v60 = vld [vmem:[#allocation118_spill] sm:$0xff] }
 0x1d9   :  { %7229 = vmatmul.mubr.msk.f32.gmra.mrb[40].mxu1 %vm391_vm2, %v8572_v38  ;;  %7671 = vmatmul.mubr.msk.f32.gmra.mrb[8].mxu0 %vm391_vm2, %v12404_v9  ;;  %v8575_v9 = vld [vmem:[%s11934_s0 + $0x258] sm:$0xff] }
 0x1da   :  { %7231 = vmatprep.mubr.msk.f32.mxu1 %vm391_vm2, %v8573_v50  ;;  %7673 = vmatprep.mubr.msk.f32.mxu0 %vm391_vm2, %v12405_v15  ;;  %v8576_v15 = vld [vmem:[%s11934_s0 + $0x260] sm:$0xff]  ;;  %v12553_v38 = vld [vmem:[#allocation21_spill] sm:$0xff] }
 0x1db   :  { %v12554_v50 = vld [vmem:[#allocation121_spill] sm:$0xff] }
 0x1dd   :  { %7232 = vmatmul.mubr.msk.f32.gmra.mrb[42].mxu1 %vm391_vm2, %v8574_v6  ;;  %7674 = vmatmul.mubr.msk.f32.gmra.mrb[10].mxu0 %vm391_vm2, %v12406_v21  ;;  %v8577_v21 = vld [vmem:[%s11934_s0 + $0x270] sm:$0xff] }
 0x1de   :  { %7234 = vmatprep.mubr.msk.f32.mxu1 %vm391_vm2, %v8575_v9  ;;  %7676 = vmatprep.mubr.msk.f32.mxu0 %vm391_vm2, %v12407_v19  ;;  %v8578_v19 = vld [vmem:[%s11934_s0 + $0x278] sm:$0xff]  ;;  %v12555_v6 = vld [vmem:[#allocation24_spill] sm:$0xff]  ;;  %v12556_v9 = vld [vmem:[#allocation123_spill] sm:$0xff] }
 0x1e1   :  { %7235 = vmatmul.mubr.msk.f32.gmra.mrb[44].mxu1 %vm391_vm2, %v8576_v15  ;;  %7677 = vmatmul.mubr.msk.f32.gmra.mrb[12].mxu0 %vm391_vm2, %v12408_v25  ;;  %v8579_v25 = vld [vmem:[%s11934_s0 + $0x288] sm:$0xff]  ;;  %v12557_v15 = vld [vmem:[#allocation25_spill] sm:$0xff] }
 0x1e2   :  { %7237 = vmatprep.mubr.msk.f32.mxu1 %vm391_vm2, %v8577_v21  ;;  %7679 = vmatprep.mubr.msk.f32.mxu0 %vm391_vm2, %v12409_v31  ;;  %v8580_v31 = vld [vmem:[%s11934_s0 + $0x290] sm:$0xff]  ;;  %v12558_v21 = vld [vmem:[#allocation67_spill] sm:$0xff] }
 0x1e5   :  { %7238 = vmatmul.mubr.msk.f32.gmra.mrb[46].mxu1 %vm391_vm2, %v8578_v19  ;;  %7680 = vmatmul.mubr.msk.f32.gmra.mrb[14].mxu0 %vm391_vm2, %v12410_v44  ;;  %v8581_v44 = vld [vmem:[%s11934_s0 + $0x2a0] sm:$0xff]  ;;  %v4513_v19 = vrot.slane %v12558_v21, 2 }
 0x1e6   :  { %7240 = vmatprep.mubr.msk.f32.mxu1 %vm391_vm2, %v8579_v25  ;;  %7682 = vmatprep.mubr.msk.f32.mxu0 %vm391_vm2, %v12411_v2  ;;  %v8582_v2 = vld [vmem:[%s11934_s0 + $0x2a8] sm:$0xff]  ;;  %v12559_v25 = vld [vmem:[#allocation68_spill] sm:$0xff] }
 0x1e9   :  { %7241 = vmatmul.mubr.msk.f32.gmra.mrb[48].mxu1 %vm391_vm2, %v8580_v31  ;;  %7683 = vmatmul.mubr.msk.f32.gmra.mrb[16].mxu0 %vm391_vm2, %v12412_v47  ;;  %v8583_v47 = vld [vmem:[%s11934_s0 + $0x2b8] sm:$0xff]  ;;  %v4514_v31 = vrot.slane %v12559_v25, 2 }
 0x1ea   :  { %7243 = vmatprep.mubr.msk.f32.mxu1 %vm391_vm2, %v8581_v44  ;;  %7685 = vmatprep.mubr.msk.f32.mxu0 %vm391_vm2, %v12413_v48  ;;  %v8584_v48 = vld [vmem:[%s11934_s0 + $0x2c0] sm:$0xff]  ;;  %v12560_v44 = vld [vmem:[#allocation57_spill] sm:$0xff] }
 0x1ed   :  { %7244 = vmatmul.mubr.msk.f32.gmra.mrb[50].mxu1 %vm391_vm2, %v8582_v2  ;;  %7686 = vmatmul.mubr.msk.f32.gmra.mrb[18].mxu0 %vm391_vm2, %v12414_v20  ;;  %v8585_v20 = vld [vmem:[%s11934_s0 + $0x2d0] sm:$0xff]  ;;  %v12561_v2 = vld [vmem:[#allocation29_spill] sm:$0xff] }
 0x1ee   :  { %7246 = vmatprep.mubr.msk.f32.mxu1 %vm391_vm2, %v8583_v47  ;;  %7688 = vmatprep.mubr.msk.f32.mxu0 %vm391_vm2, %v12415_v37  ;;  %v8586_v37 = vld [vmem:[%s11934_s0 + $0x2d8] sm:$0xff] }
 0x1ef   :  { %v12562_v47 = vld [vmem:[#allocation125_spill] sm:$0xff] }
 0x1f1   :  { %7247 = vmatmul.mubr.msk.f32.gmra.mrb[52].mxu1 %vm391_vm2, %v8584_v48  ;;  %7689 = vmatmul.mubr.msk.f32.gmra.mrb[20].mxu0 %vm391_vm2, %v12416_v63  ;;  %v8587_v63 = vld [vmem:[%s11934_s0 + $0x2e8] sm:$0xff]  ;;  %v12563_v48 = vld [vmem:[#allocation32_spill] sm:$0xff] }
 0x1f2   :  { %7249 = vmatprep.mubr.msk.f32.mxu1 %vm391_vm2, %v8585_v20  ;;  %7691 = vmatprep.mubr.msk.f32.mxu0 %vm391_vm2, %v12417_v1  ;;  %v8588_v1 = vld [vmem:[%s11934_s0 + $0x2f0] sm:$0xff]  ;;  %v4516_v20 = vrot.slane %v10850_v22, 2 }
 0x1f5   :  { %7250 = vmatmul.mubr.msk.f32.gmra.mrb[54].mxu1 %vm391_vm2, %v8586_v37  ;;  %7692 = vmatmul.mubr.msk.f32.gmra.mrb[22].mxu0 %vm391_vm2, %v12519_v29  ;;  %v4515_v37 = vsel %vm1425_vm3, %v4513_v19, %v4514_v31  ;;  %v12564_v29 = vld [vmem:[#allocation33_spill] sm:$0xff] }
 0x1f6   :  { %7252 = vmatprep.mubr.msk.f32.mxu1 %vm391_vm2, %v8587_v63  ;;  %7694 = vmatprep.mubr.msk.f32.mxu0 %vm391_vm2, %v12520_v8  ;;  %v4517_v63 = vsel %vm1425_vm3, %v4514_v31, %v4516_v20 }
 0x1f9   :  { %7253 = vmatmul.mubr.msk.f32.gmra.mrb[56].mxu1 %vm391_vm2, %v8588_v1  ;;  %7695 = vmatmul.mubr.msk.f32.gmra.mrb[24].mxu0 %vm391_vm2, %v12521_v41 }
 0x1fa   :  { %7255 = vmatprep.mubr.msk.f32.mxu1 %vm391_vm2, %v8589_v28  ;;  %7697 = vmatprep.mubr.msk.f32.mxu0 %vm391_vm2, %v12522_v10 }
 0x1fd   :  { %7256 = vmatmul.mubr.msk.f32.gmra.mrb[58].mxu1 %vm391_vm2, %v8590_v4  ;;  %7698 = vmatmul.mubr.msk.f32.gmra.mrb[26].mxu0 %vm391_vm2, %v9801_v18  ;;  %v12524_v18 = vld [vmem:[#allocation65_spill] sm:$0xff] }
 0x1fe   :  { %7258 = vmatprep.mubr.msk.f32.mxu1 %vm391_vm2, %v8591_v27  ;;  %7700 = vmatprep.mubr.msk.f32.mxu0 %vm391_vm2, %v12523_v12 }
 0x201   :  { %7259 = vmatmul.mubr.msk.f32.gmra.mrb[60].mxu1 %vm391_vm2, %v8592_v26  ;;  %7701 = vmatmul.mubr.msk.f32.gmra.mrb[28].mxu0 %vm391_vm2, %v12524_v18 }
 0x202   :  { %7261 = vmatprep.mubr.msk.f32.mxu1 %vm391_vm2, %v10066_v51  ;;  %7703 = vmatprep.mubr.msk.f32.mxu0 %vm391_vm2, %v4510_v16  ;;  %v12538_v51 = vld [vmem:[#allocation104_spill] sm:$0xff] }
 0x205   :  { %7262 = vmatmul.mubr.msk.f32.gmra.mrb[62].mxu1 %vm391_vm2, %v10071_v40  ;;  %7704 = vmatmul.mubr.msk.f32.gmra.mrb[30].mxu0 %vm391_vm2, %v4512_v23  ;;  %v12540_v40 = vld [vmem:[#allocation106_spill] sm:$0xff] }
 0x206   :  { %7314 = vmatprep.mubr.msk.f32.mxu1 %vm391_vm2, %v12525_v52  ;;  %7706 = vmatprep.mubr.msk.f32.mxu0 %vm391_vm2, %v9848_v46  ;;  %v12528_v46 = vld [vmem:[#allocation94_spill] sm:$0xff] }
 0x209   :  { %7315 = vmatmul.mubr.msk.f32.vlgmr.msra.gmra.mrb[32].mxu1 %vm391_vm2, %v12526_v54  ;;  %7707 = vmatmul.mubr.msk.f32.gmra.mrb[32].mxu0 %vm391_vm2, %v9864_v55  ;;  %v12529_v55 = vld [vmem:[#allocation3_spill] sm:$0xff] }
 0x20a   :  { %7317 = vmatprep.mubr.msk.f32.mxu1 %vm391_vm2, %v12464_v35  ;;  %7709 = vmatprep.mubr.msk.f32.mxu0 %vm391_vm2, %v9870_v43  ;;  %v12527_v43 = vld [vmem:[#allocation2_spill] sm:$0xff]  ;;  %v12543_v35 = vld [vmem:[#allocation9_spill] sm:$0xff] }
 0x20d   :  { %7318 = vmatmul.mubr.msk.f32.gmra.mrb[34].mxu1 %vm391_vm2, %v12465_v56  ;;  %7710 = vmatmul.mubr.msk.f32.gmra.mrb[34].mxu0 %vm391_vm2, %v9885_v36  ;;  %v12530_v36 = vld [vmem:[#allocation96_spill] sm:$0xff]  ;;  %v12544_v56 = vld [vmem:[#allocation110_spill] sm:$0xff] }
 0x20e   :  { %7320 = vmatprep.mubr.msk.f32.mxu1 %vm391_vm2, %v12466_v45  ;;  %7712 = vmatprep.mubr.msk.f32.mxu0 %vm391_vm2, %v9889_v14  ;;  %v12531_v14 = vld [vmem:[#allocation42_spill] sm:$0xff]  ;;  %v12545_v45 = vld [vmem:[#allocation13_spill] sm:$0xff] }
 0x211   :  { %7321 = vmatmul.mubr.msk.f32.gmra.mrb[36].mxu1 %vm391_vm2, %v12467_v61  ;;  %7713 = vmatmul.mubr.msk.f32.gmra.mrb[36].mxu0 %vm391_vm2, %v9902_v24  ;;  %v12532_v24 = vld [vmem:[#allocation98_spill] sm:$0xff]  ;;  %v12546_v61 = vld [vmem:[#allocation112_spill] sm:$0xff] }
 0x212   :  { %7323 = vmatprep.mubr.msk.f32.mxu1 %vm391_vm2, %v12468_v32  ;;  %7715 = vmatprep.mubr.msk.f32.mxu0 %vm391_vm2, %v9906_v62  ;;  %v12533_v62 = vld [vmem:[#allocation4_spill] sm:$0xff] }
 0x213   :  { %v12547_v32 = vld [vmem:[#allocation16_spill] sm:$0xff] }
 0x215   :  { %7324 = vmatmul.mubr.msk.f32.gmra.mrb[38].mxu1 %vm391_vm2, %v12470_v3  ;;  %7716 = vmatmul.mubr.msk.f32.gmra.mrb[38].mxu0 %vm391_vm2, %v9919_v58  ;;  %v12534_v58 = vld [vmem:[#allocation100_spill] sm:$0xff]  ;;  %v12548_v3 = vld [vmem:[#allocation114_spill] sm:$0xff] }
 0x216   :  { %7326 = vmatprep.mubr.msk.f32.mxu1 %vm391_vm2, %v12472_v17  ;;  %7718 = vmatprep.mubr.msk.f32.mxu0 %vm391_vm2, %v9923_v0  ;;  %v12535_v0 = vld [vmem:[#allocation5_spill] sm:$0xff] }
 0x217   :  { %v12549_v17 = vld [vmem:[#allocation17_spill] sm:$0xff] }
 0x219   :  { %7327 = vmatmul.mubr.msk.f32.gmra.mrb[40].mxu1 %vm391_vm2, %v12474_v7  ;;  %7719 = vmatmul.mubr.msk.f32.gmra.mrb[40].mxu0 %vm391_vm2, %v9936_v30  ;;  %v12536_v30 = vld [vmem:[#allocation102_spill] sm:$0xff]  ;;  %v12542_v7 = vld [vmem:[#allocation108_spill] sm:$0xff] }
 0x21a   :  { %7329 = vmatprep.mubr.msk.f32.mxu1 %vm391_vm2, %v12476_v11  ;;  %7721 = vmatprep.mubr.msk.f32.mxu0 %vm391_vm2, %v9940_v53  ;;  %v12537_v53 = vld [vmem:[#allocation6_spill] sm:$0xff]  ;;  %v12539_v11 = vld [vmem:[#allocation7_spill] sm:$0xff] }
 0x21d   :  { %7330 = vmatmul.mubr.msk.f32.gmra.mrb[42].mxu1 %vm391_vm2, %v12478_v42  ;;  %7722 = vmatmul.mubr.msk.f32.gmra.mrb[42].mxu0 %vm391_vm2, %v12527_v43  ;;  %v12541_v42 = vld [vmem:[#allocation8_spill] sm:$0xff] }
 0x21e   :  { %7332 = vmatprep.mubr.msk.f32.mxu1 %vm391_vm2, %v12528_v46  ;;  %7724 = vmatprep.mubr.msk.f32.mxu0 %vm391_vm2, %v12529_v55 }
 0x221   :  { %7333 = vmatmul.mubr.msk.f32.gmra.mrb[44].mxu1 %vm391_vm2, %v12530_v36  ;;  %7725 = vmatmul.mubr.msk.f32.gmra.mrb[44].mxu0 %vm391_vm2, %v12531_v14 }
 0x222   :  { %7335 = vmatprep.mubr.msk.f32.mxu1 %vm391_vm2, %v12532_v24  ;;  %7727 = vmatprep.mubr.msk.f32.mxu0 %vm391_vm2, %v12533_v62 }
 0x225   :  { %7336 = vmatmul.mubr.msk.f32.gmra.mrb[46].mxu1 %vm391_vm2, %v12534_v58  ;;  %7728 = vmatmul.mubr.msk.f32.gmra.mrb[46].mxu0 %vm391_vm2, %v12535_v0 }
 0x226   :  { %7338 = vmatprep.mubr.msk.f32.mxu1 %vm391_vm2, %v12536_v30  ;;  %7730 = vmatprep.mubr.msk.f32.mxu0 %vm391_vm2, %v12537_v53 }
 0x229   :  { %7339 = vmatmul.mubr.msk.f32.gmra.mrb[48].mxu1 %vm391_vm2, %v12538_v51  ;;  %7731 = vmatmul.mubr.msk.f32.gmra.mrb[48].mxu0 %vm391_vm2, %v12539_v11  ;;  %v11251_v11 = vld [vmem:[%s11935_s2] ss:$0 sm:$0xff] }
 0x22a   :  { %7341 = vmatprep.mubr.msk.f32.mxu1 %vm391_vm2, %v12540_v40  ;;  %7733 = vmatprep.mubr.msk.f32.mxu0 %vm391_vm2, %v12541_v42 }
 0x22d   :  { %7342 = vmatmul.mubr.msk.f32.gmra.mrb[50].mxu1 %vm391_vm2, %v12542_v7  ;;  %7734 = vmatmul.mubr.msk.f32.gmra.mrb[50].mxu0 %vm391_vm2, %v12543_v35  ;;  %v11256_v7 = vld [vmem:[%s11936_s3] ss:$0 sm:$0xff] }
 0x22e   :  { %7344 = vmatprep.mubr.msk.f32.mxu1 %vm391_vm2, %v12544_v56  ;;  %7736 = vmatprep.mubr.msk.f32.mxu0 %vm391_vm2, %v12545_v45 }
 0x231   :  { %7345 = vmatmul.mubr.msk.f32.gmra.mrb[52].mxu1 %vm391_vm2, %v12546_v61  ;;  %7737 = vmatmul.mubr.msk.f32.gmra.mrb[52].mxu0 %vm391_vm2, %v12547_v32 }
 0x232   :  { %7347 = vmatprep.mubr.msk.f32.mxu1 %vm391_vm2, %v12548_v3  ;;  %7739 = vmatprep.mubr.msk.f32.mxu0 %vm391_vm2, %v12549_v17 }
 0x235   :  { %7348 = vmatmul.mubr.msk.f32.gmra.mrb[54].mxu1 %vm391_vm2, %v12550_v33  ;;  %7740 = vmatmul.mubr.msk.f32.gmra.mrb[54].mxu0 %vm391_vm2, %v12551_v34 }
 0x236   :  { %7350 = vmatprep.mubr.msk.f32.mxu1 %vm391_vm2, %v12552_v60  ;;  %7742 = vmatprep.mubr.msk.f32.mxu0 %vm391_vm2, %v12553_v38 }
 0x239   :  { %7351 = vmatmul.mubr.msk.f32.gmra.mrb[56].mxu1 %vm391_vm2, %v12554_v50  ;;  %7743 = vmatmul.mubr.msk.f32.gmra.mrb[56].mxu0 %vm391_vm2, %v12555_v6 }
 0x23a   :  { %7353 = vmatprep.mubr.msk.f32.mxu1 %vm391_vm2, %v12556_v9  ;;  %7745 = vmatprep.mubr.msk.f32.mxu0 %vm391_vm2, %v12557_v15 }
 0x23d   :  { %7354 = vmatmul.mubr.msk.f32.gmra.mrb[58].mxu1 %vm391_vm2, %v12560_v44  ;;  %7746 = vmatmul.mubr.msk.f32.gmra.mrb[58].mxu0 %vm391_vm2, %v12561_v2 }
 0x23e   :  { %7356 = vmatprep.mubr.msk.f32.mxu1 %vm391_vm2, %v12562_v47  ;;  %7748 = vmatprep.mubr.msk.f32.mxu0 %vm391_vm2, %v12563_v48 }
 0x241   :  { %7357 = vmatmul.mubr.msk.f32.gmra.mrb[60].mxu1 %vm391_vm2, %v12515_v5  ;;  %7749 = vmatmul.mubr.msk.f32.gmra.mrb[60].mxu0 %vm391_vm2, %v12564_v29 }
 0x242   :  { %7359 = vmatprep.mubr.msk.f32.mxu1 %vm391_vm2, %v10845_v49  ;;  %7751 = vmatprep.mubr.msk.f32.mxu0 %vm391_vm2, %v4515_v37 }
 0x245   :  { %7360 = vmatmul.mubr.msk.f32.gmra.mrb[62].mxu1 %vm391_vm2, %v10861_v13  ;;  %7752 = vmatmul.mubr.msk.f32.gmra.mrb[62].mxu0 %vm391_vm2, %v4517_v63 }
 0x25c   :  { %v7170_v22 = vpop.f32.mrb[0].mxu1 }
 0x25d   :  { %v2247_v8 = vpop.f32.mrb[1].mxu1 }
 0x260   :  { %v7173_v1 = vpop.f32.mrb[2].mxu1 }
 0x261   :  { %v2257_v41 = vpop.f32.mrb[3].mxu1 }
 0x264   :  { %v7176_v5 = vpop.f32.mrb[4].mxu1 }
 0x265   :  { %v2267_v28 = vpop.f32.mrb[5].mxu1 }
 0x268   :  { %v7179_v10 = vpop.f32.mrb[6].mxu1 }
 0x269   :  { %v11198_v57 = vpop.f32.mrb[7].mxu1 }
 0x26c   :  { %v11200_v39 = vpop.f32.mrb[8].mxu1 }
 0x26d   :  { %v11202_v49 = vpop.f32.mrb[9].mxu1 }
 0x270   :  { %v11204_v4 = vpop.f32.mrb[10].mxu1 }
 0x271   :  { %v11206_v27 = vpop.f32.mrb[11].mxu1 }
 0x274   :  { %v11208_v13 = vpop.f32.mrb[12].mxu1 }
 0x275   :  { %v11210_v12 = vpop.f32.mrb[13].mxu1 }
 0x278   :  { %v11212_v59 = vpop.f32.mrb[14].mxu1 }
 0x279   :  { %v11214_v16 = vpop.f32.mrb[15].mxu1 }
 0x27c   :  { %v11216_v26 = vpop.f32.mrb[16].mxu1 }
 0x27d   :  { %v11218_v18 = vpop.f32.mrb[17].mxu1 }
 0x280   :  { %v11220_v23 = vpop.f32.mrb[18].mxu1 }
 0x281   :  { %v11222_v52 = vpop.f32.mrb[19].mxu1 }
 0x284   :  { %v11224_v54 = vpop.f32.mrb[20].mxu1 }
 0x285   :  { %v11226_v43 = vpop.f32.mrb[21].mxu1 }
 0x288   :  { %v11228_v46 = vpop.f32.mrb[22].mxu1 }
 0x289   :  { %v11230_v55 = vpop.f32.mrb[23].mxu1 }
 0x28c   :  { %v11232_v36 = vpop.f32.mrb[24].mxu1 }
 0x28d   :  { %v11234_v14 = vpop.f32.mrb[25].mxu1 }
 0x290   :  { %v11236_v24 = vpop.f32.mrb[26].mxu1 }
 0x291   :  { %v11238_v62 = vpop.f32.mrb[27].mxu1 }
 0x294   :  { %v11240_v58 = vpop.f32.mrb[28].mxu1 }
 0x295   :  { %v11242_v0 = vpop.f32.mrb[29].mxu1 }
 0x298   :  { %v11244_v30 = vpop.f32.mrb[30].mxu1 }
 0x299   :  { %v11246_v53 = vpop.f32.mrb[31].mxu1 }
 0x29c   :  { %v7660_v51 = vpop.f32.mrb[0].mxu0 }
 0x29d   :  { %v7756_v40 = vadd.f32 %v7660_v51, %v7170_v22  ;;  %v4595_v42 = vpop.f32.mrb[1].mxu0 }
 0x29e   :  { %v7757_v35 = vadd.f32 %v4595_v42, %v2247_v8 }
 0x29f   :  { %v4986_v56 = vmul.f32 %v7756_v40, %v11251_v11 }
 0x2a0   :  { %v4985_v45 = vmul.f32 %v7757_v35, %v11251_v11  ;;  %v7663_v61 = vpop.f32.mrb[2].mxu0 }
 0x2a1   :  { %v11261_v32 = vadd.f32 %v11256_v7, %v4986_v56  ;;  %v7758_v3 = vadd.f32 %v7663_v61, %v7173_v1  ;;  %v4605_v17 = vpop.f32.mrb[3].mxu0 }
 0x2a2   :  { %v11264_v33 = vadd.f32 %v11256_v7, %v4985_v45  ;;  %v7759_v34 = vadd.f32 %v4605_v17, %v2257_v41 }
 0x2a3   :  { %v6224_v60 = vmul.f32 -1.442695, %v11261_v32  ;;  %v4988_v38 = vmul.f32 %v7758_v3, %v11251_v11 }
 0x2a4   :  { %v6223_v50 = vmul.f32 -1.442695, %v11264_v33  ;;  %v4987_v6 = vmul.f32 %v7759_v34, %v11251_v11  ;;  %v7666_v9 = vpop.f32.mrb[4].mxu0 }
 0x2a5   :  { %8268 = vpow2.f32 %v6224_v60  ;;  %v11271_v15 = vadd.f32 %v11256_v7, %v4988_v38  ;;  %v7760_v21 = vadd.f32 %v7666_v9, %v7176_v5  ;;  %v4615_v19 = vpop.f32.mrb[5].mxu0 }
 0x2a6   :  { %8270 = vpow2.f32 %v6223_v50  ;;  %v11274_v25 = vadd.f32 %v11256_v7, %v4987_v6  ;;  %v7761_v31 = vadd.f32 %v4615_v19, %v2267_v28 }
 0x2a7   :  { %v6226_v44 = vmul.f32 -1.442695, %v11271_v15  ;;  %v4990_v2 = vmul.f32 %v7760_v21, %v11251_v11 }
 0x2a8   :  { %v6225_v47 = vmul.f32 -1.442695, %v11274_v25  ;;  %v4989_v48 = vmul.f32 %v7761_v31, %v11251_v11  ;;  %v7669_v20 = vpop.f32.mrb[6].mxu0 }
 0x2a9   :  { %8272 = vpow2.f32 %v6226_v44  ;;  %v11281_v37 = vadd.f32 %v11256_v7, %v4990_v2  ;;  %v7762_v29 = vadd.f32 %v7669_v20, %v7179_v10  ;;  %v4625_v63 = vpop.f32.mrb[7].mxu0 }
 0x2aa   :  { %8274 = vpow2.f32 %v6225_v47  ;;  %v11284_v22 = vadd.f32 %v11256_v7, %v4989_v48  ;;  %v7763_v8 = vadd.f32 %v4625_v63, %v11198_v57 }
 0x2ab   :  { %v6228_v1 = vmul.f32 -1.442695, %v11281_v37  ;;  %v4992_v41 = vmul.f32 %v7762_v29, %v11251_v11 }
 0x2ac   :  { %v6227_v5 = vmul.f32 -1.442695, %v11284_v22  ;;  %v4991_v28 = vmul.f32 %v7763_v8, %v11251_v11  ;;  %v7672_v51 = vpop.f32.mrb[8].mxu0 }
 0x2ad   :  { %8276 = vpow2.f32 %v6228_v1  ;;  %v11292_v40 = vadd.f32 %v11256_v7, %v4992_v41  ;;  %v7764_v10 = vadd.f32 %v7672_v51, %v11200_v39  ;;  %v4635_v42 = vpop.f32.mrb[9].mxu0 }
 0x2ae   :  { %8278 = vpow2.f32 %v6227_v5  ;;  %v11296_v35 = vadd.f32 %v11256_v7, %v4991_v28  ;;  %v7765_v57 = vadd.f32 %v4635_v42, %v11202_v49 }
 0x2af   :  { %v8269_v56 = vpop.eup %8268  ;;  %v6230_v45 = vmul.f32 -1.442695, %v11292_v40  ;;  %v4994_v61 = vmul.f32 %v7764_v10, %v11251_v11 }
 0x2b0   :  { %v8271_v3 = vpop.eup %8270  ;;  %v5313_v17 = vadd.f32 1.0, %v8269_v56  ;;  %v6229_v34 = vmul.f32 -1.442695, %v11296_v35  ;;  %v4993_v60 = vmul.f32 %v7765_v57, %v11251_v11  ;;  %v7675_v38 = vpop.f32.mrb[10].mxu0 }
 0x2b1   :  { %v5312_v39 = vadd.f32 1.0, %v8271_v3  ;;  %8280 = vpow2.f32 %v6230_v45  ;;  %v11304_v50 = vadd.f32 %v11256_v7, %v4994_v61  ;;  %v7766_v6 = vadd.f32 %v7675_v38, %v11204_v4  ;;  %v4645_v49 = vpop.f32.mrb[11].mxu0 }
 0x2b2   :  { %8282 = vrcp.f32 %v5313_v17  ;;  %v11308_v9 = vadd.f32 %v11256_v7, %v4993_v60  ;;  %v7767_v21 = vadd.f32 %v4645_v49, %v11206_v27 }
 0x2b3   :  { %v8273_v19 = vpop.eup %8272  ;;  %8284 = vrcp.f32 %v5312_v39  ;;  %v6232_v31 = vmul.f32 -1.442695, %v11304_v50  ;;  %v4996_v44 = vmul.f32 %v7766_v6, %v11251_v11 }
 0x2b4   :  { %v8275_v2 = vpop.eup %8274  ;;  %v5315_v47 = vadd.f32 1.0, %v8273_v19  ;;  %8286 = vpow2.f32 %v6229_v34  ;;  %v6231_v48 = vmul.f32 -1.442695, %v11308_v9  ;;  %v4995_v4 = vmul.f32 %v7767_v21, %v11251_v11  ;;  %v7678_v20 = vpop.f32.mrb[12].mxu0 }
 0x2b5   :  { %v5314_v29 = vadd.f32 1.0, %v8275_v2  ;;  %8288 = vpow2.f32 %v6232_v31  ;;  %v11316_v63 = vadd.f32 %v11256_v7, %v4996_v44  ;;  %v7768_v27 = vadd.f32 %v7678_v20, %v11208_v13  ;;  %v4655_v8 = vpop.f32.mrb[13].mxu0 }
 0x2b6   :  { %8290 = vrcp.f32 %v5315_v47  ;;  %v11320_v1 = vadd.f32 %v11256_v7, %v4995_v4  ;;  %v7769_v41 = vadd.f32 %v4655_v8, %v11210_v12 }
 0x2b7   :  { %v8277_v5 = vpop.eup %8276  ;;  %8292 = vrcp.f32 %v5314_v29  ;;  %v6234_v28 = vmul.f32 -1.442695, %v11316_v63  ;;  %v4998_v51 = vmul.f32 %v7768_v27, %v11251_v11 }
 0x2b8   :  { %v8279_v10 = vpop.eup %8278  ;;  %v5317_v42 = vadd.f32 1.0, %v8277_v5  ;;  %8294 = vpow2.f32 %v6231_v48  ;;  %v6233_v57 = vmul.f32 -1.442695, %v11320_v1  ;;  %v4997_v13 = vmul.f32 %v7769_v41, %v11251_v11  ;;  %v7681_v56 = vpop.f32.mrb[14].mxu0 }
 0x2b9   :  { %v5316_v45 = vadd.f32 1.0, %v8279_v10  ;;  %8296 = vpow2.f32 %v6234_v28  ;;  %v11328_v61 = vadd.f32 %v11256_v7, %v4998_v51  ;;  %v7770_v12 = vadd.f32 %v7681_v56, %v11212_v59  ;;  %v4665_v3 = vpop.f32.mrb[15].mxu0 }
 0x2ba   :  { %8298 = vrcp.f32 %v5317_v42  ;;  %v11332_v17 = vadd.f32 %v11256_v7, %v4997_v13  ;;  %v7771_v34 = vadd.f32 %v4665_v3, %v11214_v16 }
 0x2bb   :  { %v8281_v60 = vpop.eup %8280  ;;  %8300 = vrcp.f32 %v5316_v45  ;;  %v6236_v38 = vmul.f32 -1.442695, %v11328_v61  ;;  %v5000_v39 = vmul.f32 %v7770_v12, %v11251_v11 }
 0x2bc   :  { %v8283_v6 = vpop.eup %8282  ;;  %v5319_v49 = vadd.f32 1.0, %v8281_v60  ;;  %8302 = vpow2.f32 %v6233_v57  ;;  %v6235_v21 = vmul.f32 -1.442695, %v11332_v17  ;;  %v4999_v59 = vmul.f32 %v7771_v34, %v11251_v11  ;;  %v7684_v19 = vpop.f32.mrb[16].mxu0 }
 0x2bd   :  { %v8285_v31 = vpop.eup %8284  ;;  %v5505_v44 = vmul.f32 %v8283_v6, %v11261_v32  ;;  %8304 = vpow2.f32 %v6236_v38  ;;  %v11341_v16 = vadd.f32 %v11256_v7, %v5000_v39  ;;  %v7772_v2 = vadd.f32 %v7684_v19, %v11216_v26  ;;  %v4675_v47 = vpop.f32.mrb[17].mxu0 }
 0x2be   :  { %v8287_v48 = vpop.eup %8286  ;;  %v5504_v4 = vmul.f32 %v8285_v31, %v11264_v33  ;;  %8306 = vrcp.f32 %v5319_v49  ;;  %v11346_v20 = vadd.f32 %v11256_v7, %v4999_v59  ;;  %v7773_v29 = vadd.f32 %v4675_v47, %v11218_v18 }
 0x2bf   :  { %v8289_v27 = vpop.eup %8288  ;;  %5569 = vst.msk [vmem:[%s11937_s4 + $0x8] sm:$0xff] %vm391_vm2, %v5505_v44  ;;  %v5318_v32 = vadd.f32 1.0, %v8287_v48  ;;  %8308 = vpow2.f32 %v6235_v21  ;;  %v6238_v26 = vmul.f32 -1.442695, %v11341_v16  ;;  %v5002_v8 = vmul.f32 %v7772_v2, %v11251_v11 }
 0x2c0   :  { %v8291_v41 = vpop.eup %8290  ;;  %5568 = vst.msk [vmem:[%s11937_s4] sm:$0xff] %vm391_vm2, %v5504_v4  ;;  %v5321_v33 = vadd.f32 1.0, %v8289_v27  ;;  %v6237_v18 = vmul.f32 -1.442695, %v11346_v20  ;;  %v5001_v5 = vmul.f32 %v7773_v29, %v11251_v11  ;;  %v7687_v28 = vpop.f32.mrb[18].mxu0 }
 0x2c1   :  { %v8293_v51 = vpop.eup %8292  ;;  %v5507_v10 = vmul.f32 %v8291_v41, %v11271_v15  ;;  %8310 = vrcp.f32 %v5318_v32  ;;  %v11363_v42 = vadd.f32 %v11256_v7, %v5002_v8  ;;  %v7774_v57 = vadd.f32 %v7687_v28, %v11220_v23  ;;  %v4685_v13 = vpop.f32.mrb[19].mxu0 }
 0x2c2   :  { %v8295_v56 = vpop.eup %8294  ;;  %v5506_v45 = vmul.f32 %v8293_v51, %v11274_v25  ;;  %8312 = vrcp.f32 %v5321_v33  ;;  %v11368_v12 = vadd.f32 %v11256_v7, %v5001_v5  ;;  %v7775_v3 = vadd.f32 %v4685_v13, %v11222_v52 }
 0x2c3   :  { %v8297_v34 = vpop.eup %8296  ;;  %5571 = vst.msk [vmem:[%s11937_s4 + $0x18] sm:$0xff] %vm391_vm2, %v5507_v10  ;;  %v5320_v15 = vadd.f32 1.0, %v8295_v56  ;;  %8314 = vpow2.f32 %v6238_v26  ;;  %v6240_v23 = vmul.f32 -1.442695, %v11363_v42  ;;  %v5004_v60 = vmul.f32 %v7774_v57, %v11251_v11 }
 0x2c4   :  { %v8299_v38 = vpop.eup %8298  ;;  %5570 = vst.msk [vmem:[%s11937_s4 + $0x10] sm:$0xff] %vm391_vm2, %v5506_v45  ;;  %v5323_v25 = vadd.f32 1.0, %v8297_v34  ;;  %8316 = vpow2.f32 %v6237_v18  ;;  %v6239_v52 = vmul.f32 -1.442695, %v11368_v12  ;;  %v5003_v39 = vmul.f32 %v7775_v3, %v11251_v11  ;;  %v7690_v6 = vpop.f32.mrb[20].mxu0 }
 0x2c5   :  { %v8301_v49 = vpop.eup %8300  ;;  %v5509_v21 = vmul.f32 %v8299_v38, %v11281_v37  ;;  %8318 = vrcp.f32 %v5320_v15  ;;  %v11385_v59 = vadd.f32 %v11256_v7, %v5004_v60  ;;  %v7776_v19 = vadd.f32 %v7690_v6, %v11224_v54  ;;  %v4695_v31 = vpop.f32.mrb[21].mxu0 }
 0x2c6   :  { %v8303_v44 = vpop.eup %8302  ;;  %v5508_v2 = vmul.f32 %v8301_v49, %v11284_v22  ;;  %8320 = vrcp.f32 %v5323_v25  ;;  %v11390_v47 = vadd.f32 %v11256_v7, %v5003_v39  ;;  %v7777_v48 = vadd.f32 %v4695_v31, %v11226_v43 }
 0x2c7   :  { %v8305_v4 = vpop.eup %8304  ;;  %5573 = vst.msk [vmem:[%s11937_s4 + $0x28] sm:$0xff] %vm391_vm2, %v5509_v21  ;;  %v5322_v37 = vadd.f32 1.0, %v8303_v44  ;;  %8322 = vpow2.f32 %v6240_v23  ;;  %v6242_v54 = vmul.f32 -1.442695, %v11385_v59  ;;  %v5006_v29 = vmul.f32 %v7776_v19, %v11251_v11 }
 0x2c8   :  { %v8307_v27 = vpop.eup %8306  ;;  %5572 = vst.msk [vmem:[%s11937_s4 + $0x20] sm:$0xff] %vm391_vm2, %v5508_v2  ;;  %v5325_v22 = vadd.f32 1.0, %v8305_v4  ;;  %8324 = vpow2.f32 %v6239_v52  ;;  %v6241_v43 = vmul.f32 -1.442695, %v11390_v47  ;;  %v5005_v32 = vmul.f32 %v7777_v48, %v11251_v11  ;;  %v7693_v26 = vpop.f32.mrb[22].mxu0 }
 0x2c9   :  { %v8309_v8 = vpop.eup %8308  ;;  %v5511_v41 = vmul.f32 %v8307_v27, %v11292_v40  ;;  %8326 = vrcp.f32 %v5322_v37  ;;  %v11407_v33 = vadd.f32 %v11256_v7, %v5006_v29  ;;  %v7778_v18 = vadd.f32 %v7693_v26, %v11228_v46  ;;  %v4705_v5 = vpop.f32.mrb[23].mxu0 }
 0x2ca   :  { %8328 = vrcp.f32 %v5325_v22  ;;  %v5324_v28 = vadd.f32 1.0, %v8309_v8  ;;  %v11411_v51 = vadd.f32 %v11256_v7, %v5005_v32  ;;  %v7779_v10 = vadd.f32 %v4705_v5, %v11230_v55 }
 0x2cb   :  { %v8311_v57 = vpop.eup %8310  ;;  %5575 = vst.msk [vmem:[%s11937_s4 + $0x38] sm:$0xff] %vm391_vm2, %v5511_v41  ;;  %8330 = vpow2.f32 %v6242_v54  ;;  %v6244_v40 = vmul.f32 -1.442695, %v11407_v33  ;;  %v5008_v13 = vmul.f32 %v7778_v18, %v11251_v11 }
 0x2cc   :  { %v8313_v46 = vpop.eup %8312  ;;  %v5510_v56 = vmul.f32 %v8311_v57, %v11296_v35  ;;  %8332 = vrcp.f32 %v5324_v28  ;;  %v6243_v45 = vmul.f32 -1.442695, %v11411_v51  ;;  %v5007_v3 = vmul.f32 %v7779_v10, %v11251_v11  ;;  %v7696_v55 = vpop.f32.mrb[24].mxu0 }
 0x2cd   :  { %v8315_v34 = vpop.eup %8314  ;;  %v5513_v15 = vmul.f32 %v8313_v46, %v11304_v50  ;;  %8334 = vpow2.f32 %v6241_v43  ;;  %v11425_v23 = vadd.f32 %v11256_v7, %v5008_v13  ;;  %v7780_v60 = vadd.f32 %v7696_v55, %v11232_v36  ;;  %v4715_v38 = vpop.f32.mrb[25].mxu0 }
 0x2ce   :  { %v8317_v25 = vpop.eup %8316  ;;  %5574 = vst.msk [vmem:[%s11937_s4 + $0x30] sm:$0xff] %vm391_vm2, %v5510_v56  ;;  %v5327_v35 = vadd.f32 1.0, %v8315_v34  ;;  %8336 = vpow2.f32 %v6244_v40  ;;  %v11433_v52 = vadd.f32 %v11256_v7, %v5007_v3  ;;  %v7781_v50 = vadd.f32 %v4715_v38, %v11234_v14 }
 0x2cf   :  { %v8319_v39 = vpop.eup %8318  ;;  %5577 = vst.msk [vmem:[%s11937_s4 + $0x48] sm:$0xff] %vm391_vm2, %v5513_v15  ;;  %v5326_v36 = vadd.f32 1.0, %v8317_v25  ;;  %8338 = vpow2.f32 %v6243_v45  ;;  %v6246_v6 = vmul.f32 -1.442695, %v11425_v23  ;;  %v5010_v49 = vmul.f32 %v7780_v60, %v11251_v11 }
 0x2d0   :  { %v8321_v21 = vpop.eup %8320  ;;  %v5512_v19 = vmul.f32 %v8319_v39, %v11308_v9  ;;  %8340 = vrcp.f32 %v5327_v35  ;;  %v6245_v31 = vmul.f32 -1.442695, %v11433_v52  ;;  %v5009_v14 = vmul.f32 %v7781_v50, %v11251_v11  ;;  %v7699_v44 = vpop.f32.mrb[26].mxu0 }
 0x2d1   :  { %v8323_v2 = vpop.eup %8322  ;;  %v5515_v48 = vmul.f32 %v8321_v21, %v11316_v63  ;;  %8342 = vrcp.f32 %v5326_v36  ;;  %v11447_v4 = vadd.f32 %v11256_v7, %v5010_v49  ;;  %v7782_v37 = vadd.f32 %v7699_v44, %v11236_v24  ;;  %v4725_v54 = vpop.f32.mrb[27].mxu0 }
 0x2d2   :  { %v8325_v29 = vpop.eup %8324  ;;  %5576 = vst.msk [vmem:[%s11937_s4 + $0x40] sm:$0xff] %vm391_vm2, %v5512_v19  ;;  %v5329_v9 = vadd.f32 1.0, %v8323_v2  ;;  %8344 = vpow2.f32 %v6246_v6  ;;  %v11455_v27 = vadd.f32 %v11256_v7, %v5009_v14  ;;  %v7783_v63 = vadd.f32 %v4725_v54, %v11238_v62 }
 0x2d3   :  { %v8327_v22 = vpop.eup %8326  ;;  %5579 = vst.msk [vmem:[%s11937_s4 + $0x58] sm:$0xff] %vm391_vm2, %v5515_v48  ;;  %v5328_v24 = vadd.f32 1.0, %v8325_v29  ;;  %8346 = vpow2.f32 %v6245_v31  ;;  %v6248_v43 = vmul.f32 -1.442695, %v11447_v4  ;;  %v5012_v32 = vmul.f32 %v7782_v37, %v11251_v11 }
 0x2d4   :  { %v8329_v26 = vpop.eup %8328  ;;  %v5514_v8 = vmul.f32 %v8327_v22, %v11320_v1  ;;  %8348 = vrcp.f32 %v5329_v9  ;;  %v6247_v41 = vmul.f32 -1.442695, %v11455_v27  ;;  %v5011_v62 = vmul.f32 %v7783_v63, %v11251_v11  ;;  %v7702_v18 = vpop.f32.mrb[28].mxu0 }
 0x2d5   :  { %v8331_v5 = vpop.eup %8330  ;;  %v5517_v28 = vmul.f32 %v8329_v26, %v11328_v61  ;;  %8350 = vrcp.f32 %v5328_v24  ;;  %v11469_v10 = vadd.f32 %v11256_v7, %v5012_v32  ;;  %v7784_v57 = vadd.f32 %v7702_v18, %v11240_v58  ;;  %v4735_v40 = vpop.f32.mrb[29].mxu0 }
 0x2d6   :  { %v8333_v13 = vpop.eup %8332  ;;  %5578 = vst.msk [vmem:[%s11937_s4 + $0x50] sm:$0xff] %vm391_vm2, %v5514_v8  ;;  %v5331_v1 = vadd.f32 1.0, %v8331_v5  ;;  %8352 = vpow2.f32 %v6248_v43  ;;  %v11477_v46 = vadd.f32 %v11256_v7, %v5011_v62  ;;  %v7785_v61 = vadd.f32 %v4735_v40, %v11242_v0 }
 0x2d7   :  { %v8335_v56 = vpop.eup %8334  ;;  %5581 = vst.msk [vmem:[%s11937_s4 + $0x68] sm:$0xff] %vm391_vm2, %v5517_v28  ;;  %v5516_v58 = vmul.f32 %v8333_v13, %v11332_v17  ;;  %8354 = vpow2.f32 %v6247_v41  ;;  %v6250_v45 = vmul.f32 -1.442695, %v11469_v10  ;;  %v5014_v3 = vmul.f32 %v7784_v57, %v11251_v11 }
 0x2d8   :  { %v8337_v55 = vpop.eup %8336  ;;  %8356 = vrcp.f32 %v5331_v1  ;;  %v5330_v34 = vadd.f32 1.0, %v8335_v56  ;;  %v6249_v15 = vmul.f32 -1.442695, %v11477_v46  ;;  %v5013_v0 = vmul.f32 %v7785_v61, %v11251_v11  ;;  %v7705_v60 = vpop.f32.mrb[30].mxu0 }
 0x2d9   :  { %v8339_v38 = vpop.eup %8338  ;;  %5580 = vst.msk [vmem:[%s11937_s4 + $0x60] sm:$0xff] %vm391_vm2, %v5516_v58  ;;  %v5333_v17 = vadd.f32 1.0, %v8337_v55  ;;  %8358 = vpow2.f32 %v6250_v45  ;;  %v11494_v25 = vadd.f32 %v11256_v7, %v5014_v3  ;;  %v7786_v35 = vadd.f32 %v7705_v60, %v11244_v30  ;;  %v4745_v50 = vpop.f32.mrb[31].mxu0 }
 0x2da   :  { %v8341_v39 = vpop.eup %8340  ;;  %8360 = vrcp.f32 %v5330_v34  ;;  %v5332_v36 = vadd.f32 1.0, %v8339_v38  ;;  %v11498_v6 = vadd.f32 %v11256_v7, %v5013_v0  ;;  %v7787_v49 = vadd.f32 %v4745_v50, %v11246_v53 }
 0x2db   :  { %v8343_v21 = vpop.eup %8342  ;;  %v5519_v19 = vmul.f32 %v8341_v39, %v11341_v16  ;;  %8362 = vrcp.f32 %v5333_v17  ;;  %v6252_v31 = vmul.f32 -1.442695, %v11494_v25  ;;  %v5016_v14 = vmul.f32 %v7786_v35, %v11251_v11 }
 0x2dc   :  { %v8345_v44 = vpop.eup %8344  ;;  %v5518_v30 = vmul.f32 %v8343_v21, %v11346_v20  ;;  %8364 = vrcp.f32 %v5332_v36  ;;  %v6251_v2 = vmul.f32 -1.442695, %v11498_v6  ;;  %v5015_v48 = vmul.f32 %v7787_v49, %v11251_v11  ;;  %v7316_v37 = vpop.f32.mrb[32].mxu1 }
 0x2dd   :  { %v7708_v54 = vpop.f32.mrb[32].mxu0  ;;  %v8347_v29 = vpop.eup %8346  ;;  %5583 = vst.msk [vmem:[%s11937_s4 + $0x78] sm:$0xff] %vm391_vm2, %v5519_v19  ;;  %v5335_v53 = vadd.f32 1.0, %v8345_v44  ;;  %8366 = vpow2.f32 %v6249_v15  ;;  %v11512_v16 = vadd.f32 %v11256_v7, %v5016_v14 }
 0x2de   :  { %v7788_v9 = vadd.f32 %v7708_v54, %v7316_v37  ;;  %v2879_v20 = vpop.f32.mrb[33].mxu1  ;;  %v4755_v63 = vpop.f32.mrb[33].mxu0  ;;  %5582 = vst.msk [vmem:[%s11937_s4 + $0x70] sm:$0xff] %vm391_vm2, %v5518_v30  ;;  %v5334_v24 = vadd.f32 1.0, %v8347_v29  ;;  %8368 = vpow2.f32 %v6252_v31  ;;  %v11519_v43 = vadd.f32 %v11256_v7, %v5015_v48 }
 0x2df   :  { %v8349_v22 = vpop.eup %8348  ;;  %v7789_v32 = vadd.f32 %v4755_v63, %v2879_v20  ;;  %8370 = vrcp.f32 %v5335_v53  ;;  %v6254_v41 = vmul.f32 -1.442695, %v11512_v16 }
 0x2e0   :  { %v8351_v26 = vpop.eup %8350  ;;  %v5521_v8 = vmul.f32 %v8349_v22, %v11363_v42  ;;  %v5018_v62 = vmul.f32 %v7788_v9, %v11251_v11  ;;  %8372 = vrcp.f32 %v5334_v24  ;;  %v6253_v28 = vmul.f32 -1.442695, %v11519_v43  ;;  %v7319_v40 = vpop.f32.mrb[34].mxu1 }
 0x2e1   :  { %v8353_v18 = vpop.eup %8352  ;;  %v5520_v5 = vmul.f32 %v8351_v26, %v11368_v12  ;;  %v5017_v57 = vmul.f32 %v7789_v32, %v11251_v11  ;;  %v7711_v13 = vpop.f32.mrb[34].mxu0  ;;  %8374 = vpow2.f32 %v6251_v2 }
 0x2e2   :  { %v8355_v1 = vpop.eup %8354  ;;  %5585 = vst.msk [vmem:[%s11937_s4 + $0x88] sm:$0xff] %vm391_vm2, %v5521_v8  ;;  %v5337_v42 = vadd.f32 1.0, %v8353_v18  ;;  %v11532_v61 = vadd.f32 %v11256_v7, %v5018_v62  ;;  %v7790_v56 = vadd.f32 %v7711_v13, %v7319_v40  ;;  %v2889_v12 = vpop.f32.mrb[35].mxu1  ;;  %8376 = vpow2.f32 %v6254_v41 }
 0x2e3   :  { %v4765_v58 = vpop.f32.mrb[35].mxu0  ;;  %v8357_v45 = vpop.eup %8356  ;;  %5584 = vst.msk [vmem:[%s11937_s4 + $0x80] sm:$0xff] %vm391_vm2, %v5520_v5  ;;  %v5336_v3 = vadd.f32 1.0, %v8355_v1  ;;  %v11539_v55 = vadd.f32 %v11256_v7, %v5017_v57 }
 0x2e4   :  { %v7791_v34 = vadd.f32 %v4765_v58, %v2889_v12  ;;  %v8359_v15 = vpop.eup %8358  ;;  %v5523_v0 = vmul.f32 %v8357_v45, %v11385_v59  ;;  %8378 = vrcp.f32 %v5337_v42  ;;  %v6256_v60 = vmul.f32 -1.442695, %v11532_v61  ;;  %v7322_v36 = vpop.f32.mrb[36].mxu1 }
 0x2e5   :  { %v5020_v38 = vmul.f32 %v7790_v56, %v11251_v11  ;;  %v8361_v17 = vpop.eup %8360  ;;  %8380 = vrcp.f32 %v5336_v3  ;;  %v5339_v35 = vadd.f32 1.0, %v8359_v15  ;;  %v6255_v50 = vmul.f32 -1.442695, %v11539_v55  ;;  %v7714_v49 = vpop.f32.mrb[36].mxu0 }
 0x2e6   :  { %v5019_v39 = vmul.f32 %v7791_v34, %v11251_v11  ;;  %v8363_v21 = vpop.eup %8362  ;;  %5587 = vst.msk [vmem:[%s11937_s4 + $0x98] sm:$0xff] %vm391_vm2, %v5523_v0  ;;  %v5522_v59 = vmul.f32 %v8361_v17, %v11390_v47  ;;  %8382 = vpow2.f32 %v6253_v28  ;;  %v7792_v31 = vadd.f32 %v7714_v49, %v7322_v36  ;;  %v2899_v14 = vpop.f32.mrb[37].mxu1 }
 0x2e7   :  { %v11552_v19 = vadd.f32 %v11256_v7, %v5020_v38  ;;  %v4775_v44 = vpop.f32.mrb[37].mxu0  ;;  %v8365_v30 = vpop.eup %8364  ;;  %v5525_v2 = vmul.f32 %v8363_v21, %v11407_v33  ;;  %8384 = vrcp.f32 %v5339_v35 }
 0x2e8   :  { %v11556_v48 = vadd.f32 %v11256_v7, %v5019_v39  ;;  %v7793_v37 = vadd.f32 %v4775_v44, %v2899_v14  ;;  %v8367_v54 = vpop.eup %8366  ;;  %5586 = vst.msk [vmem:[%s11937_s4 + $0x90] sm:$0xff] %vm391_vm2, %v5522_v59  ;;  %v5524_v47 = vmul.f32 %v8365_v30, %v11411_v51  ;;  %8386 = vpow2.f32 %v6256_v60  ;;  %v7325_v22 = vpop.f32.mrb[38].mxu1 }
 0x2e9   :  { %v6258_v29 = vmul.f32 -1.442695, %v11552_v19  ;;  %v5022_v53 = vmul.f32 %v7792_v31, %v11251_v11  ;;  %v8369_v9 = vpop.eup %8368  ;;  %5589 = vst.msk [vmem:[%s11937_s4 + $0xa8] sm:$0xff] %vm391_vm2, %v5525_v2  ;;  %v5338_v33 = vadd.f32 1.0, %v8367_v54  ;;  %8388 = vpow2.f32 %v6255_v50  ;;  %v7717_v24 = vpop.f32.mrb[38].mxu0 }
 0x2ea   :  { %v6257_v20 = vmul.f32 -1.442695, %v11556_v48  ;;  %v5021_v63 = vmul.f32 %v7793_v37, %v11251_v11  ;;  %v8371_v51 = vpop.eup %8370  ;;  %5588 = vst.msk [vmem:[%s11937_s4 + $0xa0] sm:$0xff] %vm391_vm2, %v5524_v47  ;;  %v5341_v32 = vadd.f32 1.0, %v8369_v9  ;;  %v7794_v8 = vadd.f32 %v7717_v24, %v7325_v22  ;;  %v2909_v41 = vpop.f32.mrb[39].mxu1 }
 0x2eb   :  { %8390 = vpow2.f32 %v6258_v29  ;;  %v11576_v26 = vadd.f32 %v11256_v7, %v5022_v53  ;;  %v4785_v62 = vpop.f32.mrb[39].mxu0  ;;  %v8373_v18 = vpop.eup %8372  ;;  %v5527_v5 = vmul.f32 %v8371_v51, %v11425_v23 }
 0x2ec   :  { %8392 = vrcp.f32 %v5338_v33  ;;  %v11580_v28 = vadd.f32 %v11256_v7, %v5021_v63  ;;  %v7795_v57 = vadd.f32 %v4785_v62, %v2909_v41  ;;  %v8375_v40 = vpop.eup %8374  ;;  %v5526_v13 = vmul.f32 %v8373_v18, %v11433_v52  ;;  %v7328_v45 = vpop.f32.mrb[40].mxu1 }
 0x2ed   :  { %8394 = vrcp.f32 %v5341_v32  ;;  %v6260_v1 = vmul.f32 -1.442695, %v11576_v26  ;;  %v5024_v42 = vmul.f32 %v7794_v8, %v11251_v11  ;;  %v8377_v56 = vpop.eup %8376  ;;  %5591 = vst.msk [vmem:[%s11937_s4 + $0xb8] sm:$0xff] %vm391_vm2, %v5527_v5  ;;  %v5340_v23 = vadd.f32 1.0, %v8375_v40  ;;  %v7720_v3 = vpop.f32.mrb[40].mxu0 }
 0x2ee   :  { %8396 = vpow2.f32 %v6257_v20  ;;  %v6259_v12 = vmul.f32 -1.442695, %v11580_v28  ;;  %v5023_v58 = vmul.f32 %v7795_v57, %v11251_v11  ;;  %v8379_v52 = vpop.eup %8378  ;;  %5590 = vst.msk [vmem:[%s11937_s4 + $0xb0] sm:$0xff] %vm391_vm2, %v5526_v13  ;;  %v5343_v34 = vadd.f32 1.0, %v8377_v56  ;;  %v2919_v60 = vpop.f32.mrb[41].mxu1 }
 0x2ef   :  { %8398 = vpow2.f32 %v6260_v1  ;;  %v11596_v15 = vadd.f32 %v11256_v7, %v5024_v42  ;;  %v7796_v0 = vadd.f32 %v7720_v3, %v7328_v45  ;;  %v4795_v38 = vpop.f32.mrb[41].mxu0  ;;  %v8381_v17 = vpop.eup %8380  ;;  %v5529_v35 = vmul.f32 %v8379_v52, %v11447_v4 }
 0x2f0   :  { %8400 = vrcp.f32 %v5340_v23  ;;  %v11600_v50 = vadd.f32 %v11256_v7, %v5023_v58  ;;  %v7797_v39 = vadd.f32 %v4795_v38, %v2919_v60  ;;  %v8383_v36 = vpop.eup %8382  ;;  %v5528_v49 = vmul.f32 %v8381_v17, %v11455_v27  ;;  %v7331_v30 = vpop.f32.mrb[42].mxu1 }
 0x2f1   :  { %8402 = vrcp.f32 %v5343_v34  ;;  %v6262_v21 = vmul.f32 -1.442695, %v11596_v15  ;;  %v5026_v59 = vmul.f32 %v7796_v0, %v11251_v11  ;;  %v8385_v31 = vpop.eup %8384  ;;  %5593 = vst.msk [vmem:[%s11937_s4 + $0xc8] sm:$0xff] %vm391_vm2, %v5529_v35  ;;  %v5342_v4 = vadd.f32 1.0, %v8383_v36  ;;  %v7723_v2 = vpop.f32.mrb[42].mxu0 }
 0x2f2   :  { %8404 = vpow2.f32 %v6259_v12  ;;  %v6261_v14 = vmul.f32 -1.442695, %v11600_v50  ;;  %v5025_v44 = vmul.f32 %v7797_v39, %v11251_v11  ;;  %v8387_v27 = vpop.eup %8386  ;;  %5592 = vst.msk [vmem:[%s11937_s4 + $0xc0] sm:$0xff] %vm391_vm2, %v5528_v49  ;;  %v5531_v37 = vmul.f32 %v8385_v31, %v11469_v10  ;;  %v2929_v29 = vpop.f32.mrb[43].mxu1 }
 0x2f3   :  { %8406 = vpow2.f32 %v6262_v21  ;;  %v11617_v54 = vadd.f32 %v11256_v7, %v5026_v59  ;;  %v7798_v47 = vadd.f32 %v7723_v2, %v7331_v30  ;;  %v4805_v53 = vpop.f32.mrb[43].mxu0  ;;  %v8389_v9 = vpop.eup %8388  ;;  %v5345_v33 = vadd.f32 1.0, %v8387_v27 }
 0x2f4   :  { %8408 = vrcp.f32 %v5342_v4  ;;  %v11620_v20 = vadd.f32 %v11256_v7, %v5025_v44  ;;  %v7799_v63 = vadd.f32 %v4805_v53, %v2929_v29  ;;  %5595 = vst.msk [vmem:[%s11937_s4 + $0xd8] sm:$0xff] %vm391_vm2, %v5531_v37  ;;  %v5344_v10 = vadd.f32 1.0, %v8389_v9  ;;  %v7334_v18 = vpop.f32.mrb[44].mxu1  ;;  %v7726_v5 = vpop.f32.mrb[44].mxu0 }
 0x2f5   :  { %v8391_v22 = vpop.eup %8390  ;;  %8410 = vpow2.f32 %v6261_v14  ;;  %v6264_v24 = vmul.f32 -1.442695, %v11617_v54  ;;  %v5028_v51 = vmul.f32 %v7798_v47, %v11251_v11  ;;  %v7800_v1 = vadd.f32 %v7726_v5, %v7334_v18  ;;  %v2939_v42 = vpop.f32.mrb[45].mxu1 }
 0x2f6   :  { %v8393_v32 = vpop.eup %8392  ;;  %8412 = vrcp.f32 %v5345_v33  ;;  %v5347_v8 = vadd.f32 1.0, %v8391_v22  ;;  %v6263_v41 = vmul.f32 -1.442695, %v11620_v20  ;;  %v5027_v62 = vmul.f32 %v7799_v63, %v11251_v11  ;;  %v4815_v56 = vpop.f32.mrb[45].mxu0 }
 0x2f7   :  { %v8395_v57 = vpop.eup %8394  ;;  %v5530_v40 = vmul.f32 %v8393_v32, %v11477_v46  ;;  %8414 = vrcp.f32 %v5344_v10  ;;  %v11632_v13 = vadd.f32 %v11256_v7, %v5028_v51  ;;  %v7801_v45 = vadd.f32 %v4815_v56, %v2939_v42 }
 0x2f8   :  { %v8397_v23 = vpop.eup %8396  ;;  %v5533_v12 = vmul.f32 %v8395_v57, %v11494_v25  ;;  %8416 = vrcp.f32 %v5347_v8  ;;  %v11636_v58 = vadd.f32 %v11256_v7, %v5027_v62  ;;  %v5030_v34 = vmul.f32 %v7800_v1, %v11251_v11  ;;  %v7337_v17 = vpop.f32.mrb[46].mxu1  ;;  %v11677_v62 = vld [vmem:[%s11936_s3] ss:$0 sm:$0xff] }
 0x2f9   :  { %v8399_v3 = vpop.eup %8398  ;;  %5594 = vst.msk [vmem:[%s11937_s4 + $0xd0] sm:$0xff] %vm391_vm2, %v5530_v40  ;;  %v5346_v46 = vadd.f32 1.0, %v8397_v23  ;;  %8418 = vpow2.f32 %v6264_v24  ;;  %v6266_v52 = vmul.f32 -1.442695, %v11632_v13  ;;  %v5029_v38 = vmul.f32 %v7801_v45, %v11251_v11  ;;  %v7729_v35 = vpop.f32.mrb[46].mxu0 }
 0x2fa   :  { %v8401_v0 = vpop.eup %8400  ;;  %5597 = vst.msk [vmem:[%s11937_s4 + $0xe8] sm:$0xff] %vm391_vm2, %v5533_v12  ;;  %v5349_v25 = vadd.f32 1.0, %v8399_v3  ;;  %8420 = vpow2.f32 %v6263_v41  ;;  %v6265_v60 = vmul.f32 -1.442695, %v11636_v58  ;;  %v11652_v49 = vadd.f32 %v11256_v7, %v5030_v34  ;;  %v2949_v59 = vpop.f32.mrb[47].mxu1 }
 0x2fb   :  { %v8403_v39 = vpop.eup %8402  ;;  %v5532_v36 = vmul.f32 %v8401_v0, %v11498_v6  ;;  %8422 = vrcp.f32 %v5346_v46  ;;  %v7802_v21 = vadd.f32 %v7729_v35, %v7337_v17  ;;  %v4825_v31 = vpop.f32.mrb[47].mxu0  ;;  %v11656_v44 = vadd.f32 %v11256_v7, %v5029_v38  ;;  %v11691_v57 = vld [vmem:[%s11935_s2] ss:$0 sm:$0xff] }
 0x2fc   :  { %v8405_v4 = vpop.eup %8404  ;;  %v5535_v14 = vmul.f32 %v8403_v39, %v11512_v16  ;;  %8424 = vrcp.f32 %v5349_v25  ;;  %v7803_v30 = vadd.f32 %v4825_v31, %v2949_v59  ;;  %v6268_v27 = vmul.f32 -1.442695, %v11652_v49  ;;  %v7340_v9 = vpop.f32.mrb[48].mxu1 }
 0x2fd   :  { %v8407_v2 = vpop.eup %8406  ;;  %5596 = vst.msk [vmem:[%s11937_s4 + $0xe0] sm:$0xff] %vm391_vm2, %v5532_v36  ;;  %v5348_v6 = vadd.f32 1.0, %v8405_v4  ;;  %8426 = vpow2.f32 %v6266_v52  ;;  %v5032_v37 = vmul.f32 %v7802_v21, %v11251_v11  ;;  %v6267_v29 = vmul.f32 -1.442695, %v11656_v44  ;;  %v7732_v33 = vpop.f32.mrb[48].mxu0 }
 0x2fe   :  { %v8409_v47 = vpop.eup %8408  ;;  %5599 = vst.msk [vmem:[%s11937_s4 + $0xf8] sm:$0xff] %vm391_vm2, %v5535_v14  ;;  %v5351_v16 = vadd.f32 1.0, %v8407_v2  ;;  %8428 = vpow2.f32 %v6265_v60  ;;  %v5031_v53 = vmul.f32 %v7803_v30, %v11251_v11  ;;  %v7804_v24 = vadd.f32 %v7732_v33, %v7340_v9  ;;  %v2959_v51 = vpop.f32.mrb[49].mxu1 }
 0x2ff   :  { %v8411_v63 = vpop.eup %8410  ;;  %v5534_v22 = vmul.f32 %v8409_v47, %v11519_v43  ;;  %8430 = vrcp.f32 %v5348_v6  ;;  %v11672_v10 = vadd.f32 %v11256_v7, %v5032_v37  ;;  %v4835_v32 = vpop.f32.mrb[49].mxu0 }
 0x300   :  { %v8413_v8 = vpop.eup %8412  ;;  %8432 = vrcp.f32 %v5351_v16  ;;  %v5350_v41 = vadd.f32 1.0, %v8411_v63  ;;  %v11680_v11 = vadd.f32 %v11677_v62, %v5031_v53  ;;  %v7805_v18 = vadd.f32 %v4835_v32, %v2959_v51  ;;  %v7343_v12 = vpop.f32.mrb[50].mxu1 }
 0x301   :  { %v8415_v43 = vpop.eup %8414  ;;  %5598 = vst.msk [vmem:[%s11937_s4 + $0xf0] sm:$0xff] %vm391_vm2, %v5534_v22  ;;  %v5537_v7 = vmul.f32 %v8413_v8, %v11532_v61  ;;  %8434 = vpow2.f32 %v6268_v27  ;;  %v6270_v5 = vmul.f32 -1.442695, %v11672_v10  ;;  %v5034_v40 = vmul.f32 %v11691_v57, %v7804_v24  ;;  %v7735_v61 = vpop.f32.mrb[50].mxu0 }
 0x302   :  { %v8417_v1 = vpop.eup %8416  ;;  %v5536_v42 = vmul.f32 %v8415_v43, %v11539_v55  ;;  %8436 = vrcp.f32 %v5350_v41  ;;  %v6269_v56 = vmul.f32 -1.442695, %v11680_v11  ;;  %v5033_v23 = vmul.f32 %v11691_v57, %v7805_v18  ;;  %v2969_v52 = vpop.f32.mrb[51].mxu1 }
 0x303   :  { %v8419_v45 = vpop.eup %8418  ;;  %5601 = vst.msk [vmem:[%s11937_s4 + $0x108] sm:$0xff] %vm391_vm2, %v5537_v7  ;;  %v5539_v3 = vmul.f32 %v8417_v1, %v11552_v19  ;;  %8438 = vpow2.f32 %v6267_v29  ;;  %v11703_v46 = vadd.f32 %v11677_v62, %v5034_v40  ;;  %v7806_v55 = vadd.f32 %v7735_v61, %v7343_v12  ;;  %v4845_v34 = vpop.f32.mrb[51].mxu0 }
 0x304   :  { %v8421_v0 = vpop.eup %8420  ;;  %5600 = vst.msk [vmem:[%s11937_s4 + $0x100] sm:$0xff] %vm391_vm2, %v5536_v42  ;;  %v5353_v25 = vadd.f32 1.0, %v8419_v45  ;;  %8440 = vpow2.f32 %v6270_v5  ;;  %v11710_v60 = vadd.f32 %v11677_v62, %v5033_v23  ;;  %v7807_v38 = vadd.f32 %v4845_v34, %v2969_v52  ;;  %v7346_v4 = vpop.f32.mrb[52].mxu1 }
 0x305   :  { %v8423_v19 = vpop.eup %8422  ;;  %5603 = vst.msk [vmem:[%s11937_s4 + $0x118] sm:$0xff] %vm391_vm2, %v5539_v3  ;;  %v5352_v17 = vadd.f32 1.0, %v8421_v0  ;;  %8442 = vpow2.f32 %v6269_v56  ;;  %v6272_v35 = vmul.f32 -1.442695, %v11703_v46  ;;  %v5036_v39 = vmul.f32 %v11691_v57, %v7806_v55  ;;  %v7738_v14 = vpop.f32.mrb[52].mxu0 }
 0x306   :  { %v8425_v36 = vpop.eup %8424  ;;  %v5538_v21 = vmul.f32 %v8423_v19, %v11556_v48  ;;  %8444 = vrcp.f32 %v5353_v25  ;;  %v6271_v59 = vmul.f32 -1.442695, %v11710_v60  ;;  %v5035_v31 = vmul.f32 %v11691_v57, %v7807_v38  ;;  %v2979_v37 = vpop.f32.mrb[53].mxu1 }
 0x307   :  { %v8427_v30 = vpop.eup %8426  ;;  %v5541_v2 = vmul.f32 %v8425_v36, %v11576_v26  ;;  %8446 = vrcp.f32 %v5352_v17  ;;  %v11723_v6 = vadd.f32 %v11677_v62, %v5036_v39  ;;  %v7808_v27 = vadd.f32 %v7738_v14, %v7346_v4  ;;  %v4855_v47 = vpop.f32.mrb[53].mxu0 }
 0x308   :  { %v8429_v16 = vpop.eup %8428  ;;  %5602 = vst.msk [vmem:[%s11937_s4 + $0x110] sm:$0xff] %vm391_vm2, %v5538_v21  ;;  %v5355_v48 = vadd.f32 1.0, %v8427_v30  ;;  %8448 = vpow2.f32 %v6272_v35  ;;  %v11730_v29 = vadd.f32 %v11677_v62, %v5035_v31  ;;  %v7809_v53 = vadd.f32 %v4855_v47, %v2979_v37  ;;  %v7349_v8 = vpop.f32.mrb[54].mxu1 }
 0x309   :  { %v8431_v26 = vpop.eup %8430  ;;  %5605 = vst.msk [vmem:[%s11937_s4 + $0x128] sm:$0xff] %vm391_vm2, %v5541_v2  ;;  %v5354_v9 = vadd.f32 1.0, %v8429_v16  ;;  %8450 = vpow2.f32 %v6271_v59  ;;  %v6274_v33 = vmul.f32 -1.442695, %v11723_v6  ;;  %v5038_v63 = vmul.f32 %v11691_v57, %v7808_v27  ;;  %v7741_v41 = vpop.f32.mrb[54].mxu0 }
 0x30a   :  { %v8433_v22 = vpop.eup %8432  ;;  %v5540_v24 = vmul.f32 %v8431_v26, %v11580_v28  ;;  %8452 = vrcp.f32 %v5355_v48  ;;  %v6273_v51 = vmul.f32 -1.442695, %v11730_v29  ;;  %v5037_v32 = vmul.f32 %v11691_v57, %v7809_v53  ;;  %v2989_v40 = vpop.f32.mrb[55].mxu1 }
 0x30b   :  { %v8435_v18 = vpop.eup %8434  ;;  %v5543_v43 = vmul.f32 %v8433_v22, %v11596_v15  ;;  %8454 = vrcp.f32 %v5354_v9  ;;  %v11743_v7 = vadd.f32 %v11677_v62, %v5038_v63  ;;  %v7810_v5 = vadd.f32 %v7741_v41, %v7349_v8  ;;  %v4865_v1 = vpop.f32.mrb[55].mxu0 }
 0x30c   :  { %v8437_v42 = vpop.eup %8436  ;;  %5604 = vst.msk [vmem:[%s11937_s4 + $0x120] sm:$0xff] %vm391_vm2, %v5540_v24  ;;  %v5357_v28 = vadd.f32 1.0, %v8435_v18  ;;  %8456 = vpow2.f32 %v6274_v33  ;;  %v11750_v56 = vadd.f32 %v11677_v62, %v5037_v32  ;;  %v7811_v23 = vadd.f32 %v4865_v1, %v2989_v40  ;;  %v7352_v0 = vpop.f32.mrb[56].mxu1 }
 0x30d   :  { %v8439_v15 = vpop.eup %8438  ;;  %5607 = vst.msk [vmem:[%s11937_s4 + $0x138] sm:$0xff] %vm391_vm2, %v5543_v43  ;;  %v5542_v12 = vmul.f32 %v8437_v42, %v11600_v50  ;;  %8458 = vpow2.f32 %v6273_v51  ;;  %v6276_v61 = vmul.f32 -1.442695, %v11743_v7  ;;  %v5040_v45 = vmul.f32 %v11691_v57, %v7810_v5  ;;  %v7744_v25 = vpop.f32.mrb[56].mxu0 }
 0x30e   :  { %v8441_v3 = vpop.eup %8440  ;;  %8460 = vrcp.f32 %v5357_v28  ;;  %v5356_v55 = vadd.f32 1.0, %v8439_v15  ;;  %v6275_v52 = vmul.f32 -1.442695, %v11750_v56  ;;  %v5039_v34 = vmul.f32 %v11691_v57, %v7811_v23  ;;  %v2999_v35 = vpop.f32.mrb[57].mxu1 }
 0x30f   :  { %v8443_v38 = vpop.eup %8442  ;;  %5606 = vst.msk [vmem:[%s11937_s4 + $0x130] sm:$0xff] %vm391_vm2, %v5542_v12  ;;  %v5359_v50 = vadd.f32 1.0, %v8441_v3  ;;  %8462 = vpow2.f32 %v6276_v61  ;;  %v11766_v19 = vadd.f32 %v11677_v62, %v5040_v45  ;;  %v7812_v17 = vadd.f32 %v7744_v25, %v7352_v0  ;;  %v4875_v39 = vpop.f32.mrb[57].mxu0 }
 0x310   :  { %v8445_v36 = vpop.eup %8444  ;;  %8464 = vrcp.f32 %v5356_v55  ;;  %v5358_v21 = vadd.f32 1.0, %v8443_v38  ;;  %v11769_v59 = vadd.f32 %v11677_v62, %v5039_v34  ;;  %v7813_v31 = vadd.f32 %v4875_v39, %v2999_v35  ;;  %v7355_v48 = vpop.f32.mrb[58].mxu1 }
 0x311   :  { %v8447_v4 = vpop.eup %8446  ;;  %v5545_v14 = vmul.f32 %v8445_v36, %v11617_v54  ;;  %8466 = vrcp.f32 %v5359_v50  ;;  %v6278_v30 = vmul.f32 -1.442695, %v11766_v19  ;;  %v5042_v2 = vmul.f32 %v11691_v57, %v7812_v17  ;;  %v7747_v53 = vpop.f32.mrb[58].mxu0 }
 0x312   :  { %v8449_v27 = vpop.eup %8448  ;;  %v5544_v37 = vmul.f32 %v8447_v4, %v11620_v20  ;;  %8468 = vrcp.f32 %v5358_v21  ;;  %v6277_v47 = vmul.f32 -1.442695, %v11769_v59  ;;  %v5041_v16 = vmul.f32 %v11691_v57, %v7813_v31  ;;  %v3009_v20 = vpop.f32.mrb[59].mxu1 }
 0x313   :  { %v8451_v26 = vpop.eup %8450  ;;  %5609 = vst.msk [vmem:[%s11937_s4 + $0x148] sm:$0xff] %vm391_vm2, %v5545_v14  ;;  %v5361_v54 = vadd.f32 1.0, %v8449_v27  ;;  %8470 = vpow2.f32 %v6275_v52  ;;  %v11782_v9 = vadd.f32 %v11677_v62, %v5042_v2  ;;  %v7814_v33 = vadd.f32 %v7747_v53, %v7355_v48  ;;  %v4885_v63 = vpop.f32.mrb[59].mxu0 }
 0x314   :  { %v8453_v22 = vpop.eup %8452  ;;  %5608 = vst.msk [vmem:[%s11937_s4 + $0x140] sm:$0xff] %vm391_vm2, %v5544_v37  ;;  %v5360_v24 = vadd.f32 1.0, %v8451_v26  ;;  %8472 = vpow2.f32 %v6278_v30  ;;  %v11789_v51 = vadd.f32 %v11677_v62, %v5041_v16  ;;  %v7815_v32 = vadd.f32 %v4885_v63, %v3009_v20  ;;  %v7358_v28 = vpop.f32.mrb[60].mxu1 }
 0x315   :  { %v8455_v8 = vpop.eup %8454  ;;  %v5547_v41 = vmul.f32 %v8453_v22, %v11632_v13  ;;  %8474 = vrcp.f32 %v5361_v54  ;;  %v6280_v18 = vmul.f32 -1.442695, %v11782_v9  ;;  %v5044_v43 = vmul.f32 %v11691_v57, %v7814_v33  ;;  %v7750_v23 = vpop.f32.mrb[60].mxu0 }
 0x316   :  { %v8457_v5 = vpop.eup %8456  ;;  %v5546_v40 = vmul.f32 %v8455_v8, %v11636_v58  ;;  %8476 = vrcp.f32 %v5360_v24  ;;  %v6279_v1 = vmul.f32 -1.442695, %v11789_v51  ;;  %v5043_v42 = vmul.f32 %v11691_v57, %v7815_v32  ;;  %v3019_v58 = vpop.f32.mrb[61].mxu1 }
 0x317   :  { %v8459_v15 = vpop.eup %8458  ;;  %5611 = vst.msk [vmem:[%s11937_s4 + $0x158] sm:$0xff] %vm391_vm2, %v5547_v41  ;;  %v5363_v13 = vadd.f32 1.0, %v8457_v5  ;;  %8478 = vpow2.f32 %v6277_v47  ;;  %v11802_v12 = vadd.f32 %v11677_v62, %v5044_v43  ;;  %v7816_v61 = vadd.f32 %v7750_v23, %v7358_v28  ;;  %v4895_v45 = vpop.f32.mrb[61].mxu0 }
 0x318   :  { %v8461_v3 = vpop.eup %8460  ;;  %5610 = vst.msk [vmem:[%s11937_s4 + $0x150] sm:$0xff] %vm391_vm2, %v5546_v40  ;;  %v5362_v55 = vadd.f32 1.0, %v8459_v15  ;;  %8480 = vpow2.f32 %v6280_v18  ;;  %v11809_v52 = vadd.f32 %v11677_v62, %v5043_v42  ;;  %v7817_v34 = vadd.f32 %v4895_v45, %v3019_v58  ;;  %v7361_v21 = vpop.f32.mrb[62].mxu1 }
 0x319   :  { %v8463_v0 = vpop.eup %8462  ;;  %v5549_v25 = vmul.f32 %v8461_v3, %v11652_v49  ;;  %8482 = vrcp.f32 %v5363_v13  ;;  %v6282_v38 = vmul.f32 -1.442695, %v11802_v12  ;;  %v5046_v50 = vmul.f32 %v11691_v57, %v7816_v61  ;;  %v7753_v31 = vpop.f32.mrb[62].mxu0 }
 0x31a   :  { %v8465_v17 = vpop.eup %8464  ;;  %8484 = vrcp.f32 %v5362_v55  ;;  %v5365_v35 = vadd.f32 1.0, %v8463_v0  ;;  %v6281_v39 = vmul.f32 -1.442695, %v11809_v52  ;;  %v5045_v36 = vmul.f32 %v11691_v57, %v7817_v34  ;;  %v3029_v2 = vpop.f32.mrb[63].mxu1 }
 0x31b   :  { %v8467_v4 = vpop.eup %8466  ;;  %5613 = vst.msk [vmem:[%s11937_s4 + $0x168] sm:$0xff] %vm391_vm2, %v5549_v25  ;;  %v5548_v49 = vmul.f32 %v8465_v17, %v11656_v44  ;;  %8486 = vpow2.f32 %v6279_v1  ;;  %v11822_v14 = vadd.f32 %v11677_v62, %v5046_v50  ;;  %v7818_v30 = vadd.f32 %v7753_v31, %v7361_v21  ;;  %v4905_v27 = vpop.f32.mrb[63].mxu0 }
 0x31c   :  { %v8469_v37 = vpop.eup %8468  ;;  %v5551_v47 = vmul.f32 %v8467_v4, %v11672_v10  ;;  %8488 = vrcp.f32 %v5365_v35  ;;  %v11826_v16 = vadd.f32 %v11677_v62, %v5045_v36  ;;  %v7819_v48 = vadd.f32 %v4905_v27, %v3029_v2 }
 0x31d   :  { %v8471_v53 = vpop.eup %8470  ;;  %5612 = vst.msk [vmem:[%s11937_s4 + $0x160] sm:$0xff] %vm391_vm2, %v5548_v49  ;;  %v5550_v44 = vmul.f32 %v8469_v37, %v11680_v11  ;;  %8490 = vpow2.f32 %v6282_v38  ;;  %v6284_v26 = vmul.f32 -1.442695, %v11822_v14  ;;  %v5048_v54 = vmul.f32 %v11691_v57, %v7818_v30 }
 0x31e   :  { %v8473_v33 = vpop.eup %8472  ;;  %5615 = vst.msk [vmem:[%s11937_s4 + $0x178] sm:$0xff] %vm391_vm2, %v5551_v47  ;;  %v5364_v10 = vadd.f32 1.0, %v8471_v53  ;;  %8492 = vpow2.f32 %v6281_v39  ;;  %v6283_v20 = vmul.f32 -1.442695, %v11826_v16  ;;  %v5047_v63 = vmul.f32 %v11691_v57, %v7819_v48 }
 0x31f   :  { %v8475_v22 = vpop.eup %8474  ;;  %5614 = vst.msk [vmem:[%s11937_s4 + $0x170] sm:$0xff] %vm391_vm2, %v5550_v44  ;;  %v5367_v11 = vadd.f32 1.0, %v8473_v33  ;;  %8494 = vpow2.f32 %v6284_v26  ;;  %v11846_v24 = vadd.f32 %v11677_v62, %v5048_v54 }
 0x320   :  { %v8477_v32 = vpop.eup %8476  ;;  %v5553_v8 = vmul.f32 %v8475_v22, %v11703_v46  ;;  %8496 = vrcp.f32 %v5364_v10  ;;  %v11850_v41 = vadd.f32 %v11677_v62, %v5047_v63 }
 0x321   :  { %v8479_v18 = vpop.eup %8478  ;;  %v5552_v57 = vmul.f32 %v8477_v32, %v11710_v60  ;;  %8498 = vrcp.f32 %v5367_v11  ;;  %v6286_v43 = vmul.f32 -1.442695, %v11846_v24 }
 0x322   :  { %v8481_v5 = vpop.eup %8480  ;;  %5617 = vst.msk [vmem:[%s11937_s4 + $0x188] sm:$0xff] %vm391_vm2, %v5553_v8  ;;  %v5366_v40 = vadd.f32 1.0, %v8479_v18  ;;  %8500 = vpow2.f32 %v6283_v20  ;;  %v6285_v46 = vmul.f32 -1.442695, %v11850_v41 }
 0x323   :  { %v8483_v1 = vpop.eup %8482  ;;  %5616 = vst.msk [vmem:[%s11937_s4 + $0x180] sm:$0xff] %vm391_vm2, %v5552_v57  ;;  %v5369_v62 = vadd.f32 1.0, %v8481_v5  ;;  %8502 = vpow2.f32 %v6286_v43 }
 0x324   :  { %v8485_v60 = vpop.eup %8484  ;;  %v5555_v42 = vmul.f32 %v8483_v1, %v11723_v6  ;;  %8504 = vrcp.f32 %v5366_v40 }
 0x325   :  { %v8487_v28 = vpop.eup %8486  ;;  %v5554_v23 = vmul.f32 %v8485_v60, %v11730_v29  ;;  %8506 = vrcp.f32 %v5369_v62 }
 0x326   :  { %v8489_v15 = vpop.eup %8488  ;;  %5619 = vst.msk [vmem:[%s11937_s4 + $0x198] sm:$0xff] %vm391_vm2, %v5555_v42  ;;  %v5368_v13 = vadd.f32 1.0, %v8487_v28  ;;  %8508 = vpow2.f32 %v6285_v46 }
 0x327   :  { %v8491_v61 = vpop.eup %8490  ;;  %5618 = vst.msk [vmem:[%s11937_s4 + $0x190] sm:$0xff] %vm391_vm2, %v5554_v23  ;;  %v5557_v6 = vmul.f32 %v8489_v15, %v11743_v7 }
 0x328   :  { %v8493_v58 = vpop.eup %8492  ;;  %8510 = vrcp.f32 %v5368_v13  ;;  %v5371_v29 = vadd.f32 1.0, %v8491_v61 }
 0x329   :  { %v8495_v45 = vpop.eup %8494  ;;  %5621 = vst.msk [vmem:[%s11937_s4 + $0x1a8] sm:$0xff] %vm391_vm2, %v5557_v6  ;;  %v5370_v3 = vadd.f32 1.0, %v8493_v58 }
 0x32a   :  { %v8497_v55 = vpop.eup %8496  ;;  %8512 = vrcp.f32 %v5371_v29  ;;  %v5373_v34 = vadd.f32 1.0, %v8495_v45 }
 0x32b   :  { %v8499_v0 = vpop.eup %8498  ;;  %v5556_v25 = vmul.f32 %v8497_v55, %v11750_v56  ;;  %8514 = vrcp.f32 %v5370_v3 }
 0x32c   :  { %v8501_v38 = vpop.eup %8500  ;;  %v5559_v7 = vmul.f32 %v8499_v0, %v11766_v19  ;;  %8516 = vrcp.f32 %v5373_v34 }
 0x32d   :  { %v8503_v50 = vpop.eup %8502  ;;  %5620 = vst.msk [vmem:[%s11937_s4 + $0x1a0] sm:$0xff] %vm391_vm2, %v5556_v25  ;;  %v5372_v17 = vadd.f32 1.0, %v8501_v38 }
 0x32e   :  { %v8505_v35 = vpop.eup %8504  ;;  %5623 = vst.msk [vmem:[%s11937_s4 + $0x1b8] sm:$0xff] %vm391_vm2, %v5559_v7  ;;  %v5375_v39 = vadd.f32 1.0, %v8503_v50 }
 0x32f   :  { %v8507_v56 = vpop.eup %8506  ;;  %v5558_v36 = vmul.f32 %v8505_v35, %v11769_v59  ;;  %8518 = vrcp.f32 %v5372_v17 }
 0x330   :  { %v8509_v19 = vpop.eup %8508  ;;  %v5561_v21 = vmul.f32 %v8507_v56, %v11782_v9  ;;  %8520 = vrcp.f32 %v5375_v39 }
 0x331   :  { %5622 = vst.msk [vmem:[%s11937_s4 + $0x1b0] sm:$0xff] %vm391_vm2, %v5558_v36  ;;  %v5374_v31 = vadd.f32 1.0, %v8509_v19 }
 0x332   :  { %v8511_v4 = vpop.eup %8510  ;;  %5625 = vst.msk [vmem:[%s11937_s4 + $0x1c8] sm:$0xff] %vm391_vm2, %v5561_v21 }
 0x333   :  { %v5560_v49 = vmul.f32 %v8511_v4, %v11789_v51  ;;  %8522 = vrcp.f32 %v5374_v31 }
 0x334   :  { %v8513_v59 = vpop.eup %8512 }
 0x335   :  { %v8515_v30 = vpop.eup %8514  ;;  %5624 = vst.msk [vmem:[%s11937_s4 + $0x1c0] sm:$0xff] %vm391_vm2, %v5560_v49  ;;  %v5563_v9 = vmul.f32 %v8513_v59, %v11802_v12 }
 0x336   :  { %v8517_v2 = vpop.eup %8516  ;;  %v5562_v27 = vmul.f32 %v8515_v30, %v11809_v52 }
 0x337   :  { %5627 = vst.msk [vmem:[%s11937_s4 + $0x1d8] sm:$0xff] %vm391_vm2, %v5563_v9  ;;  %v5565_v51 = vmul.f32 %v8517_v2, %v11822_v14 }
 0x338   :  { %5626 = vst.msk [vmem:[%s11937_s4 + $0x1d0] sm:$0xff] %vm391_vm2, %v5562_v27 }
 0x339   :  { %v8519_v37 = vpop.eup %8518  ;;  %5629 = vst.msk [vmem:[%s11937_s4 + $0x1e8] sm:$0xff] %vm391_vm2, %v5565_v51 }
 0x33a   :  { %v8521_v12 = vpop.eup %8520  ;;  %v5564_v52 = vmul.f32 %v8519_v37, %v11826_v16 }
 0x33b   :  { %v5567_v47 = vmul.f32 %v8521_v12, %v11846_v24 }
 0x33c   :  { %5628 = vst.msk [vmem:[%s11937_s4 + $0x1e0] sm:$0xff] %vm391_vm2, %v5564_v52 }
 0x33d   :  { %v8523_v14 = vpop.eup %8522  ;;  %5631 = vst.msk [vmem:[%s11937_s4 + $0x1f8] sm:$0xff] %vm391_vm2, %v5567_v47 }
 0x33e   :  { %v5566_v48 = vmul.f32 %v8523_v14, %v11850_v41 }
 0x340   :  { %5630 = vst.msk [vmem:[%s11937_s4 + $0x1f0] sm:$0xff] %vm391_vm2, %v5566_v48 }

</bundles_post_ra>
